<compile_context>
chip_gen: v7x
topology: tpu7x:2x2x1
jax: 0.10.0
libtpu: 0.0.40
codegen_flags: <defaults>
</compile_context>

<pallas_src>
import math
from functools import partial

import jax
import jax.numpy as jnp
from jax.experimental import pallas as pl
from jax.experimental.pallas import tpu as pltpu


# ----------------------------- module configuration -----------------------------
IN_CHANNELS = 4
OUT_CHANNELS = 128
KERNEL_SHAPE = (3, 3, 3)
STRIDE = (1, 2, 2)
BN_EPS = 1e-3                      # nn.BatchNorm3d(..., eps=0.001)

BATCH = 2
SEQ = 8                            # T
FRAME = 16                         # H = W


def _round_up(x, m):
    return ((x + m - 1) // m) * m


def _compute_pad(dim_size, k, s):
    """TF-style SAME padding, identical to Unit3D.compute_pad."""
    if dim_size % s == 0:
        return max(k - s, 0)
    return max(k - dim_size % s, 0)


# ----------------------------- fused Pallas kernel -----------------------------

def _unit3d_fused_kernel(col_ref, w_ref, gamma_ref, beta_ref, out_ref,
                         sum_ref, ssq_ref, *, count, eps, p_chunk):
    """conv3d (one lane-dense MXU dot per sample) + fused BatchNorm + ReLU.

    col_ref:   (1, K_pad, P)       bf16  im2col slab of the current sample
    w_ref:     (Cout_pad, K_pad)   bf16  packed conv weights (resident)
    gamma_ref: (Cout_pad, 1)       f32   BN scale (resident)
    beta_ref:  (Cout_pad, 1)       f32   BN shift (resident)
    out_ref:   (N, Cout_pad, P)    f32   final output, VMEM-resident across the grid
    sum_ref:   (Cout_pad, 1)       f32   running per-channel sum    (scratch)
    ssq_ref:   (Cout_pad, 1)       f32   running per-channel sum-sq (scratch)
    """
    i = pl.program_id(0)
    last = pl.num_programs(0) - 1

    @pl.when(i == 0)
    def _():
        sum_ref[...] = jnp.zeros_like(sum_ref)
        ssq_ref[...] = jnp.zeros_like(ssq_ref)

    w = w_ref[...]                                        # (Cout_pad, K_pad) bf16
    p_total = col_ref.shape[-1]
    # One MXU dot per 256-column chunk: the taps are folded into K, so there is no
    # tap accumulation and the live f32 result is only ~32 vregs per chunk.
    for c0 in range(0, p_total, p_chunk):
        y = jnp.dot(w, col_ref[0, :, c0:c0 + p_chunk],
                    preferred_element_type=jnp.float32)   # (Cout_pad, p_chunk) f32
        out_ref[i, :, c0:c0 + p_chunk] = y                # lane-dense store
        sum_ref[...] += jnp.sum(y, axis=-1, keepdims=True)
        ssq_ref[...] += jnp.sum(y * y, axis=-1, keepdims=True)

    # Last grid step: batch statistics are complete -> apply BN + ReLU in place; Pallas
    # writes the resident output block back to HBM once after this step.
    @pl.when(i == last)
    def _():
        inv_n = 1.0 / count
        mean = sum_ref[...] * inv_n                                   # (Cout_pad, 1)
        var = jnp.maximum(ssq_ref[...] * inv_n - mean * mean, 0.0)    # biased (training)
        scale = jax.lax.rsqrt(var + eps) * gamma_ref[...]
        shift = beta_ref[...] - mean * scale
        for s in range(out_ref.shape[0]):
            out_ref[s] = jnp.maximum(out_ref[s] * scale + shift, 0.0)


# ----------------------------- params & one-time packing -----------------------------

def init_unit3d_params(key):
    """Parameters in the layout nn.Conv3d / nn.BatchNorm3d would hold."""
    kd, kh, kw = KERNEL_SHAPE
    fan_in = IN_CHANNELS * kd * kh * kw
    bound = 1.0 / math.sqrt(fan_in)            # PyTorch Conv3d default init bound
    w = jax.random.uniform(key, (OUT_CHANNELS, IN_CHANNELS, kd, kh, kw),
                           jnp.float32, -bound, bound)
    gamma = jnp.ones((OUT_CHANNELS,), jnp.float32)
    beta = jnp.zeros((OUT_CHANNELS,), jnp.float32)
    return {"conv_w": w, "bn_gamma": gamma, "bn_beta": beta}


def pack_unit3d_params(params):
    """One-time repack (outside the jitted forward).

    Conv weights (Cout, Cin, kd, kh, kw) f32 -> (Cout_pad, K_pad) bf16 with the taps
    folded into the contraction dim (K = kd*kh*kw*cin = 108 -> K_pad = 128; tap-major,
    cin-minor -- the same order the im2col slab uses).  BN affine params become
    (Cout_pad, 1) f32 columns.
    """
    w = params["conv_w"]
    cout, cin, kd, kh, kw = w.shape
    k = kd * kh * kw * cin
    k_pad = _round_up(k, 128)                  # 108 -> 128: single-pass MXU depth (v5e),
                                               # bf16 sublane-pair aligned (v6e/v7x)
    cout_p = _round_up(cout, 8)
    wp = jnp.transpose(w, (0, 2, 3, 4, 1)).reshape(cout, k)
    wp = jnp.pad(wp, ((0, cout_p - cout), (0, k_pad - k)))
    gamma = jnp.pad(params["bn_gamma"], (0, cout_p - cout), constant_values=1.0)
    beta = jnp.pad(params["bn_beta"], (0, cout_p - cout))
    return {"w": wp.astype(jnp.bfloat16),
            "gamma": gamma[:, None],
            "beta": beta[:, None]}


# ----------------------------- forward -----------------------------

def unit3d_forward(packed, x_ncdhw):
    kd, kh, kw = KERNEL_SHAPE
    sd, sh, sw = STRIDE
    n, cin, t, h, w = x_ncdhw.shape
    cout_p, k_pad = packed["w"].shape
    k = kd * kh * kw * cin

    # ---- TF-SAME padding (Unit3D.compute_pad); all static python ints ----
    pad_t = _compute_pad(t, kd, sd)
    pad_h = _compute_pad(h, kh, sh)
    pad_w = _compute_pad(w, kw, sw)
    x = jnp.pad(x_ncdhw.astype(jnp.bfloat16),
                ((0, 0), (0, 0),
                 (pad_t // 2, pad_t - pad_t // 2),
                 (pad_h // 2, pad_h - pad_h // 2),
                 (pad_w // 2, pad_w - pad_w // 2)))
    dp, hp, wp_ = t + pad_t, h + pad_h, w + pad_w
    od = (dp - kd) // sd + 1
    oh = (hp - kh) // sh + 1
    ow = (wp_ - kw) // sw + 1
    p_rows = od * oh * ow

    # ---- im2col layout plumbing (XLA side, ~200 KB at this size): fold the 27 taps
    # into the contraction dim so every kernel operand is lane-dense and one MXU dot
    # per sample does the whole conv.  Order: tap-major, cin-minor (matches weights).
    parts = []
    for dk in range(kd):
        for hk in range(kh):
            for wk in range(kw):
                win = x[:, :,
                        dk:dk + (od - 1) * sd + 1:sd,
                        hk:hk + (oh - 1) * sh + 1:sh,
                        wk:wk + (ow - 1) * sw + 1:sw]
                parts.append(win.reshape(n, cin, p_rows))
    col = jnp.concatenate(parts, axis=1)                   # (n, K, P) bf16
    col = jnp.pad(col, ((0, 0), (0, k_pad - k), (0, 0)))   # (n, K_pad, P)

    # chunk the per-sample dot over output columns to bound live vregs (~32 / chunk)
    if p_rows % 256 == 0:
        p_chunk = 256
    elif p_rows % 128 == 0:
        p_chunk = 128
    else:
        p_chunk = p_rows

    # Single fused pallas_call: conv + BN stats + BN apply + ReLU, one HBM write.
    # grid=(n,) is "arbitrary": the output block and the BN statistics are carried
    # across grid steps (the BN reduction spans the whole batch).
    out = pl.pallas_call(
        partial(_unit3d_fused_kernel, count=float(n * p_rows), eps=BN_EPS,
                p_chunk=p_chunk),
        grid=(n,),
        in_specs=[
            pl.BlockSpec((1, k_pad, p_rows), lambda i: (i, 0, 0)),   # per-sample im2col
            pl.BlockSpec((cout_p, k_pad), lambda i: (0, 0)),         # weights (resident)
            pl.BlockSpec((cout_p, 1), lambda i: (0, 0)),             # gamma  (resident)
            pl.BlockSpec((cout_p, 1), lambda i: (0, 0)),             # beta   (resident)
        ],
        out_specs=pl.BlockSpec((n, cout_p, p_rows), lambda i: (0, 0, 0)),
        out_shape=jax.ShapeDtypeStruct((n, cout_p, p_rows), jnp.float32),
        scratch_shapes=[pltpu.VMEM((cout_p, 1), jnp.float32),
                        pltpu.VMEM((cout_p, 1), jnp.float32)],
        compiler_params=pltpu.CompilerParams(dimension_semantics=("arbitrary",)),
    )(col, packed["w"], packed["gamma"], packed["beta"])

    # Channel-major kernel output == NCDHW after a free reshape (no transpose).
    return out[:, :OUT_CHANNELS, :].reshape(n, OUT_CHANNELS, od, oh, ow)


if __name__ == "__main__":
    key = jax.random.PRNGKey(0)
    kp, kx = jax.random.split(key)

    params = init_unit3d_params(kp)
    packed = pack_unit3d_params(params)        # one-time, outside the jitted forward

    x = jax.random.normal(kx, (BATCH, IN_CHANNELS, SEQ, FRAME, FRAME), jnp.float32)

    fwd = jax.jit(unit3d_forward)
    out = jax.block_until_ready(fwd(packed, x))

    sd, sh, sw = STRIDE
    expect = (BATCH, OUT_CHANNELS, -(-SEQ // sd), -(-FRAME // sh), -(-FRAME // sw))
    assert out.shape == expect, (out.shape, expect)
    assert bool(jnp.all(jnp.isfinite(out)))
    assert bool(jnp.all(out >= 0.0))           # ReLU output

    # Reference (same bf16 MXU operand precision): conv3d + training-mode BN + ReLU.
    kd, kh, kw = KERNEL_SHAPE
    pads = [(p // 2, p - p // 2) for p in (_compute_pad(SEQ, kd, sd),
                                           _compute_pad(FRAME, kh, sh),
                                           _compute_pad(FRAME, kw, sw))]
    ref = jax.lax.conv_general_dilated(
        x.astype(jnp.bfloat16), params["conv_w"].astype(jnp.bfloat16),
        window_strides=STRIDE, padding=pads,
        dimension_numbers=("NCDHW", "OIDHW", "NCDHW"),
        preferred_element_type=jnp.float32)
    mean = ref.mean(axis=(0, 2, 3, 4), keepdims=True)
    var = ref.var(axis=(0, 2, 3, 4), keepdims=True)
    ref = jnp.maximum((ref - mean) * jax.lax.rsqrt(var + BN_EPS), 0.0)  # gamma=1, beta=0
    assert bool(jnp.allclose(out, ref, rtol=2e-2, atol=2e-2)), \
        float(jnp.max(jnp.abs(out - ref)))

    print("KERNEL_OK")
</pallas_src>

<mosaic_0001>
module attributes {stable_mosaic.version = 11 : i64} {
  func.func @_unit3d_fused_kernel(%arg0: i32, %arg1: memref<1x128x512xbf16, #tpu.memory_space<vmem>>, %arg2: memref<128x128xbf16, #tpu.memory_space<vmem>>, %arg3: memref<128x1xf32, #tpu.memory_space<vmem>>, %arg4: memref<128x1xf32, #tpu.memory_space<vmem>>, %arg5: memref<2x128x512xf32, #tpu.memory_space<vmem>>, %arg6: memref<128x1xf32, #tpu.memory_space<vmem>>, %arg7: memref<128x1xf32, #tpu.memory_space<vmem>>) attributes {dimension_semantics = [#tpu.dimension_semantics<arbitrary>], iteration_bounds = array<i64: 2>, scalar_prefetch = 0 : i64, scratch_operands = 2 : i64, tpu.core_type = #tpu.core_type<tc>, window_params = [{transform_indices = @transform_0, window_bounds = array<i64: 1, 128, 512>}, {pipeline_mode = #tpu.pipeline_mode<synchronous>, transform_indices = @transform_1, window_bounds = array<i64: 128, 128>}, {pipeline_mode = #tpu.pipeline_mode<synchronous>, transform_indices = @transform_2, window_bounds = array<i64: 128, 1>}, {pipeline_mode = #tpu.pipeline_mode<synchronous>, transform_indices = @transform_3, window_bounds = array<i64: 128, 1>}, {pipeline_mode = #tpu.pipeline_mode<synchronous>, transform_indices = @transform_4, window_bounds = array<i64: 2, 128, 512>}]} {
    %c0_i32 = arith.constant 0 : i32
    %0 = arith.cmpi eq, %arg0, %c0_i32 : i32
    %1 = arith.extui %0 : i1 to i32
    %c0_i32_0 = arith.constant 0 : i32
    %2 = arith.cmpi ne, %1, %c0_i32_0 : i32
    scf.if %2 {
      %cst_33 = arith.constant 0.000000e+00 : f32
      %43 = vector.broadcast %cst_33 : f32 to vector<128x1xf32>
      %c0_34 = arith.constant 0 : index
      %c0_35 = arith.constant 0 : index
      %44 = vector.load %arg6[%c0_34, %c0_35] : memref<128x1xf32, #tpu.memory_space<vmem>>, vector<128x1xf32>
      tpu.vector_store %arg6[%c0_34, %c0_35], %43 {strides = array<i32>} : memref<128x1xf32, #tpu.memory_space<vmem>>, vector<128x1xf32>,
      %cst_36 = arith.constant 0.000000e+00 : f32
      %45 = vector.broadcast %cst_36 : f32 to vector<128x1xf32>
      %c0_37 = arith.constant 0 : index
      %c0_38 = arith.constant 0 : index
      %46 = vector.load %arg7[%c0_37, %c0_38] : memref<128x1xf32, #tpu.memory_space<vmem>>, vector<128x1xf32>
      tpu.vector_store %arg7[%c0_37, %c0_38], %45 {strides = array<i32>} : memref<128x1xf32, #tpu.memory_space<vmem>>, vector<128x1xf32>,
    } else {
    }
    %c0 = arith.constant 0 : index
    %c0_1 = arith.constant 0 : index
    %3 = vector.load %arg2[%c0, %c0_1] : memref<128x128xbf16, #tpu.memory_space<vmem>>, vector<128x128xbf16>
    %c0_2 = arith.constant 0 : index
    %c0_3 = arith.constant 0 : index
    %c0_4 = arith.constant 0 : index
    %4 = vector.load %arg1[%c0_2, %c0_3, %c0_4] : memref<1x128x512xbf16, #tpu.memory_space<vmem>>, vector<1x128x256xbf16>
    %5 = vector.shape_cast %4 : vector<1x128x256xbf16> to vector<128x256xbf16>
    %cst = arith.constant dense<0.000000e+00> : vector<128x256xf32>
    %6 = tpu.matmul %3, %5, %cst {dimension_numbers = #tpu.dot_dimension_numbers<[1], [0], [0], [1], [0, 0, 1, 1], [], []>} : vector<128x128xbf16>, vector<128x256xbf16>, vector<128x256xf32> -> vector<128x256xf32>
    %7 = arith.index_cast %arg0 : i32 to index
    %c0_5 = arith.constant 0 : index
    %c0_6 = arith.constant 0 : index
    %8 = vector.load %arg5[%7, %c0_5, %c0_6] : memref<2x128x512xf32, #tpu.memory_space<vmem>>, vector<1x128x256xf32>
    %9 = vector.shape_cast %8 : vector<1x128x256xf32> to vector<128x256xf32>
    %10 = vector.shape_cast %6 : vector<128x256xf32> to vector<1x128x256xf32>
    tpu.vector_store %arg5[%7, %c0_5, %c0_6], %10 {strides = array<i32>} : memref<2x128x512xf32, #tpu.memory_space<vmem>>, vector<1x128x256xf32>,
    %c0_7 = arith.constant 0 : index
    %c0_8 = arith.constant 0 : index
    %11 = vector.load %arg6[%c0_7, %c0_8] : memref<128x1xf32, #tpu.memory_space<vmem>>, vector<128x1xf32>
    %cst_9 = arith.constant dense<0.000000e+00> : vector<128xf32>
    %12 = vector.multi_reduction <add>, %6, %cst_9 [1] : vector<128x256xf32> to vector<128xf32>
    %13 = vector.shape_cast %12 : vector<128xf32> to vector<128x1xf32>
    %14 = arith.addf %11, %13 : vector<128x1xf32>
    %c0_10 = arith.constant 0 : index
    %c0_11 = arith.constant 0 : index
    %15 = vector.load %arg6[%c0_10, %c0_11] : memref<128x1xf32, #tpu.memory_space<vmem>>, vector<128x1xf32>
    tpu.vector_store %arg6[%c0_10, %c0_11], %14 {strides = array<i32>} : memref<128x1xf32, #tpu.memory_space<vmem>>, vector<128x1xf32>,
    %c0_12 = arith.constant 0 : index
    %c0_13 = arith.constant 0 : index
    %16 = vector.load %arg7[%c0_12, %c0_13] : memref<128x1xf32, #tpu.memory_space<vmem>>, vector<128x1xf32>
    %17 = arith.mulf %6, %6 : vector<128x256xf32>
    %cst_14 = arith.constant dense<0.000000e+00> : vector<128xf32>
    %18 = vector.multi_reduction <add>, %17, %cst_14 [1] : vector<128x256xf32> to vector<128xf32>
    %19 = vector.shape_cast %18 : vector<128xf32> to vector<128x1xf32>
    %20 = arith.addf %16, %19 : vector<128x1xf32>
    %c0_15 = arith.constant 0 : index
    %c0_16 = arith.constant 0 : index
    %21 = vector.load %arg7[%c0_15, %c0_16] : memref<128x1xf32, #tpu.memory_space<vmem>>, vector<128x1xf32>
    tpu.vector_store %arg7[%c0_15, %c0_16], %20 {strides = array<i32>} : memref<128x1xf32, #tpu.memory_space<vmem>>, vector<128x1xf32>,
    %c0_17 = arith.constant 0 : index
    %c0_18 = arith.constant 0 : index
    %c256 = arith.constant 256 : index
    %22 = vector.load %arg1[%c0_17, %c0_18, %c256] : memref<1x128x512xbf16, #tpu.memory_space<vmem>>, vector<1x128x256xbf16>
    %23 = vector.shape_cast %22 : vector<1x128x256xbf16> to vector<128x256xbf16>
    %cst_19 = arith.constant dense<0.000000e+00> : vector<128x256xf32>
    %24 = tpu.matmul %3, %23, %cst_19 {dimension_numbers = #tpu.dot_dimension_numbers<[1], [0], [0], [1], [0, 0, 1, 1], [], []>} : vector<128x128xbf16>, vector<128x256xbf16>, vector<128x256xf32> -> vector<128x256xf32>
    %25 = arith.index_cast %arg0 : i32 to index
    %c0_20 = arith.constant 0 : index
    %c256_21 = arith.constant 256 : index
    %26 = vector.load %arg5[%25, %c0_20, %c256_21] : memref<2x128x512xf32, #tpu.memory_space<vmem>>, vector<1x128x256xf32>
    %27 = vector.shape_cast %26 : vector<1x128x256xf32> to vector<128x256xf32>
    %28 = vector.shape_cast %24 : vector<128x256xf32> to vector<1x128x256xf32>
    tpu.vector_store %arg5[%25, %c0_20, %c256_21], %28 {strides = array<i32>} : memref<2x128x512xf32, #tpu.memory_space<vmem>>, vector<1x128x256xf32>,
    %c0_22 = arith.constant 0 : index
    %c0_23 = arith.constant 0 : index
    %29 = vector.load %arg6[%c0_22, %c0_23] : memref<128x1xf32, #tpu.memory_space<vmem>>, vector<128x1xf32>
    %cst_24 = arith.constant dense<0.000000e+00> : vector<128xf32>
    %30 = vector.multi_reduction <add>, %24, %cst_24 [1] : vector<128x256xf32> to vector<128xf32>
    %31 = vector.shape_cast %30 : vector<128xf32> to vector<128x1xf32>
    %32 = arith.addf %29, %31 : vector<128x1xf32>
    %c0_25 = arith.constant 0 : index
    %c0_26 = arith.constant 0 : index
    %33 = vector.load %arg6[%c0_25, %c0_26] : memref<128x1xf32, #tpu.memory_space<vmem>>, vector<128x1xf32>
    tpu.vector_store %arg6[%c0_25, %c0_26], %32 {strides = array<i32>} : memref<128x1xf32, #tpu.memory_space<vmem>>, vector<128x1xf32>,
    %c0_27 = arith.constant 0 : index
    %c0_28 = arith.constant 0 : index
    %34 = vector.load %arg7[%c0_27, %c0_28] : memref<128x1xf32, #tpu.memory_space<vmem>>, vector<128x1xf32>
    %35 = arith.mulf %24, %24 : vector<128x256xf32>
    %cst_29 = arith.constant dense<0.000000e+00> : vector<128xf32>
    %36 = vector.multi_reduction <add>, %35, %cst_29 [1] : vector<128x256xf32> to vector<128xf32>
    %37 = vector.shape_cast %36 : vector<128xf32> to vector<128x1xf32>
    %38 = arith.addf %34, %37 : vector<128x1xf32>
    %c0_30 = arith.constant 0 : index
    %c0_31 = arith.constant 0 : index
    %39 = vector.load %arg7[%c0_30, %c0_31] : memref<128x1xf32, #tpu.memory_space<vmem>>, vector<128x1xf32>
    tpu.vector_store %arg7[%c0_30, %c0_31], %38 {strides = array<i32>} : memref<128x1xf32, #tpu.memory_space<vmem>>, vector<128x1xf32>,
    %c1_i32 = arith.constant 1 : i32
    %40 = arith.cmpi eq, %arg0, %c1_i32 : i32
    %41 = arith.extui %40 : i1 to i32
    %c0_i32_32 = arith.constant 0 : i32
    %42 = arith.cmpi ne, %41, %c0_i32_32 : i32
    scf.if %42 {
      %c0_33 = arith.constant 0 : index
      %c0_34 = arith.constant 0 : index
      %43 = vector.load %arg6[%c0_33, %c0_34] : memref<128x1xf32, #tpu.memory_space<vmem>>, vector<128x1xf32>
      %cst_35 = arith.constant 9.765625E-4 : f32
      %44 = vector.broadcast %cst_35 : f32 to vector<128x1xf32>
      %45 = arith.mulf %43, %44 : vector<128x1xf32>
      %c0_36 = arith.constant 0 : index
      %c0_37 = arith.constant 0 : index
      %46 = vector.load %arg7[%c0_36, %c0_37] : memref<128x1xf32, #tpu.memory_space<vmem>>, vector<128x1xf32>
      %cst_38 = arith.constant 9.765625E-4 : f32
      %47 = vector.broadcast %cst_38 : f32 to vector<128x1xf32>
      %48 = arith.mulf %46, %47 : vector<128x1xf32>
      %49 = arith.mulf %45, %45 : vector<128x1xf32>
      %50 = arith.subf %48, %49 : vector<128x1xf32>
      %cst_39 = arith.constant 0.000000e+00 : f32
      %51 = vector.broadcast %cst_39 : f32 to vector<128x1xf32>
      %52 = arith.maximumf %50, %51 : vector<128x1xf32>
      %cst_40 = arith.constant 1.000000e-03 : f32
      %53 = vector.broadcast %cst_40 : f32 to vector<128x1xf32>
      %54 = arith.addf %52, %53 : vector<128x1xf32>
      %55 = math.rsqrt %54 : vector<128x1xf32>
      %c0_41 = arith.constant 0 : index
      %c0_42 = arith.constant 0 : index
      %56 = vector.load %arg3[%c0_41, %c0_42] : memref<128x1xf32, #tpu.memory_space<vmem>>, vector<128x1xf32>
      %57 = arith.mulf %55, %56 : vector<128x1xf32>
      %c0_43 = arith.constant 0 : index
      %c0_44 = arith.constant 0 : index
      %58 = vector.load %arg4[%c0_43, %c0_44] : memref<128x1xf32, #tpu.memory_space<vmem>>, vector<128x1xf32>
      %59 = arith.mulf %45, %57 : vector<128x1xf32>
      %60 = arith.subf %58, %59 : vector<128x1xf32>
      %c0_45 = arith.constant 0 : index
      %c0_46 = arith.constant 0 : index
      %c0_47 = arith.constant 0 : index
      %61 = vector.load %arg5[%c0_45, %c0_46, %c0_47] : memref<2x128x512xf32, #tpu.memory_space<vmem>>, vector<1x128x512xf32>
      %62 = vector.shape_cast %61 : vector<1x128x512xf32> to vector<128x512xf32>
      %63 = vector.broadcast %57 : vector<128x1xf32> to vector<128x512xf32>
      %64 = arith.mulf %62, %63 : vector<128x512xf32>
      %65 = vector.broadcast %60 : vector<128x1xf32> to vector<128x512xf32>
      %66 = arith.addf %64, %65 : vector<128x512xf32>
      %cst_48 = arith.constant 0.000000e+00 : f32
      %67 = vector.broadcast %cst_48 : f32 to vector<128x512xf32>
      %68 = arith.maximumf %66, %67 : vector<128x512xf32>
      %c0_49 = arith.constant 0 : index
      %c0_50 = arith.constant 0 : index
      %c0_51 = arith.constant 0 : index
      %69 = vector.load %arg5[%c0_49, %c0_50, %c0_51] : memref<2x128x512xf32, #tpu.memory_space<vmem>>, vector<1x128x512xf32>
      %70 = vector.shape_cast %69 : vector<1x128x512xf32> to vector<128x512xf32>
      %71 = vector.shape_cast %68 : vector<128x512xf32> to vector<1x128x512xf32>
      tpu.vector_store %arg5[%c0_49, %c0_50, %c0_51], %71 {strides = array<i32>} : memref<2x128x512xf32, #tpu.memory_space<vmem>>, vector<1x128x512xf32>,
      %c1 = arith.constant 1 : index
      %c0_52 = arith.constant 0 : index
      %c0_53 = arith.constant 0 : index
      %72 = vector.load %arg5[%c1, %c0_52, %c0_53] : memref<2x128x512xf32, #tpu.memory_space<vmem>>, vector<1x128x512xf32>
      %73 = vector.shape_cast %72 : vector<1x128x512xf32> to vector<128x512xf32>
      %74 = vector.broadcast %57 : vector<128x1xf32> to vector<128x512xf32>
      %75 = arith.mulf %73, %74 : vector<128x512xf32>
      %76 = vector.broadcast %60 : vector<128x1xf32> to vector<128x512xf32>
      %77 = arith.addf %75, %76 : vector<128x512xf32>
      %cst_54 = arith.constant 0.000000e+00 : f32
      %78 = vector.broadcast %cst_54 : f32 to vector<128x512xf32>
      %79 = arith.maximumf %77, %78 : vector<128x512xf32>
      %c1_55 = arith.constant 1 : index
      %c0_56 = arith.constant 0 : index
      %c0_57 = arith.constant 0 : index
      %80 = vector.load %arg5[%c1_55, %c0_56, %c0_57] : memref<2x128x512xf32, #tpu.memory_space<vmem>>, vector<1x128x512xf32>
      %81 = vector.shape_cast %80 : vector<1x128x512xf32> to vector<128x512xf32>
      %82 = vector.shape_cast %79 : vector<128x512xf32> to vector<1x128x512xf32>
      tpu.vector_store %arg5[%c1_55, %c0_56, %c0_57], %82 {strides = array<i32>} : memref<2x128x512xf32, #tpu.memory_space<vmem>>, vector<1x128x512xf32>,
    } else {
    }
    return
  }
  func.func @transform_0(%arg0: i32) -> (i32, i32, i32) {
    %c0_i32 = arith.constant 0 : i32
    %c0_i32_0 = arith.constant 0 : i32
    %c0_i32_1 = arith.constant 0 : i32
    return %arg0, %c0_i32, %c0_i32_0 : i32, i32, i32
  }
  func.func @transform_1(%arg0: i32) -> (i32, i32) {
    %c0_i32 = arith.constant 0 : i32
    %c0_i32_0 = arith.constant 0 : i32
    %c0_i32_1 = arith.constant 0 : i32
    return %c0_i32, %c0_i32_0 : i32, i32
  }
  func.func @transform_2(%arg0: i32) -> (i32, i32) {
    %c0_i32 = arith.constant 0 : i32
    %c0_i32_0 = arith.constant 0 : i32
    %c0_i32_1 = arith.constant 0 : i32
    return %c0_i32, %c0_i32_0 : i32, i32
  }
  func.func @transform_3(%arg0: i32) -> (i32, i32) {
    %c0_i32 = arith.constant 0 : i32
    %c0_i32_0 = arith.constant 0 : i32
    %c0_i32_1 = arith.constant 0 : i32
    return %c0_i32, %c0_i32_0 : i32, i32
  }
  func.func @transform_4(%arg0: i32) -> (i32, i32, i32) {
    %c0_i32 = arith.constant 0 : i32
    %c0_i32_0 = arith.constant 0 : i32
    %c0_i32_1 = arith.constant 0 : i32
    %c0_i32_2 = arith.constant 0 : i32
    return %c0_i32, %c0_i32_0, %c0_i32_1 : i32, i32, i32
  }
}

</mosaic_0001>

<bundles_post_ra>
// kernel: unit3d_forward.1
= control target key start
LH: loop header
LB: loop body
LE: loop exit
PB: predicated region body
PF: predicated region fallthrough
CT: control target
= control target key end

     0   :  { %s2597_s15 = smov 0   ;;  %s4340_s0 = inlined_call_operand.vmem [shape: bf16[2,128,512], index: 0, kind: input, shape index: {}]   ;;  %s4341_s1 = inlined_call_operand.vmem [shape: bf16[128,128], index: 1, kind: input, shape index: {}]   ;;  %s4342_s2 = inlined_call_operand.vmem [shape: f32[128,1], index: 2, kind: input, shape index: {}]   ;;  %s4343_s3 = inlined_call_operand.vmem [shape: f32[128,1], index: 3, kind: input, shape index: {}]   ;;  %s4344_s4 = inlined_call_operand.vmem [shape: f32[2,128,512], index: 4, kind: output, shape index: {}]  }
   0x1 LB: > { %s2603_s16 = sadd.s32 4294967295, %s2567_s15   ;;  %p2281_p0 = scmp.ge.s32.totalorder %s2567_s15, 1  ;;  %s2567_s15 = sphi %s2597_s15, %s14_s15  }
   0x2   : > { %p157_p1 = scmp.lt.s32.totalorder %s2567_s15, 3 }
   0x4   : > { %p158_p2 = pnand %p2281_p0, %p157_p1 }
   0x5   : > { %p178_p3 = scmp.lt.s32.totalorder (!%p158_p2), %s2603_s16, 1  ;;  %p2284_p4 = scmp.ne.s32.totalorder (!%p158_p2), %s2603_s16, 0 }
   0x6   : > { %161 = sbr.rel (%p158_p2) target bundleno = 823 (0x337), region = 36 }
   0xd   : > { %s179_s17 = scalar_select %p178_p3, %s2603_s16, 1 }
   0xe   : > { %187 = sbr.rel (%p2284_p4) target bundleno = 31 (0x1f), region = 40  ;;  %vm188_vm0 = vcmask (!%p2284_p4), 7168   ;;  %v2569_v0 = vmov (!%p2284_p4), 0.0  }
   0xf   : > { %s2458_s18 = sshll.u32 %s179_s17, 8  ;;  %189 = vst.msk [vmem:[#allocation2] sm:$0xff] (!%p2284_p4), %vm188_vm0, %v2569_v0  ;;  %190 = vst.msk [vmem:[#allocation2 + $0x8] sm:$0xff] (!%p2284_p4), %vm188_vm0, %v2569_v0 }
  0x10   : > { %s2612_s21 = scalar_lea.vmem %s4340_s0, %s2458_s18  ;;  %191 = vst.msk [vmem:[#allocation2 + $0x10] sm:$0xff] (!%p2284_p4), %vm188_vm0, %v2569_v0  ;;  %192 = vst.msk [vmem:[#allocation2 + $0x18] sm:$0xff] (!%p2284_p4), %vm188_vm0, %v2569_v0 }
  0x11   : > { %193 = vst.msk [vmem:[#allocation2 + $0x20] sm:$0xff] (!%p2284_p4), %vm188_vm0, %v2569_v0  ;;  %194 = vst.msk [vmem:[#allocation2 + $0x28] sm:$0xff] (!%p2284_p4), %vm188_vm0, %v2569_v0 }
  0x12   : > { %195 = vst.msk [vmem:[#allocation2 + $0x30] sm:$0xff] (!%p2284_p4), %vm188_vm0, %v2569_v0  ;;  %196 = vst.msk [vmem:[#allocation2 + $0x38] sm:$0xff] (!%p2284_p4), %vm188_vm0, %v2569_v0 }
  0x13   : > { %197 = vst.msk [vmem:[#allocation2 + $0x40] sm:$0xff] (!%p2284_p4), %vm188_vm0, %v2569_v0  ;;  %198 = vst.msk [vmem:[#allocation2 + $0x48] sm:$0xff] (!%p2284_p4), %vm188_vm0, %v2569_v0 }
  0x14   : > { %199 = vst.msk [vmem:[#allocation2 + $0x50] sm:$0xff] (!%p2284_p4), %vm188_vm0, %v2569_v0  ;;  %200 = vst.msk [vmem:[#allocation2 + $0x58] sm:$0xff] (!%p2284_p4), %vm188_vm0, %v2569_v0 }
  0x15   : > { %201 = vst.msk [vmem:[#allocation2 + $0x60] sm:$0xff] %vm188_vm0, %v2569_v0  ;;  %202 = vst.msk [vmem:[#allocation2 + $0x68] sm:$0xff] %vm188_vm0, %v2569_v0 }
  0x16   : > { %203 = vst.msk [vmem:[#allocation2 + $0x70] sm:$0xff] %vm188_vm0, %v2569_v0  ;;  %204 = vst.msk [vmem:[#allocation2 + $0x78] sm:$0xff] %vm188_vm0, %v2569_v0 }
  0x17   : > { %205 = vst.msk [vmem:[#allocation3] sm:$0xff] %vm188_vm0, %v2569_v0  ;;  %206 = vst.msk [vmem:[#allocation3 + $0x8] sm:$0xff] %vm188_vm0, %v2569_v0 }
  0x18   : > { %207 = vst.msk [vmem:[#allocation3 + $0x10] sm:$0xff] %vm188_vm0, %v2569_v0  ;;  %208 = vst.msk [vmem:[#allocation3 + $0x18] sm:$0xff] %vm188_vm0, %v2569_v0 }
  0x19   : > { %209 = vst.msk [vmem:[#allocation3 + $0x20] sm:$0xff] %vm188_vm0, %v2569_v0  ;;  %210 = vst.msk [vmem:[#allocation3 + $0x28] sm:$0xff] %vm188_vm0, %v2569_v0 }
  0x1a   : > { %211 = vst.msk [vmem:[#allocation3 + $0x30] sm:$0xff] %vm188_vm0, %v2569_v0  ;;  %212 = vst.msk [vmem:[#allocation3 + $0x38] sm:$0xff] %vm188_vm0, %v2569_v0 }
  0x1b   : > { %213 = vst.msk [vmem:[#allocation3 + $0x40] sm:$0xff] %vm188_vm0, %v2569_v0  ;;  %214 = vst.msk [vmem:[#allocation3 + $0x48] sm:$0xff] %vm188_vm0, %v2569_v0 }
  0x1c   : > { %215 = vst.msk [vmem:[#allocation3 + $0x50] sm:$0xff] %vm188_vm0, %v2569_v0  ;;  %216 = vst.msk [vmem:[#allocation3 + $0x58] sm:$0xff] %vm188_vm0, %v2569_v0 }
  0x1d   : > { %217 = vst.msk [vmem:[#allocation3 + $0x60] sm:$0xff] %vm188_vm0, %v2569_v0  ;;  %218 = vst.msk [vmem:[#allocation3 + $0x68] sm:$0xff] %vm188_vm0, %v2569_v0 }
  0x1e   : > { %219 = vst.msk [vmem:[#allocation3 + $0x70] sm:$0xff] %vm188_vm0, %v2569_v0  ;;  %220 = vst.msk [vmem:[#allocation3 + $0x78] sm:$0xff] %vm188_vm0, %v2569_v0 }
  0x1f PF: > { %v2471_v1 = vld [vmem:[%s2612_s21 + $0x4] ss:$16 sps:$4 sm:$0xff]   ;;  %v2473_v2 = vld [vmem:[%s2612_s21 + $0xc] ss:$16 sps:$4 sm:$0xff]   ;;  %v2570_v3 = vmov 0   ;;  %s2459_s12 = sshll.u32 %s2603_s16, 9 }
  0x20   : > { %413 = vmatprep.mubr.bf16.mxu0 %v2570_v3  ;;  %882 = vmatprep.mubr.bf16.mxu1 %v2570_v3  ;;  %v2475_v4 = vld [vmem:[%s2612_s21] ss:$16 sps:$4 sm:$0xff]   ;;  %v2476_v5 = vld [vmem:[%s2612_s21 + $0x8] ss:$16 sps:$4 sm:$0xff]   ;;  %v2477_v6 = vld [vmem:[%s2612_s21 + $0x24] ss:$16 sps:$4 sm:$0xff]   ;;  %s2723_s17 = scalar_lea.vmem %s4344_s4, %s2459_s12 }
  0x21   : > { %381 = vmatprep.subr.bf16.mxu0 %v2471_v1  ;;  %850 = vmatprep.subr.bf16.mxu1 %v2473_v2  ;;  %v2479_v7 = vld [vmem:[%s2612_s21 + $0x2c] ss:$16 sps:$4 sm:$0xff]   ;;  %v2481_v8 = vld [vmem:[%s2612_s21 + $0x20] ss:$16 sps:$4 sm:$0xff]   ;;  %v2482_v9 = vld [vmem:[%s2612_s21 + $0x28] ss:$16 sps:$4 sm:$0xff]  }
  0x22   : > { %382 = vmatpush1.bf16.msra.mxu0 %v2475_v4  ;;  %851 = vmatpush1.bf16.msra.mxu1 %v2476_v5  ;;  %v2483_v10 = vld [vmem:[%s2612_s21 + $0x44] ss:$16 sps:$4 sm:$0xff]   ;;  %v2485_v11 = vld [vmem:[%s2612_s21 + $0x4c] ss:$16 sps:$4 sm:$0xff]   ;;  %v2487_v12 = vld [vmem:[%s2612_s21 + $0x40] ss:$16 sps:$4 sm:$0xff]  }
  0x23   : > { %383 = vmatprep.subr.bf16.mxu0 %v2477_v6  ;;  %852 = vmatprep.subr.bf16.mxu1 %v2479_v7  ;;  %v2488_v13 = vld [vmem:[%s2612_s21 + $0x48] ss:$16 sps:$4 sm:$0xff]   ;;  %v2489_v14 = vld [vmem:[%s2612_s21 + $0x64] ss:$16 sps:$4 sm:$0xff]   ;;  %v2491_v15 = vld [vmem:[%s2612_s21 + $0x6c] ss:$16 sps:$4 sm:$0xff]  }
  0x24   : > { %v2493_v16 = vld [vmem:[%s2612_s21 + $0x60] ss:$16 sps:$4 sm:$0xff]   ;;  %v2494_v17 = vld [vmem:[%s2612_s21 + $0x68] ss:$16 sps:$4 sm:$0xff]   ;;  %v2495_v18 = vld [vmem:[%s2612_s21 + $0x84] ss:$16 sps:$4 sm:$0xff]  }
  0x25   : > { %v2497_v19 = vld [vmem:[%s2612_s21 + $0x8c] ss:$16 sps:$4 sm:$0xff]   ;;  %v2499_v20 = vld [vmem:[%s2612_s21 + $0x80] ss:$16 sps:$4 sm:$0xff]   ;;  %v2500_v21 = vld [vmem:[%s2612_s21 + $0x88] ss:$16 sps:$4 sm:$0xff]  }
  0x26   : > { %384 = vmatpush1.bf16.msra.mxu0 %v2481_v8  ;;  %853 = vmatpush1.bf16.msra.mxu1 %v2482_v9  ;;  %v2501_v22 = vld [vmem:[%s2612_s21 + $0xa4] ss:$16 sps:$4 sm:$0xff]   ;;  %v2503_v23 = vld [vmem:[%s2612_s21 + $0xac] ss:$16 sps:$4 sm:$0xff]   ;;  %v2505_v24 = vld [vmem:[%s2612_s21 + $0xa0] ss:$16 sps:$4 sm:$0xff]  }
  0x27   : > { %385 = vmatprep.subr.bf16.mxu0 %v2483_v10  ;;  %854 = vmatprep.subr.bf16.mxu1 %v2485_v11  ;;  %v2506_v25 = vld [vmem:[%s2612_s21 + $0xa8] ss:$16 sps:$4 sm:$0xff]   ;;  %v2507_v26 = vld [vmem:[%s2612_s21 + $0xc4] ss:$16 sps:$4 sm:$0xff]   ;;  %v2509_v27 = vld [vmem:[%s2612_s21 + $0xcc] ss:$16 sps:$4 sm:$0xff]  }
  0x28   : > { %v2511_v28 = vld [vmem:[%s2612_s21 + $0xc0] ss:$16 sps:$4 sm:$0xff]   ;;  %v2512_v29 = vld [vmem:[%s2612_s21 + $0xc8] ss:$16 sps:$4 sm:$0xff]   ;;  %v2513_v30 = vld [vmem:[%s2612_s21 + $0xe4] ss:$16 sps:$4 sm:$0xff]  }
  0x29   : > { %v2515_v31 = vld [vmem:[%s2612_s21 + $0xec] ss:$16 sps:$4 sm:$0xff]   ;;  %v2517_v32 = vld [vmem:[%s2612_s21 + $0xe0] ss:$16 sps:$4 sm:$0xff]   ;;  %v2518_v33 = vld [vmem:[%s2612_s21 + $0xe8] ss:$16 sps:$4 sm:$0xff]  }
  0x2a   : > { %386 = vmatpush1.bf16.msra.mxu0 %v2487_v12  ;;  %855 = vmatpush1.bf16.msra.mxu1 %v2488_v13  ;;  %v2519_v34 = vld [vmem:[%s4341_s1] sm:$0xff]   ;;  %v2520_v35 = vld [vmem:[%s4341_s1 + $0x8] sm:$0xff]   ;;  %v2521_v36 = vld [vmem:[%s4341_s1 + $0x10] sm:$0xff]   ;;  %vm609_vm1 = vcmask 7168   ;;  %p2327_p5 = scmp.ne.s32.totalorder %s2603_s16, 1 }
  0x2b   : > { %387 = vmatprep.subr.bf16.mxu0 %v2489_v14  ;;  %856 = vmatprep.subr.bf16.mxu1 %v2491_v15  ;;  %v2522_v37 = vld [vmem:[%s4341_s1 + $0x18] sm:$0xff]   ;;  %v2523_v38 = vld [vmem:[%s4341_s1 + $0x20] sm:$0xff]   ;;  %v2524_v39 = vld [vmem:[%s4341_s1 + $0x28] sm:$0xff]  }
  0x2c   : > { %v2525_v40 = vld [vmem:[%s4341_s1 + $0x30] sm:$0xff]   ;;  %v2526_v41 = vld [vmem:[%s4341_s1 + $0x38] sm:$0xff]  }
  0x2e   : > { %388 = vmatpush1.bf16.msra.mxu0 %v2493_v16  ;;  %857 = vmatpush1.bf16.msra.mxu1 %v2494_v17 }
  0x2f   : > { %389 = vmatprep.subr.bf16.mxu0 %v2495_v18  ;;  %858 = vmatprep.subr.bf16.mxu1 %v2497_v19 }
  0x32   : > { %390 = vmatpush1.bf16.msra.mxu0 %v2499_v20  ;;  %859 = vmatpush1.bf16.msra.mxu1 %v2500_v21 }
  0x33   : > { %391 = vmatprep.subr.bf16.mxu0 %v2501_v22  ;;  %860 = vmatprep.subr.bf16.mxu1 %v2503_v23 }
  0x36   : > { %392 = vmatpush1.bf16.msra.mxu0 %v2505_v24  ;;  %861 = vmatpush1.bf16.msra.mxu1 %v2506_v25 }
  0x37   : > { %393 = vmatprep.subr.bf16.mxu0 %v2507_v26  ;;  %862 = vmatprep.subr.bf16.mxu1 %v2509_v27 }
  0x3a   : > { %394 = vmatpush1.bf16.msra.mxu0 %v2511_v28  ;;  %863 = vmatpush1.bf16.msra.mxu1 %v2512_v29 }
  0x3b   : > { %395 = vmatprep.subr.bf16.mxu0 %v2513_v30  ;;  %864 = vmatprep.subr.bf16.mxu1 %v2515_v31 }
  0x3e   : > { %396 = vmatpush1.bf16.msra.mxu0 %v2517_v32  ;;  %865 = vmatpush1.bf16.msra.mxu1 %v2518_v33 }
  0x41   : > { %414 = vmatmul.mubr.bf16.vlgmr.msra.gmra.mrb[0].mxu0 %v2519_v34  ;;  %883 = vmatmul.mubr.bf16.vlgmr.msra.gmra.mrb[0].mxu1 %v2519_v34 }
  0x42   : > { %423 = vmatprep.mubr.bf16.mxu0 %v2570_v3  ;;  %892 = vmatprep.mubr.bf16.mxu1 %v2570_v3 }
  0x49   : > { %424 = vmatmul.mubr.bf16.gmra.mrb[4].mxu0 %v2520_v35  ;;  %893 = vmatmul.mubr.bf16.gmra.mrb[4].mxu1 %v2520_v35 }
  0x4a   : > { %433 = vmatprep.mubr.bf16.mxu0 %v2570_v3  ;;  %902 = vmatprep.mubr.bf16.mxu1 %v2570_v3 }
  0x51   : > { %434 = vmatmul.mubr.bf16.gmra.mrb[8].mxu0 %v2521_v36  ;;  %903 = vmatmul.mubr.bf16.gmra.mrb[8].mxu1 %v2521_v36 }
  0x52   : > { %443 = vmatprep.mubr.bf16.mxu0 %v2570_v3  ;;  %912 = vmatprep.mubr.bf16.mxu1 %v2570_v3 }
  0x59   : > { %444 = vmatmul.mubr.bf16.gmra.mrb[12].mxu0 %v2522_v37  ;;  %913 = vmatmul.mubr.bf16.gmra.mrb[12].mxu1 %v2522_v37 }
  0x5a   : > { %453 = vmatprep.mubr.bf16.mxu0 %v2570_v3  ;;  %922 = vmatprep.mubr.bf16.mxu1 %v2570_v3 }
  0x61   : > { %454 = vmatmul.mubr.bf16.gmra.mrb[16].mxu0 %v2523_v38  ;;  %923 = vmatmul.mubr.bf16.gmra.mrb[16].mxu1 %v2523_v38 }
  0x62   : > { %463 = vmatprep.mubr.bf16.mxu0 %v2570_v3  ;;  %932 = vmatprep.mubr.bf16.mxu1 %v2570_v3 }
  0x69   : > { %464 = vmatmul.mubr.bf16.gmra.mrb[20].mxu0 %v2524_v39  ;;  %933 = vmatmul.mubr.bf16.gmra.mrb[20].mxu1 %v2524_v39 }
  0x6a   : > { %473 = vmatprep.mubr.bf16.mxu0 %v2570_v3  ;;  %942 = vmatprep.mubr.bf16.mxu1 %v2570_v3 }
  0x71   : > { %474 = vmatmul.mubr.bf16.gmra.mrb[24].mxu0 %v2525_v40  ;;  %943 = vmatmul.mubr.bf16.gmra.mrb[24].mxu1 %v2525_v40 }
  0x72   : > { %483 = vmatprep.mubr.bf16.mxu0 %v2570_v3  ;;  %952 = vmatprep.mubr.bf16.mxu1 %v2570_v3 }
  0x79   : > { %484 = vmatmul.mubr.bf16.gmra.mrb[28].mxu0 %v2526_v41  ;;  %953 = vmatmul.mubr.bf16.gmra.mrb[28].mxu1 %v2526_v41 }
 0x114   : > { %v415_v42 = vpop.f32.mrb[0].mxu0  ;;  %v884_v43 = vpop.f32.mrb[0].mxu1 }
 0x115   : > { %497 = vst [vmem:[%s2723_s17] sm:$0xff] %v415_v42  ;;  %963 = vst [vmem:[%s2723_s17 + $0x10] sm:$0xff] %v884_v43  ;;  %v417_v44 = vpop.f32.mrb[1].mxu0  ;;  %v886_v45 = vpop.f32.mrb[1].mxu1  ;;  %v642_v46 = vmul.f32 %v415_v42, %v415_v42  ;;  %v1107_v47 = vmul.f32 %v884_v43, %v884_v43 }
 0x116   : > { %498 = vst [vmem:[%s2723_s17 + $0x8] sm:$0xff] %v417_v44  ;;  %964 = vst [vmem:[%s2723_s17 + $0x18] sm:$0xff] %v886_v45  ;;  %v419_v48 = vpop.f32.mrb[2].mxu0  ;;  %v888_v49 = vpop.f32.mrb[2].mxu1  ;;  %v545_v50 = vadd.f32 %v417_v44, %v415_v42  ;;  %v1011_v51 = vadd.f32 %v886_v45, %v884_v43  ;;  %v643_v52 = vmul.f32 %v417_v44, %v417_v44 }
 0x117   : > { %v1108_v53 = vmul.f32 %v886_v45, %v886_v45  ;;  %499 = vst [vmem:[%s2723_s17 + $0x20] sm:$0xff] %v419_v48  ;;  %965 = vst [vmem:[%s2723_s17 + $0x30] sm:$0xff] %v888_v49  ;;  %v421_v54 = vpop.f32.mrb[3].mxu0  ;;  %v890_v55 = vpop.f32.mrb[3].mxu1  ;;  %v644_v56 = vmul.f32 %v419_v48, %v419_v48  ;;  %v1109_v57 = vmul.f32 %v888_v49, %v888_v49 }
 0x118   : > { %500 = vst [vmem:[%s2723_s17 + $0x28] sm:$0xff] %v421_v54  ;;  %966 = vst [vmem:[%s2723_s17 + $0x38] sm:$0xff] %v890_v55  ;;  %546 = vadd.xlane.f32.xlu0 %v545_v50  ;;  %v1014_v58 = vadd.f32 %v890_v55, %v888_v49  ;;  %v645_v59 = vmul.f32 %v421_v54, %v421_v54  ;;  %v548_v60 = vadd.f32 %v421_v54, %v419_v48 }
 0x119   : > { %v1110_v61 = vmul.f32 %v890_v55, %v890_v55  ;;  %v674_v62 = vadd.f32 %v643_v52, %v642_v46  ;;  %v2733_v63 = vadd.f32 %v1108_v53, %v1107_v47 }
 0x11a   : > { %1015 = vadd.xlane.f32.xlu1 %v1014_v58  ;;  %v677_v0 = vadd.f32 %v645_v59, %v644_v56 }
 0x11b   : > { %v1142_v1 = vadd.f32 %v1110_v61, %v1109_v57 }
 0x11c   : > { %1012 = vadd.xlane.f32.xlu0 %v1011_v51  ;;  %v425_v2 = vpop.f32.mrb[4].mxu0  ;;  %v894_v3 = vpop.f32.mrb[4].mxu1 }
 0x11d   : > { %501 = vst [vmem:[%s2723_s17 + $0x40] sm:$0xff] %v425_v2  ;;  %v427_v4 = vpop.f32.mrb[5].mxu0  ;;  %967 = vst [vmem:[%s2723_s17 + $0x50] sm:$0xff] %v894_v3  ;;  %v896_v5 = vpop.f32.mrb[5].mxu1  ;;  %v646_v6 = vmul.f32 %v425_v2, %v425_v2  ;;  %v1111_v7 = vmul.f32 %v894_v3, %v894_v3 }
 0x11e   : > { %678 = vadd.xlane.f32.xlu1 %v677_v0  ;;  %502 = vst [vmem:[%s2723_s17 + $0x48] sm:$0xff] %v427_v4  ;;  %v429_v8 = vpop.f32.mrb[6].mxu0  ;;  %968 = vst [vmem:[%s2723_s17 + $0x58] sm:$0xff] %v896_v5  ;;  %v551_v9 = vadd.f32 %v427_v4, %v425_v2  ;;  %v898_v10 = vpop.f32.mrb[6].mxu1  ;;  %v1017_v11 = vadd.f32 %v896_v5, %v894_v3  ;;  %v647_v12 = vmul.f32 %v427_v4, %v427_v4 }
 0x11f   : > { %v1112_v13 = vmul.f32 %v896_v5, %v896_v5  ;;  %503 = vst [vmem:[%s2723_s17 + $0x60] sm:$0xff] %v429_v8  ;;  %v431_v14 = vpop.f32.mrb[7].mxu0  ;;  %969 = vst [vmem:[%s2723_s17 + $0x70] sm:$0xff] %v898_v10  ;;  %v900_v15 = vpop.f32.mrb[7].mxu1  ;;  %v648_v16 = vmul.f32 %v429_v8, %v429_v8  ;;  %v1113_v17 = vmul.f32 %v898_v10, %v898_v10 }
 0x120   : > { %549 = vadd.xlane.f32.xlu0 %v548_v60  ;;  %504 = vst [vmem:[%s2723_s17 + $0x68] sm:$0xff] %v431_v14  ;;  %970 = vst [vmem:[%s2723_s17 + $0x78] sm:$0xff] %v900_v15  ;;  %v554_v18 = vadd.f32 %v431_v14, %v429_v8  ;;  %v1020_v19 = vadd.f32 %v900_v15, %v898_v10  ;;  %v2743_v20 = vadd.f32 %v647_v12, %v646_v6 }
 0x121   : > { %v649_v21 = vmul.f32 %v431_v14, %v431_v14  ;;  %v2745_v22 = vadd.f32 %v1112_v13, %v1111_v7  ;;  %v1114_v23 = vmul.f32 %v900_v15, %v900_v15 }
 0x122   : > { %1143 = vadd.xlane.f32.xlu1 %v1142_v1 }
 0x123   : > { %v2747_v24 = vadd.f32 %v649_v21, %v648_v16  ;;  %v2749_v25 = vadd.f32 %v1114_v23, %v1113_v17 }
 0x124   : > { %675 = vadd.xlane.f32.xlu0 %v674_v62  ;;  %v435_v26 = vpop.f32.mrb[8].mxu0  ;;  %v904_v27 = vpop.f32.mrb[8].mxu1 }
 0x125   : > { %505 = vst [vmem:[%s2723_s17 + $0x80] sm:$0xff] %v435_v26  ;;  %v437_v28 = vpop.f32.mrb[9].mxu0  ;;  %971 = vst [vmem:[%s2723_s17 + $0x90] sm:$0xff] %v904_v27  ;;  %v906_v29 = vpop.f32.mrb[9].mxu1  ;;  %v650_v30 = vmul.f32 %v435_v26, %v435_v26  ;;  %v1115_v31 = vmul.f32 %v904_v27, %v904_v27 }
 0x126   : > { %552 = vadd.xlane.f32.xlu1 %v551_v9  ;;  %506 = vst [vmem:[%s2723_s17 + $0x88] sm:$0xff] %v437_v28  ;;  %v439_v32 = vpop.f32.mrb[10].mxu0  ;;  %972 = vst [vmem:[%s2723_s17 + $0x98] sm:$0xff] %v906_v29  ;;  %v908_v33 = vpop.f32.mrb[10].mxu1  ;;  %v2755_v34 = vadd.f32 %v437_v28, %v435_v26  ;;  %v2757_v35 = vadd.f32 %v906_v29, %v904_v27  ;;  %v651_v36 = vmul.f32 %v437_v28, %v437_v28 }
 0x127   : > { %v1116_v37 = vmul.f32 %v906_v29, %v906_v29  ;;  %507 = vst [vmem:[%s2723_s17 + $0xa0] sm:$0xff] %v439_v32  ;;  %v441_v38 = vpop.f32.mrb[11].mxu0  ;;  %973 = vst [vmem:[%s2723_s17 + $0xb0] sm:$0xff] %v908_v33  ;;  %v910_v39 = vpop.f32.mrb[11].mxu1  ;;  %v652_v40 = vmul.f32 %v439_v32, %v439_v32  ;;  %v1117_v41 = vmul.f32 %v908_v33, %v908_v33 }
 0x128   : > { %1140 = vadd.xlane.f32.xlu0 %v2733_v63  ;;  %508 = vst [vmem:[%s2723_s17 + $0xa8] sm:$0xff] %v441_v38  ;;  %974 = vst [vmem:[%s2723_s17 + $0xb8] sm:$0xff] %v910_v39  ;;  %v2764_v42 = vadd.f32 %v441_v38, %v439_v32  ;;  %v2766_v43 = vadd.f32 %v910_v39, %v908_v33  ;;  %v2768_v44 = vadd.f32 %v651_v36, %v650_v30 }
 0x129   : > { %v653_v45 = vmul.f32 %v441_v38, %v441_v38  ;;  %v2770_v46 = vadd.f32 %v1116_v37, %v1115_v31  ;;  %v1118_v47 = vmul.f32 %v910_v39, %v910_v39 }
 0x12a   : > { %555 = vadd.xlane.f32.xlu1 %v554_v18 }
 0x12b   : > { %v2772_v48 = vadd.f32 %v653_v45, %v652_v40  ;;  %v2774_v49 = vadd.f32 %v1118_v47, %v1117_v41 }
 0x12c   : > { %1018 = vadd.xlane.f32.xlu0 %v1017_v11  ;;  %v445_v50 = vpop.f32.mrb[12].mxu0  ;;  %v914_v51 = vpop.f32.mrb[12].mxu1 }
 0x12d   : > { %509 = vst [vmem:[%s2723_s17 + $0xc0] sm:$0xff] %v445_v50  ;;  %v447_v52 = vpop.f32.mrb[13].mxu0  ;;  %975 = vst [vmem:[%s2723_s17 + $0xd0] sm:$0xff] %v914_v51  ;;  %v916_v53 = vpop.f32.mrb[13].mxu1  ;;  %v654_v54 = vmul.f32 %v445_v50, %v445_v50  ;;  %v1119_v55 = vmul.f32 %v914_v51, %v914_v51 }
 0x12e   : > { %1021 = vadd.xlane.f32.xlu1 %v1020_v19  ;;  %510 = vst [vmem:[%s2723_s17 + $0xc8] sm:$0xff] %v447_v52  ;;  %v449_v56 = vpop.f32.mrb[14].mxu0  ;;  %976 = vst [vmem:[%s2723_s17 + $0xd8] sm:$0xff] %v916_v53  ;;  %v918_v57 = vpop.f32.mrb[14].mxu1  ;;  %v2780_v58 = vadd.f32 %v447_v52, %v445_v50  ;;  %v2782_v59 = vadd.f32 %v916_v53, %v914_v51  ;;  %v655_v60 = vmul.f32 %v447_v52, %v447_v52 }
 0x12f   : > { %v1120_v61 = vmul.f32 %v916_v53, %v916_v53  ;;  %511 = vst [vmem:[%s2723_s17 + $0xe0] sm:$0xff] %v449_v56  ;;  %v451_v62 = vpop.f32.mrb[15].mxu0  ;;  %977 = vst [vmem:[%s2723_s17 + $0xf0] sm:$0xff] %v918_v57  ;;  %v920_v63 = vpop.f32.mrb[15].mxu1  ;;  %v656_v0 = vmul.f32 %v449_v56, %v449_v56  ;;  %v1121_v1 = vmul.f32 %v918_v57, %v918_v57 }
 0x130   : > { %681 = vadd.xlane.f32.xlu0 %v2743_v20  ;;  %512 = vst [vmem:[%s2723_s17 + $0xe8] sm:$0xff] %v451_v62  ;;  %978 = vst [vmem:[%s2723_s17 + $0xf8] sm:$0xff] %v920_v63  ;;  %v2789_v2 = vadd.f32 %v451_v62, %v449_v56  ;;  %v2791_v3 = vadd.f32 %v920_v63, %v918_v57  ;;  %v2793_v4 = vadd.f32 %v655_v60, %v654_v54 }
 0x131   : > { %v657_v5 = vmul.f32 %v451_v62, %v451_v62  ;;  %v2795_v6 = vadd.f32 %v1120_v61, %v1119_v55  ;;  %v1122_v7 = vmul.f32 %v920_v63, %v920_v63 }
 0x132   : > { %684 = vadd.xlane.f32.xlu1 %v2747_v24 }
 0x133   : > { %v2798_v8 = vadd.f32 %v657_v5, %v656_v0  ;;  %v2800_v9 = vadd.f32 %v1122_v7, %v1121_v1 }
 0x134   : > { %1146 = vadd.xlane.f32.xlu0 %v2745_v22  ;;  %v455_v10 = vpop.f32.mrb[16].mxu0  ;;  %v924_v11 = vpop.f32.mrb[16].mxu1 }
 0x135   : > { %513 = vst [vmem:[%s2723_s17 + $0x100] sm:$0xff] %v455_v10  ;;  %v457_v12 = vpop.f32.mrb[17].mxu0  ;;  %979 = vst [vmem:[%s2723_s17 + $0x110] sm:$0xff] %v924_v11  ;;  %v926_v13 = vpop.f32.mrb[17].mxu1  ;;  %v658_v14 = vmul.f32 %v455_v10, %v455_v10  ;;  %v1123_v15 = vmul.f32 %v924_v11, %v924_v11 }
 0x136   : > { %1149 = vadd.xlane.f32.xlu1 %v2749_v25  ;;  %514 = vst [vmem:[%s2723_s17 + $0x108] sm:$0xff] %v457_v12  ;;  %v459_v16 = vpop.f32.mrb[18].mxu0  ;;  %980 = vst [vmem:[%s2723_s17 + $0x118] sm:$0xff] %v926_v13  ;;  %v928_v17 = vpop.f32.mrb[18].mxu1  ;;  %v2808_v18 = vadd.f32 %v457_v12, %v455_v10  ;;  %v2810_v19 = vadd.f32 %v926_v13, %v924_v11  ;;  %v659_v20 = vmul.f32 %v457_v12, %v457_v12 }
 0x137   : > { %v1124_v21 = vmul.f32 %v926_v13, %v926_v13  ;;  %515 = vst [vmem:[%s2723_s17 + $0x120] sm:$0xff] %v459_v16  ;;  %v461_v22 = vpop.f32.mrb[19].mxu0  ;;  %981 = vst [vmem:[%s2723_s17 + $0x130] sm:$0xff] %v928_v17  ;;  %v930_v23 = vpop.f32.mrb[19].mxu1  ;;  %v660_v24 = vmul.f32 %v459_v16, %v459_v16  ;;  %v1125_v26 = vmul.f32 %v928_v17, %v928_v17 }
 0x138   : > { %558 = vadd.xlane.f32.xlu0 %v2755_v34  ;;  %516 = vst [vmem:[%s2723_s17 + $0x128] sm:$0xff] %v461_v22  ;;  %982 = vst [vmem:[%s2723_s17 + $0x138] sm:$0xff] %v930_v23  ;;  %v2817_v25 = vadd.f32 %v461_v22, %v459_v16  ;;  %v2819_v27 = vadd.f32 %v930_v23, %v928_v17  ;;  %v2821_v28 = vadd.f32 %v659_v20, %v658_v14 }
 0x139   : > { %v661_v29 = vmul.f32 %v461_v22, %v461_v22  ;;  %v2823_v30 = vadd.f32 %v1124_v21, %v1123_v15  ;;  %v1126_v31 = vmul.f32 %v930_v23, %v930_v23 }
 0x13a   : > { %561 = vadd.xlane.f32.xlu1 %v2764_v42 }
 0x13b   : > { %v2826_v32 = vadd.f32 %v661_v29, %v660_v24  ;;  %v2828_v33 = vadd.f32 %v1126_v31, %v1125_v26 }
 0x13c   : > { %1024 = vadd.xlane.f32.xlu0 %v2757_v35  ;;  %v465_v34 = vpop.f32.mrb[20].mxu0  ;;  %v934_v36 = vpop.f32.mrb[20].mxu1 }
 0x13d   : > { %517 = vst [vmem:[%s2723_s17 + $0x140] sm:$0xff] %v465_v34  ;;  %v467_v37 = vpop.f32.mrb[21].mxu0  ;;  %983 = vst [vmem:[%s2723_s17 + $0x150] sm:$0xff] %v934_v36  ;;  %v936_v38 = vpop.f32.mrb[21].mxu1  ;;  %v662_v39 = vmul.f32 %v465_v34, %v465_v34  ;;  %v1127_v40 = vmul.f32 %v934_v36, %v934_v36 }
 0x13e   : > { %1027 = vadd.xlane.f32.xlu1 %v2766_v43  ;;  %518 = vst [vmem:[%s2723_s17 + $0x148] sm:$0xff] %v467_v37  ;;  %v469_v41 = vpop.f32.mrb[22].mxu0  ;;  %984 = vst [vmem:[%s2723_s17 + $0x158] sm:$0xff] %v936_v38  ;;  %v938_v42 = vpop.f32.mrb[22].mxu1  ;;  %v2836_v45 = vadd.f32 %v467_v37, %v465_v34  ;;  %v2838_v35 = vadd.f32 %v936_v38, %v934_v36  ;;  %v663_v47 = vmul.f32 %v467_v37, %v467_v37 }
 0x13f   : > { %v1128_v50 = vmul.f32 %v936_v38, %v936_v38  ;;  %519 = vst [vmem:[%s2723_s17 + $0x160] sm:$0xff] %v469_v41  ;;  %v471_v51 = vpop.f32.mrb[23].mxu0  ;;  %985 = vst [vmem:[%s2723_s17 + $0x170] sm:$0xff] %v938_v42  ;;  %v940_v52 = vpop.f32.mrb[23].mxu1  ;;  %v664_v53 = vmul.f32 %v469_v41, %v469_v41  ;;  %v1129_v54 = vmul.f32 %v938_v42, %v938_v42 }
 0x140   : > { %687 = vadd.xlane.f32.xlu0 %v2768_v44  ;;  %520 = vst [vmem:[%s2723_s17 + $0x168] sm:$0xff] %v471_v51  ;;  %986 = vst [vmem:[%s2723_s17 + $0x178] sm:$0xff] %v940_v52  ;;  %v2845_v43 = vadd.f32 %v471_v51, %v469_v41  ;;  %v2847_v55 = vadd.f32 %v940_v52, %v938_v42  ;;  %v2849_v56 = vadd.f32 %v663_v47, %v662_v39 }
 0x141   : > { %v665_v57 = vmul.f32 %v471_v51, %v471_v51  ;;  %v2851_v60 = vadd.f32 %v1128_v50, %v1127_v40  ;;  %v1130_v61 = vmul.f32 %v940_v52, %v940_v52 }
 0x142   : > { %690 = vadd.xlane.f32.xlu1 %v2772_v48 }
 0x143   : > { %v2854_v62 = vadd.f32 %v665_v57, %v664_v53  ;;  %v2856_v44 = vadd.f32 %v1130_v61, %v1129_v54 }
 0x144   : > { %1152 = vadd.xlane.f32.xlu0 %v2770_v46  ;;  %v475_v63 = vpop.f32.mrb[24].mxu0  ;;  %v944_v0 = vpop.f32.mrb[24].mxu1 }
 0x145   : > { %521 = vst [vmem:[%s2723_s17 + $0x180] sm:$0xff] %v475_v63  ;;  %v477_v1 = vpop.f32.mrb[25].mxu0  ;;  %987 = vst [vmem:[%s2723_s17 + $0x190] sm:$0xff] %v944_v0  ;;  %v946_v5 = vpop.f32.mrb[25].mxu1  ;;  %v666_v7 = vmul.f32 %v475_v63, %v475_v63  ;;  %v1131_v10 = vmul.f32 %v944_v0, %v944_v0 }
 0x146   : > { %1155 = vadd.xlane.f32.xlu1 %v2774_v49  ;;  %522 = vst [vmem:[%s2723_s17 + $0x188] sm:$0xff] %v477_v1  ;;  %v479_v48 = vpop.f32.mrb[26].mxu0  ;;  %988 = vst [vmem:[%s2723_s17 + $0x198] sm:$0xff] %v946_v5  ;;  %v948_v11 = vpop.f32.mrb[26].mxu1  ;;  %v2864_v12 = vadd.f32 %v477_v1, %v475_v63  ;;  %v2866_v46 = vadd.f32 %v946_v5, %v944_v0  ;;  %v667_v13 = vmul.f32 %v477_v1, %v477_v1 }
 0x147   : > { %v1132_v14 = vmul.f32 %v946_v5, %v946_v5  ;;  %523 = vst [vmem:[%s2723_s17 + $0x1a0] sm:$0xff] %v479_v48  ;;  %v481_v15 = vpop.f32.mrb[27].mxu0  ;;  %989 = vst [vmem:[%s2723_s17 + $0x1b0] sm:$0xff] %v948_v11  ;;  %v950_v16 = vpop.f32.mrb[27].mxu1  ;;  %v668_v17 = vmul.f32 %v479_v48, %v479_v48  ;;  %v1133_v20 = vmul.f32 %v948_v11, %v948_v11 }
 0x148   : > { %564 = vadd.xlane.f32.xlu0 %v2780_v58  ;;  %524 = vst [vmem:[%s2723_s17 + $0x1a8] sm:$0xff] %v481_v15  ;;  %990 = vst [vmem:[%s2723_s17 + $0x1b8] sm:$0xff] %v950_v16  ;;  %v584_v49 = vadd.f32 %v481_v15, %v479_v48  ;;  %v1050_v21 = vadd.f32 %v950_v16, %v948_v11  ;;  %v710_v22 = vadd.f32 %v667_v13, %v666_v7  ;;  %v532_v48 = vld [vmem:[#allocation2 + $0x18] sm:$0xff] }
 0x149   : > { %v669_v23 = vmul.f32 %v481_v15, %v481_v15  ;;  %v2873_v24 = vadd.f32 %v1132_v14, %v1131_v10  ;;  %v1134_v26 = vmul.f32 %v950_v16, %v950_v16 }
 0x14a   : > { %567 = vadd.xlane.f32.xlu1 %v2789_v2 }
 0x14b   : > { %v713_v29 = vadd.f32 %v669_v23, %v668_v17  ;;  %v2876_v31 = vadd.f32 %v1134_v26, %v1133_v20  ;;  %v628_v20 = vld [vmem:[#allocation3 + $0x10] sm:$0xff]  ;;  %v629_v23 = vld [vmem:[#allocation3 + $0x18] sm:$0xff] }
 0x14c   : > { %1030 = vadd.xlane.f32.xlu0 %v2782_v59  ;;  %v485_v58 = vpop.f32.mrb[28].mxu0  ;;  %v954_v34 = vpop.f32.mrb[28].mxu1 }
 0x14d   : > { %525 = vst [vmem:[%s2723_s17 + $0x1c0] sm:$0xff] %v485_v58  ;;  %v487_v36 = vpop.f32.mrb[29].mxu0  ;;  %991 = vst [vmem:[%s2723_s17 + $0x1d0] sm:$0xff] %v954_v34  ;;  %v956_v37 = vpop.f32.mrb[29].mxu1  ;;  %v670_v38 = vmul.f32 %v485_v58, %v485_v58  ;;  %v1135_v39 = vmul.f32 %v954_v34, %v954_v34 }
 0x14e   : > { %1033 = vadd.xlane.f32.xlu1 %v2791_v3  ;;  %526 = vst [vmem:[%s2723_s17 + $0x1c8] sm:$0xff] %v487_v36  ;;  %v489_v2 = vpop.f32.mrb[30].mxu0  ;;  %992 = vst [vmem:[%s2723_s17 + $0x1d8] sm:$0xff] %v956_v37  ;;  %v958_v40 = vpop.f32.mrb[30].mxu1  ;;  %v587_v41 = vadd.f32 %v487_v36, %v485_v58  ;;  %v1053_v59 = vadd.f32 %v956_v37, %v954_v34  ;;  %v671_v42 = vmul.f32 %v487_v36, %v487_v36 }
 0x14f   : > { %v1136_v47 = vmul.f32 %v956_v37, %v956_v37  ;;  %527 = vst [vmem:[%s2723_s17 + $0x1e0] sm:$0xff] %v489_v2  ;;  %v491_v50 = vpop.f32.mrb[31].mxu0  ;;  %993 = vst [vmem:[%s2723_s17 + $0x1f0] sm:$0xff] %v958_v40  ;;  %v960_v51 = vpop.f32.mrb[31].mxu1  ;;  %v672_v52 = vmul.f32 %v489_v2, %v489_v2  ;;  %v1137_v53 = vmul.f32 %v958_v40, %v958_v40 }
 0x150   : > { %693 = vadd.xlane.f32.xlu0 %v2793_v4  ;;  %528 = vst [vmem:[%s2723_s17 + $0x1e8] sm:$0xff] %v491_v50  ;;  %v673_v3 = vmul.f32 %v491_v50, %v491_v50  ;;  %994 = vst [vmem:[%s2723_s17 + $0x1f8] sm:$0xff] %v960_v51  ;;  %v1138_v54 = vmul.f32 %v960_v51, %v960_v51  ;;  %v590_v57 = vadd.f32 %v491_v50, %v489_v2  ;;  %v529_v4 = vld [vmem:[#allocation2] sm:$0xff]  ;;  %v534_v2 = vld [vmem:[#allocation2 + $0x28] sm:$0xff] }
 0x151   : > { %v1056_v61 = vadd.f32 %v960_v51, %v958_v40  ;;  %v716_v63 = vadd.f32 %v671_v42, %v670_v38  ;;  %v1181_v0 = vadd.f32 %v1136_v47, %v1135_v39  ;;  %v533_v38 = vld [vmem:[#allocation2 + $0x20] sm:$0xff] }
 0x152   : > { %696 = vadd.xlane.f32.xlu1 %v2798_v8  ;;  %v719_v1 = vadd.f32 %v673_v3, %v672_v52  ;;  %v1184_v5 = vadd.f32 %v1138_v54, %v1137_v53  ;;  %v630_v3 = vld [vmem:[#allocation3 + $0x20] sm:$0xff] }
 0x154   : > { %1158 = vadd.xlane.f32.xlu0 %v2795_v6 }
 0x156   : > { %1161 = vadd.xlane.f32.xlu1 %v2800_v9 }
 0x158   : > { %570 = vadd.xlane.f32.xlu0 %v2808_v18 }
 0x15a   : > { %573 = vadd.xlane.f32.xlu1 %v2817_v25 }
 0x15c   : > { %1036 = vadd.xlane.f32.xlu0 %v2810_v19  ;;  %v627_v19 = vld [vmem:[#allocation3 + $0x8] sm:$0xff] }
 0x15e   : > { %1039 = vadd.xlane.f32.xlu1 %v2819_v27  ;;  %v530_v27 = vld [vmem:[#allocation2 + $0x8] sm:$0xff] }
 0x160   : > { %699 = vadd.xlane.f32.xlu0 %v2821_v28 }
 0x162   : > { %702 = vadd.xlane.f32.xlu1 %v2826_v32 }
 0x164   : > { %1164 = vadd.xlane.f32.xlu0 %v2823_v30 }
 0x166   : > { %1167 = vadd.xlane.f32.xlu1 %v2828_v33 }
 0x168   : > { %576 = vadd.xlane.f32.xlu0 %v2836_v45 }
 0x16a   : > { %579 = vadd.xlane.f32.xlu1 %v2845_v43 }
 0x16c   : > { %1042 = vadd.xlane.f32.xlu0 %v2838_v35  ;;  %v626_v35 = vld [vmem:[#allocation3] sm:$0xff] }
 0x16e   : > { %1045 = vadd.xlane.f32.xlu1 %v2847_v55 }
 0x170   : > { %705 = vadd.xlane.f32.xlu0 %v2849_v56  ;;  %v531_v56 = vld [vmem:[#allocation2 + $0x10] sm:$0xff] }
 0x172   : > { %708 = vadd.xlane.f32.xlu1 %v2854_v62 }
 0x174   : > { %582 = vadd.xlane.f32.xlu0 %v2864_v12 }
 0x176   : > { %585 = vadd.xlane.f32.xlu1 %v584_v49 }
 0x178   : > { %1048 = vadd.xlane.f32.xlu0 %v2866_v46 }
 0x17a   : > { %1051 = vadd.xlane.f32.xlu1 %v1050_v21 }
 0x17c   : > { %711 = vadd.xlane.f32.xlu0 %v710_v22 }
 0x17e   : > { %714 = vadd.xlane.f32.xlu1 %v713_v29 }
 0x180   : > { %588 = vadd.xlane.f32.xlu0 %v587_v41 }
 0x182   : > { %591 = vadd.xlane.f32.xlu1 %v590_v57  ;;  %v631_v57 = vld [vmem:[#allocation3 + $0x28] sm:$0xff] }
 0x184   : > { %1054 = vadd.xlane.f32.xlu0 %v1053_v59 }
 0x186   : > { %1057 = vadd.xlane.f32.xlu1 %v1056_v61 }
 0x188   : > { %717 = vadd.xlane.f32.xlu0 %v716_v63 }
 0x18a   : > { %720 = vadd.xlane.f32.xlu1 %v719_v1 }
 0x18c   : > { %1170 = vadd.xlane.f32.xlu0 %v2851_v60 }
 0x18e   : > { %1173 = vadd.xlane.f32.xlu1 %v2856_v44 }
 0x190   : > { %1176 = vadd.xlane.f32.xlu0 %v2873_v24 }
 0x192   : > { %1179 = vadd.xlane.f32.xlu1 %v2876_v31 }
 0x194   : > { %1182 = vadd.xlane.f32.xlu0 %v1181_v0 }
 0x196   : > { %1185 = vadd.xlane.f32.xlu1 %v1184_v5 }
 0x1a5   : > { %v547_v6 = vpop.xlane.xlu0 %546 }
 0x1a6   : > { %v593_v8 = vadd.f32 %v547_v6, %v529_v4 }
 0x1a7   : > { %v1016_v9 = vpop.xlane.xlu1 %1015 }
 0x1a8   : > { %610 = vst.msk [vmem:[#allocation2] sm:$0xff] %vm609_vm1, %v593_v8 }
 0x1a9   : > { %v1013_v18 = vpop.xlane.xlu0 %1012 }
 0x1ab   : > { %v679_v25 = vpop.xlane.xlu1 %678 }
 0x1ac   : > { %v723_v28 = vadd.f32 %v679_v25, %v627_v19  ;;  %v536_v25 = vld [vmem:[#allocation2 + $0x38] sm:$0xff] }
 0x1ad   : > { %v550_v30 = vpop.xlane.xlu0 %549 }
 0x1ae   : > { %739 = vst.msk [vmem:[#allocation3 + $0x8] sm:$0xff] %vm609_vm1, %v723_v28  ;;  %v594_v32 = vadd.f32 %v550_v30, %v530_v27 }
 0x1af   : > { %v995_v33 = vld [vmem:[#allocation2] sm:$0xff]  ;;  %v1144_v45 = vpop.xlane.xlu1 %1143 }
 0x1b0   : > { %v1059_v43 = vadd.f32 %v1013_v18, %v995_v33  ;;  %611 = vst.msk [vmem:[#allocation2 + $0x8] sm:$0xff] %vm609_vm1, %v594_v32  ;;  %v535_v18 = vld [vmem:[#allocation2 + $0x30] sm:$0xff] }
 0x1b1   : > { %v676_v55 = vpop.xlane.xlu0 %675 }
 0x1b2   : > { %1075 = vst.msk [vmem:[#allocation2] sm:$0xff] %vm609_vm1, %v1059_v43  ;;  %v722_v60 = vadd.f32 %v676_v55, %v626_v35 }
 0x1b3   : > { %v553_v62 = vpop.xlane.xlu1 %552 }
 0x1b4   : > { %738 = vst.msk [vmem:[#allocation3] sm:$0xff] %vm609_vm1, %v722_v60  ;;  %v595_v44 = vadd.f32 %v553_v62, %v531_v56  ;;  %v632_v56 = vld [vmem:[#allocation3 + $0x30] sm:$0xff]  ;;  %v633_v62 = vld [vmem:[#allocation3 + $0x38] sm:$0xff] }
 0x1b5   : > { %v1092_v7 = vld [vmem:[#allocation3 + $0x8] sm:$0xff]  ;;  %v1141_v10 = vpop.xlane.xlu0 %1140 }
 0x1b6   : > { %v1188_v11 = vadd.f32 %v1144_v45, %v1092_v7  ;;  %612 = vst.msk [vmem:[#allocation2 + $0x10] sm:$0xff] %vm609_vm1, %v595_v44 }
 0x1b7   : > { %v996_v12 = vld [vmem:[#allocation2 + $0x8] sm:$0xff]  ;;  %v556_v46 = vpop.xlane.xlu1 %555 }
 0x1b8   : > { %v1060_v13 = vadd.f32 %v1016_v9, %v996_v12  ;;  %1204 = vst.msk [vmem:[#allocation3 + $0x8] sm:$0xff] %vm609_vm1, %v1188_v11  ;;  %v596_v14 = vadd.f32 %v556_v46, %v532_v48 }
 0x1b9   : > { %v1019_v15 = vpop.xlane.xlu0 %1018 }
 0x1ba   : > { %1076 = vst.msk [vmem:[#allocation2 + $0x8] sm:$0xff] %vm609_vm1, %v1060_v13  ;;  %613 = vst.msk [vmem:[#allocation2 + $0x18] sm:$0xff] %vm609_vm1, %v596_v14 }
 0x1bb   : > { %v1091_v16 = vld [vmem:[#allocation3] sm:$0xff]  ;;  %v1022_v17 = vpop.xlane.xlu1 %1021 }
 0x1bc   : > { %v1187_v49 = vadd.f32 %v1141_v10, %v1091_v16 }
 0x1bd   : > { %v997_v21 = vld [vmem:[#allocation2 + $0x10] sm:$0xff]  ;;  %v682_v22 = vpop.xlane.xlu0 %681 }
 0x1be   : > { %1203 = vst.msk [vmem:[#allocation3] sm:$0xff] %vm609_vm1, %v1187_v49  ;;  %v1061_v24 = vadd.f32 %v1019_v15, %v997_v21  ;;  %v724_v26 = vadd.f32 %v682_v22, %v628_v20  ;;  %v537_v15 = vld [vmem:[#allocation2 + $0x40] sm:$0xff] }
 0x1bf   : > { %v685_v29 = vpop.xlane.xlu1 %684 }
 0x1c0   : > { %1077 = vst.msk [vmem:[#allocation2 + $0x10] sm:$0xff] %vm609_vm1, %v1061_v24  ;;  %740 = vst.msk [vmem:[#allocation3 + $0x10] sm:$0xff] %vm609_vm1, %v724_v26  ;;  %v725_v31 = vadd.f32 %v685_v29, %v629_v23 }
 0x1c1   : > { %v998_v58 = vld [vmem:[#allocation2 + $0x18] sm:$0xff]  ;;  %v1147_v34 = vpop.xlane.xlu0 %1146 }
 0x1c2   : > { %v1062_v36 = vadd.f32 %v1022_v17, %v998_v58  ;;  %741 = vst.msk [vmem:[#allocation3 + $0x18] sm:$0xff] %vm609_vm1, %v725_v31  ;;  %v538_v17 = vld [vmem:[#allocation2 + $0x48] sm:$0xff]  ;;  %v634_v58 = vld [vmem:[#allocation3 + $0x40] sm:$0xff] }
 0x1c3   : > { %v1150_v37 = vpop.xlane.xlu1 %1149 }
 0x1c4   : > { %1078 = vst.msk [vmem:[#allocation2 + $0x18] sm:$0xff] %vm609_vm1, %v1062_v36  ;;  %v635_v36 = vld [vmem:[#allocation3 + $0x48] sm:$0xff] }
 0x1c5   : > { %v559_v39 = vpop.xlane.xlu0 %558 }
 0x1c6   : > { %v597_v40 = vadd.f32 %v559_v39, %v533_v38 }
 0x1c7   : > { %v1093_v41 = vld [vmem:[#allocation3 + $0x10] sm:$0xff]  ;;  %v562_v59 = vpop.xlane.xlu1 %561 }
 0x1c8   : > { %v1189_v42 = vadd.f32 %v1147_v34, %v1093_v41  ;;  %614 = vst.msk [vmem:[#allocation2 + $0x20] sm:$0xff] %vm609_vm1, %v597_v40  ;;  %v598_v47 = vadd.f32 %v562_v59, %v534_v2 }
 0x1c9   : > { %v1094_v50 = vld [vmem:[#allocation3 + $0x18] sm:$0xff]  ;;  %v1025_v51 = vpop.xlane.xlu0 %1024 }
 0x1ca   : > { %1205 = vst.msk [vmem:[#allocation3 + $0x10] sm:$0xff] %vm609_vm1, %v1189_v42  ;;  %v1190_v52 = vadd.f32 %v1150_v37, %v1094_v50  ;;  %615 = vst.msk [vmem:[#allocation2 + $0x28] sm:$0xff] %vm609_vm1, %v598_v47  ;;  %v539_v50 = vld [vmem:[#allocation2 + $0x50] sm:$0xff] }
 0x1cb   : > { %v1028_v53 = vpop.xlane.xlu1 %1027 }
 0x1cc   : > { %1206 = vst.msk [vmem:[#allocation3 + $0x18] sm:$0xff] %vm609_vm1, %v1190_v52  ;;  %v540_v52 = vld [vmem:[#allocation2 + $0x58] sm:$0xff] }
 0x1cd   : > { %v688_v54 = vpop.xlane.xlu0 %687 }
 0x1ce   : > { %v726_v61 = vadd.f32 %v688_v54, %v630_v3 }
 0x1cf   : > { %v999_v63 = vld [vmem:[#allocation2 + $0x20] sm:$0xff]  ;;  %v691_v0 = vpop.xlane.xlu1 %690 }
 0x1d0   : > { %v1063_v1 = vadd.f32 %v1025_v51, %v999_v63  ;;  %742 = vst.msk [vmem:[#allocation3 + $0x20] sm:$0xff] %vm609_vm1, %v726_v61  ;;  %v727_v5 = vadd.f32 %v691_v0, %v631_v57 }
 0x1d1   : > { %v1000_v4 = vld [vmem:[#allocation2 + $0x28] sm:$0xff]  ;;  %v1153_v6 = vpop.xlane.xlu0 %1152 }
 0x1d2   : > { %1079 = vst.msk [vmem:[#allocation2 + $0x20] sm:$0xff] %vm609_vm1, %v1063_v1  ;;  %v1064_v8 = vadd.f32 %v1028_v53, %v1000_v4  ;;  %743 = vst.msk [vmem:[#allocation3 + $0x28] sm:$0xff] %vm609_vm1, %v727_v5  ;;  %v636_v4 = vld [vmem:[#allocation3 + $0x50] sm:$0xff] }
 0x1d3   : > { %v1156_v9 = vpop.xlane.xlu1 %1155 }
 0x1d4   : > { %1080 = vst.msk [vmem:[#allocation2 + $0x28] sm:$0xff] %vm609_vm1, %v1064_v8  ;;  %v637_v8 = vld [vmem:[#allocation3 + $0x58] sm:$0xff] }
 0x1d5   : > { %v565_v19 = vpop.xlane.xlu0 %564 }
 0x1d6   : > { %v599_v27 = vadd.f32 %v565_v19, %v535_v18 }
 0x1d7   : > { %v1095_v28 = vld [vmem:[#allocation3 + $0x20] sm:$0xff]  ;;  %v568_v30 = vpop.xlane.xlu1 %567 }
 0x1d8   : > { %v1191_v32 = vadd.f32 %v1153_v6, %v1095_v28  ;;  %616 = vst.msk [vmem:[#allocation2 + $0x30] sm:$0xff] %vm609_vm1, %v599_v27  ;;  %v600_v33 = vadd.f32 %v568_v30, %v536_v25  ;;  %v541_v25 = vld [vmem:[#allocation2 + $0x60] sm:$0xff] }
 0x1d9   : > { %v1096_v45 = vld [vmem:[#allocation3 + $0x28] sm:$0xff]  ;;  %v1031_v35 = vpop.xlane.xlu0 %1030 }
 0x1da   : > { %1207 = vst.msk [vmem:[#allocation3 + $0x20] sm:$0xff] %vm609_vm1, %v1191_v32  ;;  %v1192_v43 = vadd.f32 %v1156_v9, %v1096_v45  ;;  %617 = vst.msk [vmem:[#allocation2 + $0x38] sm:$0xff] %vm609_vm1, %v600_v33  ;;  %v542_v33 = vld [vmem:[#allocation2 + $0x68] sm:$0xff] }
 0x1db   : > { %v1034_v55 = vpop.xlane.xlu1 %1033 }
 0x1dc   : > { %1208 = vst.msk [vmem:[#allocation3 + $0x28] sm:$0xff] %vm609_vm1, %v1192_v43 }
 0x1dd   : > { %v694_v60 = vpop.xlane.xlu0 %693 }
 0x1de   : > { %v728_v44 = vadd.f32 %v694_v60, %v632_v56 }
 0x1df   : > { %v1001_v7 = vld [vmem:[#allocation2 + $0x30] sm:$0xff]  ;;  %v697_v10 = vpop.xlane.xlu1 %696 }
 0x1e0   : > { %v1065_v48 = vadd.f32 %v1031_v35, %v1001_v7  ;;  %744 = vst.msk [vmem:[#allocation3 + $0x30] sm:$0xff] %vm609_vm1, %v728_v44  ;;  %v729_v11 = vadd.f32 %v697_v10, %v633_v62  ;;  %v638_v62 = vld [vmem:[#allocation3 + $0x60] sm:$0xff]  ;;  %v639_v7 = vld [vmem:[#allocation3 + $0x68] sm:$0xff] }
 0x1e1   : > { %v1002_v12 = vld [vmem:[#allocation2 + $0x38] sm:$0xff]  ;;  %v1159_v46 = vpop.xlane.xlu0 %1158 }
 0x1e2   : > { %1081 = vst.msk [vmem:[#allocation2 + $0x30] sm:$0xff] %vm609_vm1, %v1065_v48  ;;  %v1066_v13 = vadd.f32 %v1034_v55, %v1002_v12  ;;  %745 = vst.msk [vmem:[#allocation3 + $0x38] sm:$0xff] %vm609_vm1, %v729_v11  ;;  %v543_v12 = vld [vmem:[#allocation2 + $0x70] sm:$0xff] }
 0x1e3   : > { %v1162_v14 = vpop.xlane.xlu1 %1161 }
 0x1e4   : > { %1082 = vst.msk [vmem:[#allocation2 + $0x38] sm:$0xff] %vm609_vm1, %v1066_v13 }
 0x1e5   : > { %v571_v16 = vpop.xlane.xlu0 %570 }
 0x1e6   : > { %v601_v20 = vadd.f32 %v571_v16, %v537_v15  ;;  %v544_v16 = vld [vmem:[#allocation2 + $0x78] sm:$0xff] }
 0x1e7   : > { %v1097_v49 = vld [vmem:[#allocation3 + $0x30] sm:$0xff]  ;;  %v574_v21 = vpop.xlane.xlu1 %573 }
 0x1e8   : > { %v1193_v22 = vadd.f32 %v1159_v46, %v1097_v49  ;;  %618 = vst.msk [vmem:[#allocation2 + $0x40] sm:$0xff] %vm609_vm1, %v601_v20  ;;  %v602_v23 = vadd.f32 %v574_v21, %v538_v17 }
 0x1e9   : > { %v1098_v24 = vld [vmem:[#allocation3 + $0x38] sm:$0xff]  ;;  %v1037_v26 = vpop.xlane.xlu0 %1036 }
 0x1ea   : > { %1209 = vst.msk [vmem:[#allocation3 + $0x30] sm:$0xff] %vm609_vm1, %v1193_v22  ;;  %v1194_v29 = vadd.f32 %v1162_v14, %v1098_v24  ;;  %619 = vst.msk [vmem:[#allocation2 + $0x48] sm:$0xff] %vm609_vm1, %v602_v23  ;;  %v640_v24 = vld [vmem:[#allocation3 + $0x70] sm:$0xff] }
 0x1eb   : > { %v1040_v31 = vpop.xlane.xlu1 %1039 }
 0x1ec   : > { %1210 = vst.msk [vmem:[#allocation3 + $0x38] sm:$0xff] %vm609_vm1, %v1194_v29  ;;  %v641_v29 = vld [vmem:[#allocation3 + $0x78] sm:$0xff] }
 0x1ed   : > { %v700_v34 = vpop.xlane.xlu0 %699 }
 0x1ee   : > { %v730_v37 = vadd.f32 %v700_v34, %v634_v58 }
 0x1ef   : > { %v1003_v38 = vld [vmem:[#allocation2 + $0x40] sm:$0xff]  ;;  %v703_v39 = vpop.xlane.xlu1 %702 }
 0x1f0   : > { %v1067_v2 = vadd.f32 %v1037_v26, %v1003_v38  ;;  %746 = vst.msk [vmem:[#allocation3 + $0x40] sm:$0xff] %vm609_vm1, %v730_v37  ;;  %v731_v40 = vadd.f32 %v703_v39, %v635_v36 }
 0x1f1   : > { %v1004_v41 = vld [vmem:[#allocation2 + $0x48] sm:$0xff]  ;;  %v1165_v59 = vpop.xlane.xlu0 %1164 }
 0x1f2   : > { %1083 = vst.msk [vmem:[#allocation2 + $0x40] sm:$0xff] %vm609_vm1, %v1067_v2  ;;  %v1068_v42 = vadd.f32 %v1040_v31, %v1004_v41  ;;  %747 = vst.msk [vmem:[#allocation3 + $0x48] sm:$0xff] %vm609_vm1, %v731_v40 }
 0x1f3   : > { %v1168_v47 = vpop.xlane.xlu1 %1167 }
 0x1f4   : > { %1084 = vst.msk [vmem:[#allocation2 + $0x48] sm:$0xff] %vm609_vm1, %v1068_v42 }
 0x1f5   : > { %v577_v51 = vpop.xlane.xlu0 %576 }
 0x1f6   : > { %v603_v53 = vadd.f32 %v577_v51, %v539_v50 }
 0x1f7   : > { %v1099_v3 = vld [vmem:[#allocation3 + $0x40] sm:$0xff]  ;;  %v580_v54 = vpop.xlane.xlu1 %579 }
 0x1f8   : > { %v1195_v57 = vadd.f32 %v1165_v59, %v1099_v3  ;;  %620 = vst.msk [vmem:[#allocation2 + $0x50] sm:$0xff] %vm609_vm1, %v603_v53  ;;  %v604_v61 = vadd.f32 %v580_v54, %v540_v52 }
 0x1f9   : > { %v1100_v63 = vld [vmem:[#allocation3 + $0x48] sm:$0xff]  ;;  %v1043_v0 = vpop.xlane.xlu0 %1042 }
 0x1fa   : > { %1211 = vst.msk [vmem:[#allocation3 + $0x40] sm:$0xff] %vm609_vm1, %v1195_v57  ;;  %v1196_v1 = vadd.f32 %v1168_v47, %v1100_v63  ;;  %621 = vst.msk [vmem:[#allocation2 + $0x58] sm:$0xff] %vm609_vm1, %v604_v61 }
 0x1fb   : > { %v1046_v5 = vpop.xlane.xlu1 %1045 }
 0x1fc   : > { %1212 = vst.msk [vmem:[#allocation3 + $0x48] sm:$0xff] %vm609_vm1, %v1196_v1 }
 0x1fd   : > { %v706_v6 = vpop.xlane.xlu0 %705 }
 0x1fe   : > { %v732_v9 = vadd.f32 %v706_v6, %v636_v4 }
 0x1ff   : > { %v1005_v18 = vld [vmem:[#allocation2 + $0x50] sm:$0xff]  ;;  %v709_v19 = vpop.xlane.xlu1 %708 }
 0x200   : > { %v1069_v27 = vadd.f32 %v1043_v0, %v1005_v18  ;;  %748 = vst.msk [vmem:[#allocation3 + $0x50] sm:$0xff] %vm609_vm1, %v732_v9  ;;  %v733_v28 = vadd.f32 %v709_v19, %v637_v8 }
 0x201   : > { %v1006_v30 = vld [vmem:[#allocation2 + $0x58] sm:$0xff]  ;;  %v583_v32 = vpop.xlane.xlu0 %582 }
 0x202   : > { %1085 = vst.msk [vmem:[#allocation2 + $0x50] sm:$0xff] %vm609_vm1, %v1069_v27  ;;  %v1070_v45 = vadd.f32 %v1046_v5, %v1006_v30  ;;  %749 = vst.msk [vmem:[#allocation3 + $0x58] sm:$0xff] %vm609_vm1, %v733_v28  ;;  %v605_v35 = vadd.f32 %v583_v32, %v541_v25 }
 0x203   : > { %v586_v43 = vpop.xlane.xlu1 %585 }
 0x204   : > { %1086 = vst.msk [vmem:[#allocation2 + $0x58] sm:$0xff] %vm609_vm1, %v1070_v45  ;;  %622 = vst.msk [vmem:[#allocation2 + $0x60] sm:$0xff] %vm609_vm1, %v605_v35  ;;  %v606_v55 = vadd.f32 %v586_v43, %v542_v33 }
 0x205   : > { %v1049_v56 = vpop.xlane.xlu0 %1048 }
 0x206   : > { %623 = vst.msk [vmem:[#allocation2 + $0x68] sm:$0xff] %vm609_vm1, %v606_v55 }
 0x207   : > { %v1052_v60 = vpop.xlane.xlu1 %1051  ;;  %v1101_v39 = vld [vmem:[#allocation3 + $0x50] sm:$0xff] }
 0x209   : > { %v712_v44 = vpop.xlane.xlu0 %711  ;;  %v1102_v59 = vld [vmem:[#allocation3 + $0x58] sm:$0xff] }
 0x20a   : > { %v734_v10 = vadd.f32 %v712_v44, %v638_v62 }
 0x20b   : > { %v1007_v48 = vld [vmem:[#allocation2 + $0x60] sm:$0xff]  ;;  %v715_v11 = vpop.xlane.xlu1 %714 }
 0x20c   : > { %v1071_v46 = vadd.f32 %v1049_v56, %v1007_v48  ;;  %750 = vst.msk [vmem:[#allocation3 + $0x60] sm:$0xff] %vm609_vm1, %v734_v10  ;;  %v735_v13 = vadd.f32 %v715_v11, %v639_v7 }
 0x20d   : > { %v1008_v14 = vld [vmem:[#allocation2 + $0x68] sm:$0xff]  ;;  %v589_v15 = vpop.xlane.xlu0 %588 }
 0x20e   : > { %1087 = vst.msk [vmem:[#allocation2 + $0x60] sm:$0xff] %vm609_vm1, %v1071_v46  ;;  %v1072_v17 = vadd.f32 %v1052_v60, %v1008_v14  ;;  %751 = vst.msk [vmem:[#allocation3 + $0x68] sm:$0xff] %vm609_vm1, %v735_v13  ;;  %v607_v20 = vadd.f32 %v589_v15, %v543_v12 }
 0x20f   : > { %v592_v49 = vpop.xlane.xlu1 %591 }
 0x210   : > { %1088 = vst.msk [vmem:[#allocation2 + $0x68] sm:$0xff] %vm609_vm1, %v1072_v17  ;;  %624 = vst.msk [vmem:[#allocation2 + $0x70] sm:$0xff] %vm609_vm1, %v607_v20  ;;  %v608_v21 = vadd.f32 %v592_v49, %v544_v16 }
 0x211   : > { %v1055_v22 = vpop.xlane.xlu0 %1054 }
 0x212   : > { %625 = vst.msk [vmem:[#allocation2 + $0x78] sm:$0xff] %vm609_vm1, %v608_v21 }
 0x213   : > { %v1058_v23 = vpop.xlane.xlu1 %1057  ;;  %v1103_v50 = vld [vmem:[#allocation3 + $0x60] sm:$0xff] }
 0x215   : > { %v718_v26 = vpop.xlane.xlu0 %717  ;;  %v1104_v53 = vld [vmem:[#allocation3 + $0x68] sm:$0xff] }
 0x216   : > { %v736_v31 = vadd.f32 %v718_v26, %v640_v24 }
 0x217   : > { %v1009_v58 = vld [vmem:[#allocation2 + $0x70] sm:$0xff]  ;;  %v721_v34 = vpop.xlane.xlu1 %720 }
 0x218   : > { %v1073_v36 = vadd.f32 %v1055_v22, %v1009_v58  ;;  %752 = vst.msk [vmem:[#allocation3 + $0x70] sm:$0xff] %vm609_vm1, %v736_v31  ;;  %v737_v37 = vadd.f32 %v721_v34, %v641_v29 }
 0x219   : > { %v1010_v38 = vld [vmem:[#allocation2 + $0x78] sm:$0xff]  ;;  %v1171_v2 = vpop.xlane.xlu0 %1170 }
 0x21a   : > { %1089 = vst.msk [vmem:[#allocation2 + $0x70] sm:$0xff] %vm609_vm1, %v1073_v36  ;;  %v1074_v40 = vadd.f32 %v1058_v23, %v1010_v38  ;;  %753 = vst.msk [vmem:[#allocation3 + $0x78] sm:$0xff] %vm609_vm1, %v737_v37  ;;  %v1197_v41 = vadd.f32 %v1171_v2, %v1101_v39 }
 0x21b   : > { %v1174_v42 = vpop.xlane.xlu1 %1173 }
 0x21c   : > { %1090 = vst.msk [vmem:[#allocation2 + $0x78] sm:$0xff] %vm609_vm1, %v1074_v40  ;;  %1213 = vst.msk [vmem:[#allocation3 + $0x50] sm:$0xff] %vm609_vm1, %v1197_v41  ;;  %v1198_v47 = vadd.f32 %v1174_v42, %v1102_v59 }
 0x21d   : > { %v1177_v51 = vpop.xlane.xlu0 %1176 }
 0x21e   : > { %1214 = vst.msk [vmem:[#allocation3 + $0x58] sm:$0xff] %vm609_vm1, %v1198_v47  ;;  %v1199_v52 = vadd.f32 %v1177_v51, %v1103_v50 }
 0x21f   : > { %v1180_v3 = vpop.xlane.xlu1 %1179  ;;  %v1105_v57 = vld [vmem:[#allocation3 + $0x70] sm:$0xff] }
 0x220   : > { %1215 = vst.msk [vmem:[#allocation3 + $0x60] sm:$0xff] %vm609_vm1, %v1199_v52  ;;  %v1200_v54 = vadd.f32 %v1180_v3, %v1104_v53  ;;  %1222 = sbr.rel (%p2327_p5) target bundleno = 823 (0x337), region = 44 }
 0x221   : > { %v1183_v61 = vpop.xlane.xlu0 %1182  ;;  %v1106_v0 = vld [vmem:[#allocation3 + $0x78] sm:$0xff] }
 0x222   : > { %1216 = vst.msk [vmem:[#allocation3 + $0x68] sm:$0xff] %vm609_vm1, %v1200_v54  ;;  %v1201_v63 = vadd.f32 %v1183_v61, %v1105_v57 }
 0x223   : > { %v1186_v1 = vpop.xlane.xlu1 %1185 }
 0x224   : > { %1217 = vst.msk [vmem:[#allocation3 + $0x70] sm:$0xff] %vm609_vm1, %v1201_v63  ;;  %v1202_v5 = vadd.f32 %v1186_v1, %v1106_v0 }
 0x226   : > { %1218 = vst.msk [vmem:[#allocation3 + $0x78] sm:$0xff] %vm609_vm1, %v1202_v5 }
 0x227   : > { %v1225_v4 = vld [vmem:[#allocation2 + $0x10] sm:$0xff]  ;;  %v2571_v8 = vmov 0   ;;  %v1223_v19 = vld [vmem:[#allocation2] sm:$0xff]  ;;  %v1226_v30 = vld [vmem:[#allocation2 + $0x18] sm:$0xff] }
 0x228   : > { %v1257_v6 = vld [vmem:[#allocation3 + $0x10] sm:$0xff]  ;;  %2528 = vset.pattern.permute.xlu1 %v2571_v8  ;;  %2527 = vset.pattern.permute.xlu0 %v2571_v8  ;;  %v2977_v9 = vmul.f32 0.0009765625, %v1225_v4  ;;  %v1255_v25 = vld [vmem:[#allocation3] sm:$0xff]  ;;  %v2979_v27 = vmul.f32 0.0009765625, %v1223_v19  ;;  %v1258_v32 = vld [vmem:[#allocation3 + $0x18] sm:$0xff]  ;;  %v2983_v45 = vmul.f32 0.0009765625, %v1226_v30 }
 0x229   : > { %v1273_v18 = vmul.f32 0.0009765625, %v1257_v6  ;;  %v1271_v28 = vmul.f32 0.0009765625, %v1255_v25  ;;  %v1274_v35 = vmul.f32 0.0009765625, %v1258_v32  ;;  %v1224_v43 = vld [vmem:[#allocation2 + $0x8] sm:$0xff]  ;;  %v1227_v46 = vld [vmem:[#allocation2 + $0x20] sm:$0xff]  ;;  %v1230_v20 = vld [vmem:[#allocation2 + $0x38] sm:$0xff] }
 0x22a   : > { %v1289_v33 = vmul.f32 %v2977_v9, %v2977_v9  ;;  %v1256_v55 = vld [vmem:[#allocation3 + $0x8] sm:$0xff]  ;;  %v1287_v56 = vmul.f32 %v2979_v27, %v2979_v27  ;;  %v2987_v60 = vmul.f32 0.0009765625, %v1224_v43  ;;  %v1290_v48 = vmul.f32 %v2983_v45, %v2983_v45  ;;  %v1259_v13 = vld [vmem:[#allocation3 + $0x20] sm:$0xff]  ;;  %v1262_v49 = vld [vmem:[#allocation3 + $0x38] sm:$0xff] }
 0x22b   : > { %v1272_v62 = vmul.f32 0.0009765625, %v1256_v55  ;;  %v1228_v44 = vld [vmem:[#allocation2 + $0x28] sm:$0xff]  ;;  %v2995_v16 = vmul.f32 0.0009765625, %v1227_v46  ;;  %v1275_v17 = vmul.f32 0.0009765625, %v1259_v13  ;;  %v2999_v24 = vmul.f32 0.0009765625, %v1230_v20  ;;  %v1229_v26 = vld [vmem:[#allocation2 + $0x30] sm:$0xff] }
 0x22c   : > { %v1260_v7 = vld [vmem:[#allocation3 + $0x28] sm:$0xff]  ;;  %v1305_v10 = vsub.f32 %v1273_v18, %v1289_v33  ;;  %v2991_v11 = vmul.f32 0.0009765625, %v1228_v44  ;;  %v1303_v14 = vsub.f32 %v1271_v28, %v1287_v56  ;;  %v1288_v15 = vmul.f32 %v2987_v60, %v2987_v60  ;;  %v1261_v2 = vld [vmem:[#allocation3 + $0x30] sm:$0xff]  ;;  %v1231_v61 = vld [vmem:[#allocation2 + $0x40] sm:$0xff] }
 0x22d   : > { %v1276_v12 = vmul.f32 0.0009765625, %v1260_v7  ;;  %v1306_v22 = vsub.f32 %v1274_v35, %v1290_v48  ;;  %v1291_v58 = vmul.f32 %v2995_v16, %v2995_v16  ;;  %v1278_v34 = vmul.f32 0.0009765625, %v1262_v49  ;;  %v1232_v52 = vld [vmem:[#allocation2 + $0x48] sm:$0xff]  ;;  %v1263_v5 = vld [vmem:[#allocation3 + $0x40] sm:$0xff]  ;;  %v1234_v4 = vld [vmem:[#allocation2 + $0x58] sm:$0xff] }
 0x22e   : > { %v1321_v21 = vmax.f32 %v1305_v10, 0.0  ;;  %v1292_v23 = vmul.f32 %v2991_v11, %v2991_v11  ;;  %v1319_v29 = vmax.f32 %v1303_v14, 0.0  ;;  %v1304_v31 = vsub.f32 %v1272_v62, %v1288_v15  ;;  %v1264_v53 = vld [vmem:[#allocation3 + $0x48] sm:$0xff]  ;;  %v1266_v19 = vld [vmem:[#allocation3 + $0x58] sm:$0xff]  ;;  %v1233_v32 = vld [vmem:[#allocation2 + $0x50] sm:$0xff] }
 0x22f   : > { %v1322_v37 = vmax.f32 %v1306_v22, 0.0  ;;  %v1294_v39 = vmul.f32 %v2999_v24, %v2999_v24  ;;  %v1307_v59 = vsub.f32 %v1275_v17, %v1291_v58  ;;  %v3005_v42 = vmul.f32 0.0009765625, %v1229_v26  ;;  %v1265_v33 = vld [vmem:[#allocation3 + $0x50] sm:$0xff]  ;;  %v1236_v56 = vld [vmem:[#allocation2 + $0x68] sm:$0xff]  ;;  %v1235_v48 = vld [vmem:[#allocation2 + $0x60] sm:$0xff] }
 0x230   : > { %v1337_v36 = vadd.f32 0.001, %v1321_v21  ;;  %v1308_v38 = vsub.f32 %v1276_v12, %v1292_v23  ;;  %v1335_v40 = vadd.f32 0.001, %v1319_v29  ;;  %v1320_v41 = vmax.f32 %v1304_v31, 0.0  ;;  %v1268_v62 = vld [vmem:[#allocation3 + $0x68] sm:$0xff] }
 0x231   : > { %v1338_v47 = vadd.f32 0.001, %v1322_v37  ;;  %v1310_v51 = vsub.f32 %v1278_v34, %v1294_v39  ;;  %v1323_v54 = vmax.f32 %v1307_v59, 0.0  ;;  %v1277_v57 = vmul.f32 0.0009765625, %v1261_v2  ;;  %v1267_v15 = vld [vmem:[#allocation3 + $0x60] sm:$0xff]  ;;  %v1369_v17 = vld [vmem:[%s4342_s2 + $0x10] sm:$0xff] }
 0x232   : > { %2529 = vrsqrt.f32 %v1337_v36  ;;  %v1324_v50 = vmax.f32 %v1308_v38, 0.0  ;;  %v1336_v3 = vadd.f32 0.001, %v1320_v41  ;;  %v1293_v1 = vmul.f32 %v3005_v42, %v3005_v42  ;;  %v1367_v23 = vld [vmem:[%s4342_s2] sm:$0xff]  ;;  %v1370_v36 = vld [vmem:[%s4342_s2 + $0x18] sm:$0xff]  ;;  %v1368_v41 = vld [vmem:[%s4342_s2 + $0x8] sm:$0xff] }
 0x233   : > { %2531 = vrsqrt.f32 %v1335_v40  ;;  %v1326_v0 = vmax.f32 %v1310_v51, 0.0  ;;  %v1339_v6 = vadd.f32 0.001, %v1323_v54  ;;  %v3009_v8 = vmul.f32 0.0009765625, %v1232_v52 }
 0x234   : > { %2533 = vrsqrt.f32 %v1338_v47  ;;  %v1340_v63 = vadd.f32 0.001, %v1324_v50  ;;  %v1280_v18 = vmul.f32 0.0009765625, %v1264_v53  ;;  %v1309_v28 = vsub.f32 %v1277_v57, %v1293_v1  ;;  %v1270_v1 = vld [vmem:[#allocation3 + $0x78] sm:$0xff] }
 0x235   : > { %2535 = vrsqrt.f32 %v1336_v3  ;;  %v1342_v25 = vadd.f32 0.001, %v1326_v0  ;;  %v3011_v30 = vmul.f32 0.0009765625, %v1231_v61  ;;  %v1296_v35 = vmul.f32 %v3009_v8, %v3009_v8  ;;  %v1238_v0 = vld [vmem:[#allocation2 + $0x78] sm:$0xff] }
 0x236   : > { %2537 = vrsqrt.f32 %v1340_v63  ;;  %v1279_v43 = vmul.f32 0.0009765625, %v1263_v5  ;;  %v3015_v55 = vmul.f32 0.0009765625, %v1234_v4  ;;  %v1325_v44 = vmax.f32 %v1309_v28, 0.0  ;;  %v1371_v28 = vld [vmem:[%s4342_s2 + $0x20] sm:$0xff] }
 0x237   : > { %2539 = vrsqrt.f32 %v1339_v6  ;;  %v1295_v7 = vmul.f32 %v3011_v30, %v3011_v30  ;;  %v1282_v10 = vmul.f32 0.0009765625, %v1266_v19  ;;  %v1312_v12 = vsub.f32 %v1280_v18, %v1296_v35  ;;  %v1372_v6 = vld [vmem:[%s4342_s2 + $0x28] sm:$0xff]  ;;  %v1237_v19 = vld [vmem:[#allocation2 + $0x70] sm:$0xff] }
 0x238   : > { %2541 = vrsqrt.f32 %v1342_v25  ;;  %v1298_v46 = vmul.f32 %v3015_v55, %v3015_v55  ;;  %v3021_v13 = vmul.f32 0.0009765625, %v1233_v32  ;;  %v1281_v14 = vmul.f32 0.0009765625, %v1265_v33  ;;  %v1269_v35 = vld [vmem:[#allocation3 + $0x70] sm:$0xff] }
 0x239   : > { %v1341_v20 = vadd.f32 0.001, %v1325_v44  ;;  %v1311_v49 = vsub.f32 %v1279_v43, %v1295_v7  ;;  %v3026_v21 = vmul.f32 0.0009765625, %v1236_v56  ;;  %v1284_v22 = vmul.f32 0.0009765625, %v1268_v62 }
 0x23a   : > { %v1328_v26 = vmax.f32 %v1312_v12, 0.0  ;;  %v1314_v29 = vsub.f32 %v1282_v10, %v1298_v46  ;;  %v1297_v31 = vmul.f32 %v3021_v13, %v3021_v13  ;;  %v3033_v58 = vmul.f32 0.0009765625, %v1235_v48 }
 0x23b   : > { %2543 = vrsqrt.f32 %v1341_v20  ;;  %v1327_v37 = vmax.f32 %v1311_v49, 0.0  ;;  %v1300_v38 = vmul.f32 %v3026_v21, %v3026_v21  ;;  %v1283_v39 = vmul.f32 0.0009765625, %v1267_v15  ;;  %v1373_v20 = vld [vmem:[%s4342_s2 + $0x30] sm:$0xff] }
 0x23c   : > { %v2530_v34 = vpop.eup %2529  ;;  %v1344_v59 = vadd.f32 0.001, %v1328_v26  ;;  %v1330_v47 = vmax.f32 %v1314_v29, 0.0  ;;  %v1313_v50 = vsub.f32 %v1281_v14, %v1297_v31  ;;  %v1299_v54 = vmul.f32 %v3033_v58, %v3033_v58  ;;  %v1374_v14 = vld [vmem:[%s4342_s2 + $0x38] sm:$0xff] }
 0x23d   : > { %v2532_v2 = vpop.eup %2531  ;;  %v3040_v40 = vmul.f32 %v2530_v34, %v1369_v17  ;;  %v1343_v53 = vadd.f32 0.001, %v1327_v37  ;;  %v1316_v3 = vsub.f32 %v1284_v22, %v1300_v38  ;;  %v3061_v62 = vmul.f32 0.0009765625, %v1238_v0 }
 0x23e   : > { %v2534_v51 = vpop.eup %2533  ;;  %v3045_v52 = vmul.f32 %v2532_v2, %v1367_v23  ;;  %2545 = vrsqrt.f32 %v1344_v59  ;;  %v1346_v63 = vadd.f32 0.001, %v1330_v47  ;;  %v1329_v18 = vmax.f32 %v1313_v50, 0.0 }
 0x23f   : > { %v2536_v57 = vpop.eup %2535  ;;  %1523 = vperm.xlu1 %2528, %v3040_v40   ;;  %v3050_v61 = vmul.f32 %v2534_v51, %v1370_v36  ;;  %2547 = vrsqrt.f32 %v1343_v53  ;;  %v1332_v32 = vmax.f32 %v1316_v3, 0.0  ;;  %v1315_v33 = vsub.f32 %v1283_v39, %v1299_v54  ;;  %v1376_v36 = vld [vmem:[%s4342_s2 + $0x48] sm:$0xff]  ;;  %v1375_v39 = vld [vmem:[%s4342_s2 + $0x40] sm:$0xff]  ;;  %v1378_v3 = vld [vmem:[%s4342_s2 + $0x58] sm:$0xff] }
 0x240   : > { %v2538_v5 = vpop.eup %2537  ;;  %1513 = vperm.xlu0 %2527, %v3045_v52   ;;  %v3053_v4 = vmul.f32 %v2536_v57, %v1368_v41  ;;  %2549 = vrsqrt.f32 %v1346_v63  ;;  %v1345_v56 = vadd.f32 0.001, %v1329_v18  ;;  %v1286_v44 = vmul.f32 0.0009765625, %v1270_v1  ;;  %v1377_v54 = vld [vmem:[%s4342_s2 + $0x50] sm:$0xff]  ;;  %v1379_v18 = vld [vmem:[%s4342_s2 + $0x60] sm:$0xff] }
 0x241   : > { %v2540_v25 = vpop.eup %2539  ;;  %v3064_v7 = vmul.f32 %v2538_v5, %v1372_v6  ;;  %v1348_v10 = vadd.f32 0.001, %v1332_v32  ;;  %v1331_v48 = vmax.f32 %v1315_v33, 0.0  ;;  %v3066_v12 = vmul.f32 0.0009765625, %v1237_v19  ;;  %v1380_v5 = vld [vmem:[%s4342_s2 + $0x68] sm:$0xff]  ;;  %v1381_v32 = vld [vmem:[%s4342_s2 + $0x70] sm:$0xff] }
 0x242   : > { %v2542_v43 = vpop.eup %2541  ;;  %v3069_v46 = vmul.f32 %v2540_v25, %v1371_v28  ;;  %2551 = vrsqrt.f32 %v1345_v56  ;;  %v1302_v15 = vmul.f32 %v3061_v62, %v3061_v62  ;;  %v1285_v17 = vmul.f32 0.0009765625, %v1269_v35  ;;  %v1382_v28 = vld [vmem:[%s4342_s2 + $0x78] sm:$0xff] }
 0x243   : > { %1528 = vperm.xlu1 %2528, %v3050_v61   ;;  %v1347_v49 = vadd.f32 0.001, %v1331_v48  ;;  %v1301_v22 = vmul.f32 %v3066_v12, %v3066_v12  ;;  %2553 = vrsqrt.f32 %v1348_v10  ;;  %v3082_v29 = vmul.f32 %v2542_v43, %v1374_v14  ;;  %v1400_v48 = vld [vmem:[%s4343_s3 + $0x8] sm:$0xff]  ;;  %v1399_v14 = vld [vmem:[%s4343_s3] sm:$0xff] }
 0x244   : > { %1518 = vperm.xlu0 %2527, %v3053_v4   ;;  %v1318_v26 = vsub.f32 %v1286_v44, %v1302_v15  ;;  %v1416_v56 = vmul.f32 %v3053_v4, %v2987_v60  ;;  %v1415_v44 = vmul.f32 %v3045_v52, %v2979_v27  ;;  %v1417_v60 = vmul.f32 %v3040_v40, %v2977_v9  ;;  %v1402_v52 = vld [vmem:[%s4343_s3 + $0x18] sm:$0xff]  ;;  %v1401_v4 = vld [vmem:[%s4343_s3 + $0x10] sm:$0xff]  ;;  %v1404_v9 = vld [vmem:[%s4343_s3 + $0x28] sm:$0xff] }
 0x245   : > { %v2544_v23 = vpop.eup %2543  ;;  %2555 = vrsqrt.f32 %v1347_v49  ;;  %v1317_v31 = vsub.f32 %v1285_v17, %v1301_v22  ;;  %v1418_v17 = vmul.f32 %v3050_v61, %v2983_v45  ;;  %v1420_v49 = vmul.f32 %v3064_v7, %v2991_v11  ;;  %v1403_v61 = vld [vmem:[%s4343_s3 + $0x20] sm:$0xff] }
 0x246   : > { %v3085_v34 = vmul.f32 %v2544_v23, %v1373_v20  ;;  %v1334_v37 = vmax.f32 %v1318_v26, 0.0  ;;  %v1432_v15 = vsub.f32 %v1400_v48, %v1416_v56  ;;  %v1431_v27 = vsub.f32 %v1399_v14, %v1415_v44  ;;  %v2331_v56 = vld [vmem:[%s4344_s4 + $0x218] sm:$0xff]  ;;  %v1460_v48 = vld [vmem:[%s4344_s4 + $0x68] sm:$0xff]  ;;  %v1461_v14 = vld [vmem:[%s4344_s4 + $0x70] sm:$0xff] }
 0x247   : > { %1538 = vperm.xlu1 %2528, %v3064_v7   ;;  %v1333_v2 = vmax.f32 %v1317_v31, 0.0  ;;  %v1434_v20 = vsub.f32 %v1402_v52, %v1418_v17  ;;  %v1433_v45 = vsub.f32 %v1401_v4, %v1417_v60  ;;  %v1419_v40 = vmul.f32 %v3069_v46, %v2995_v16  ;;  %v1406_v7 = vld [vmem:[%s4343_s3 + $0x38] sm:$0xff]  ;;  %v1405_v16 = vld [vmem:[%s4343_s3 + $0x30] sm:$0xff] }
 0x248   : > { %1533 = vperm.xlu0 %2527, %v3069_v46   ;;  %v2546_v38 = vpop.eup %2545  ;;  %v1350_v59 = vadd.f32 0.001, %v1334_v37  ;;  %v1436_v22 = vsub.f32 %v1404_v9, %v1420_v49  ;;  %v1422_v23 = vmul.f32 %v3082_v29, %v2999_v24  ;;  %v1421_v26 = vmul.f32 %v3085_v34, %v3005_v42  ;;  %v1408_v24 = vld [vmem:[%s4343_s3 + $0x48] sm:$0xff]  ;;  %v1407_v42 = vld [vmem:[%s4343_s3 + $0x40] sm:$0xff]  ;;  %v2343_v9 = vld [vmem:[%s4344_s4 + $0x278] sm:$0xff] }
 0x249   : > { %v2548_v41 = vpop.eup %2547  ;;  %v1392_v47 = vmul.f32 %v2546_v38, %v1376_v36  ;;  %v1349_v50 = vadd.f32 0.001, %v1333_v2  ;;  %v1435_v11 = vsub.f32 %v1403_v61, %v1419_v40  ;;  %v2341_v49 = vld [vmem:[%s4344_s4 + $0x268] sm:$0xff] }
 0x24a   : > { %v2550_v51 = vpop.eup %2549  ;;  %v1391_v53 = vmul.f32 %v2548_v41, %v1375_v39  ;;  %2557 = vrsqrt.f32 %v1350_v59  ;;  %v1438_v46 = vsub.f32 %v1406_v7, %v1422_v23  ;;  %v1437_v36 = vsub.f32 %v1405_v16, %v1421_v26  ;;  %v1452_v7 = vld [vmem:[%s4344_s4 + $0x28] sm:$0xff]  ;;  %v1453_v26 = vld [vmem:[%s4344_s4 + $0x30] sm:$0xff]  ;;  %v1454_v16 = vld [vmem:[%s4344_s4 + $0x38] sm:$0xff] }
 0x24b   : > { %1548 = vperm.xlu1 %2528, %v3082_v29   ;;  %2559 = vrsqrt.f32 %v1349_v50  ;;  %v1394_v63 = vmul.f32 %v2550_v51, %v1378_v3  ;;  %v1424_v31 = vmul.f32 %v1392_v47, %v3009_v8  ;;  %v1410_v8 = vld [vmem:[%s4343_s3 + $0x58] sm:$0xff] }
 0x24c   : > { %1543 = vperm.xlu0 %2527, %v3085_v34   ;;  %v2552_v57 = vpop.eup %2551  ;;  %v1423_v29 = vmul.f32 %v1391_v53, %v3011_v30  ;;  %v1409_v30 = vld [vmem:[%s4343_s3 + $0x50] sm:$0xff] }
 0x24d   : > { %v2554_v0 = vpop.eup %2553  ;;  %v1393_v1 = vmul.f32 %v2552_v57, %v1377_v54  ;;  %v1440_v34 = vsub.f32 %v1408_v24, %v1424_v31  ;;  %v1426_v37 = vmul.f32 %v1394_v63, %v3015_v55  ;;  %v1412_v55 = vld [vmem:[%s4343_s3 + $0x68] sm:$0xff] }
 0x24e   : > { %v1396_v19 = vmul.f32 %v2554_v0, %v1380_v5  ;;  %v1439_v38 = vsub.f32 %v1407_v42, %v1423_v29  ;;  %v1458_v0 = vld [vmem:[%s4344_s4 + $0x58] sm:$0xff]  ;;  %v2337_v5 = vld [vmem:[%s4344_s4 + $0x248] sm:$0xff]  ;;  %v2332_v29 = vld [vmem:[%s4344_s4 + $0x220] sm:$0xff] }
 0x24f   : > { %1558 = vperm.xlu1 %2528, %v1392_v47   ;;  %v2556_v6 = vpop.eup %2555  ;;  %v1425_v39 = vmul.f32 %v1393_v1, %v3021_v13  ;;  %v1442_v2 = vsub.f32 %v1410_v8, %v1426_v37  ;;  %v1411_v13 = vld [vmem:[%s4343_s3 + $0x60] sm:$0xff]  ;;  %v2333_v42 = vld [vmem:[%s4344_s4 + $0x228] sm:$0xff]  ;;  %v2335_v37 = vld [vmem:[%s4344_s4 + $0x238] sm:$0xff] }
 0x250   : > { %1553 = vperm.xlu0 %2527, %v1391_v53   ;;  %v1395_v25 = vmul.f32 %v2556_v6, %v1379_v18  ;;  %v1428_v41 = vmul.f32 %v1396_v19, %v3026_v21  ;;  %v1414_v21 = vld [vmem:[%s4343_s3 + $0x78] sm:$0xff]  ;;  %v2338_v6 = vld [vmem:[%s4344_s4 + $0x250] sm:$0xff] }
 0x251   : > { %v1441_v59 = vsub.f32 %v1409_v30, %v1425_v39  ;;  %v2339_v18 = vld [vmem:[%s4344_s4 + $0x258] sm:$0xff] }
 0x252   : > { %v1427_v47 = vmul.f32 %v1395_v25, %v3033_v58  ;;  %v1444_v50 = vsub.f32 %v1412_v55, %v1428_v41  ;;  %v1413_v58 = vld [vmem:[%s4343_s3 + $0x70] sm:$0xff]  ;;  %v1467_v41 = vld [vmem:[%s4344_s4 + $0xa0] sm:$0xff] }
 0x253   : > { %1568 = vperm.xlu1 %2528, %v1394_v63   ;;  %v1456_v63 = vld [vmem:[%s4344_s4 + $0x48] sm:$0xff]  ;;  %v1469_v55 = vld [vmem:[%s4344_s4 + $0xb0] sm:$0xff] }
 0x254   : > { %1563 = vperm.xlu0 %2527, %v1393_v1   ;;  %v2558_v33 = vpop.eup %2557  ;;  %v1443_v53 = vsub.f32 %v1411_v13, %v1427_v47  ;;  %v2336_v1 = vld [vmem:[%s4344_s4 + $0x240] sm:$0xff]  ;;  %v1470_v47 = vld [vmem:[%s4344_s4 + $0xb8] sm:$0xff] }
 0x255   : > { %v2560_v35 = vpop.eup %2559  ;;  %v1398_v43 = vmul.f32 %v2558_v33, %v1382_v28  ;;  %v1449_v28 = vld [vmem:[%s4344_s4 + $0x10] sm:$0xff]  ;;  %v2328_v33 = vld [vmem:[%s4344_s4 + $0x200] sm:$0xff] }
 0x256   : > { %v1397_v10 = vmul.f32 %v2560_v35, %v1381_v32  ;;  %v1450_v32 = vld [vmem:[%s4344_s4 + $0x18] sm:$0xff]  ;;  %v2329_v35 = vld [vmem:[%s4344_s4 + $0x208] sm:$0xff] }
 0x257   : > { %1578 = vperm.xlu1 %2528, %v1396_v19   ;;  %v1430_v51 = vmul.f32 %v1398_v43, %v3061_v62  ;;  %v1455_v62 = vld [vmem:[%s4344_s4 + $0x40] sm:$0xff] }
 0x258   : > { %1573 = vperm.xlu0 %2527, %v1395_v25   ;;  %v1429_v3 = vmul.f32 %v1397_v10, %v3066_v12  ;;  %v1457_v12 = vld [vmem:[%s4344_s4 + $0x50] sm:$0xff]  ;;  %v1447_v19 = vld [vmem:[%s4344_s4] sm:$0xff]  ;;  %v1448_v25 = vld [vmem:[%s4344_s4 + $0x8] sm:$0xff] }
 0x259   : > { %v1446_v54 = vsub.f32 %v1414_v21, %v1430_v51 }
 0x25a   : > { %v1445_v57 = vsub.f32 %v1413_v58, %v1429_v3  ;;  %v2348_v3 = vld [vmem:[%s4344_s4 + $0x2a0] sm:$0xff]  ;;  %v2349_v58 = vld [vmem:[%s4344_s4 + $0x2a8] sm:$0xff] }
 0x25b   : > { %1588 = vperm.xlu1 %2528, %v1398_v43   ;;  %v2330_v43 = vld [vmem:[%s4344_s4 + $0x210] sm:$0xff] }
 0x25c   : > { %1583 = vperm.xlu0 %2527, %v1397_v10   ;;  %v1459_v10 = vld [vmem:[%s4344_s4 + $0x60] sm:$0xff] }
 0x25f   : > { %1662 = vperm.xlu1 %2528, %v1432_v15   ;;  %v1462_v15 = vld [vmem:[%s4344_s4 + $0x78] sm:$0xff] }
 0x260   : > { %1657 = vperm.xlu0 %2527, %v1431_v27  }
 0x263   : > { %1672 = vperm.xlu1 %2528, %v1434_v20   ;;  %v2340_v20 = vld [vmem:[%s4344_s4 + $0x260] sm:$0xff] }
 0x264   : > { %1667 = vperm.xlu0 %2527, %v1433_v45   ;;  %v2342_v45 = vld [vmem:[%s4344_s4 + $0x270] sm:$0xff] }
 0x267   : > { %1682 = vperm.xlu1 %2528, %v1436_v22  }
 0x268   : > { %1677 = vperm.xlu0 %2527, %v1435_v11   ;;  %v1451_v11 = vld [vmem:[%s4344_s4 + $0x20] sm:$0xff] }
 0x26b   : > { %1692 = vperm.xlu1 %2528, %v1438_v46  }
 0x26c   : > { %1687 = vperm.xlu0 %2527, %v1437_v36  }
 0x26f   : > { %1702 = vperm.xlu1 %2528, %v1440_v34   ;;  %v2334_v34 = vld [vmem:[%s4344_s4 + $0x230] sm:$0xff] }
 0x270   : > { %1697 = vperm.xlu0 %2527, %v1439_v38  }
 0x273   : > { %1712 = vperm.xlu1 %2528, %v1442_v2  }
 0x274   : > { %1707 = vperm.xlu0 %2527, %v1441_v59   ;;  %v1468_v59 = vld [vmem:[%s4344_s4 + $0xa8] sm:$0xff] }
 0x277   : > { %1722 = vperm.xlu1 %2528, %v1444_v50  }
 0x278   : > { %1717 = vperm.xlu0 %2527, %v1443_v53  }
 0x27b   : > { %1732 = vperm.xlu1 %2528, %v1446_v54   ;;  %v2350_v54 = vld [vmem:[%s4344_s4 + $0x2b0] sm:$0xff] }
 0x27c   : > { %1727 = vperm.xlu0 %2527, %v1445_v57   ;;  %v2351_v57 = vld [vmem:[%s4344_s4 + $0x2b8] sm:$0xff] }
 0x2be   : > { %v1524_v44 = vpop.permute.xlu1 %1523 }
 0x2bf   : > { %v3245_v17 = vmul.f32 %v1524_v44, %v1455_v62  ;;  %v3247_v60 = vmul.f32 %v1524_v44, %v1456_v63  ;;  %v3249_v27 = vmul.f32 %v1524_v44, %v1457_v12  ;;  %v3251_v52 = vmul.f32 %v1524_v44, %v1458_v0  ;;  %v1514_v4 = vpop.permute.xlu0 %1513 }
 0x2c0   : > { %v3265_v40 = vmul.f32 %v2336_v1, %v1524_v44  ;;  %v3267_v61 = vmul.f32 %v2337_v5, %v1524_v44  ;;  %v3269_v22 = vmul.f32 %v2338_v6, %v1524_v44  ;;  %v3271_v23 = vmul.f32 %v2339_v18, %v1524_v44  ;;  %v1463_v1 = vld [vmem:[%s4344_s4 + $0x80] sm:$0xff]  ;;  %v1464_v5 = vld [vmem:[%s4344_s4 + $0x88] sm:$0xff]  ;;  %v1465_v6 = vld [vmem:[%s4344_s4 + $0x90] sm:$0xff] }
 0x2c1   : > { %v3285_v46 = vmul.f32 %v1514_v4, %v1447_v19  ;;  %v3287_v31 = vmul.f32 %v1514_v4, %v1448_v25  ;;  %v3289_v36 = vmul.f32 %v1514_v4, %v1449_v28  ;;  %v3291_v24 = vmul.f32 %v1514_v4, %v1450_v32  ;;  %v1466_v18 = vld [vmem:[%s4344_s4 + $0x98] sm:$0xff] }
 0x2c2   : > { %v3305_v38 = vmul.f32 %v2328_v33, %v1514_v4  ;;  %v3307_v8 = vmul.f32 %v2329_v35, %v1514_v4  ;;  %v3309_v39 = vmul.f32 %v2330_v43, %v1514_v4  ;;  %v3311_v30 = vmul.f32 %v2331_v56, %v1514_v4  ;;  %v1529_v2 = vpop.permute.xlu1 %1528  ;;  %v2344_v33 = vld [vmem:[%s4344_s4 + $0x280] sm:$0xff]  ;;  %v2345_v35 = vld [vmem:[%s4344_s4 + $0x288] sm:$0xff]  ;;  %v2346_v43 = vld [vmem:[%s4344_s4 + $0x290] sm:$0xff] }
 0x2c3   : > { %v3325_v13 = vmul.f32 %v1529_v2, %v1459_v10  ;;  %v3327_v50 = vmul.f32 %v1529_v2, %v1460_v48  ;;  %v3329_v51 = vmul.f32 %v1529_v2, %v1461_v14  ;;  %v3331_v53 = vmul.f32 %v1529_v2, %v1462_v15  ;;  %v1519_v21 = vpop.permute.xlu0 %1518  ;;  %v2347_v56 = vld [vmem:[%s4344_s4 + $0x298] sm:$0xff]  ;;  %v1475_v4 = vld [vmem:[%s4344_s4 + $0xe0] sm:$0xff] }
 0x2c4   : > { %v3345_v62 = vmul.f32 %v2340_v20, %v1529_v2  ;;  %v3347_v63 = vmul.f32 %v2341_v49, %v1529_v2  ;;  %v3349_v12 = vmul.f32 %v2342_v45, %v1529_v2  ;;  %v3351_v0 = vmul.f32 %v2343_v9, %v1529_v2  ;;  %v1476_v20 = vld [vmem:[%s4344_s4 + $0xe8] sm:$0xff]  ;;  %v1477_v49 = vld [vmem:[%s4344_s4 + $0xf0] sm:$0xff]  ;;  %v1478_v45 = vld [vmem:[%s4344_s4 + $0xf8] sm:$0xff] }
 0x2c5   : > { %v3365_v19 = vmul.f32 %v1519_v21, %v1451_v11  ;;  %v3367_v25 = vmul.f32 %v1519_v21, %v1452_v7  ;;  %v3369_v28 = vmul.f32 %v1519_v21, %v1453_v26  ;;  %v3371_v32 = vmul.f32 %v1519_v21, %v1454_v16 }
 0x2c6   : > { %v3385_v44 = vmul.f32 %v2332_v29, %v1519_v21  ;;  %v3387_v10 = vmul.f32 %v2333_v42, %v1519_v21  ;;  %v3389_v48 = vmul.f32 %v2334_v34, %v1519_v21  ;;  %v3391_v14 = vmul.f32 %v2335_v37, %v1519_v21  ;;  %v1539_v15 = vpop.permute.xlu1 %1538  ;;  %v2356_v29 = vld [vmem:[%s4344_s4 + $0x2e0] sm:$0xff]  ;;  %v2357_v42 = vld [vmem:[%s4344_s4 + $0x2e8] sm:$0xff]  ;;  %v2358_v34 = vld [vmem:[%s4344_s4 + $0x2f0] sm:$0xff] }
 0x2c7   : > { %v3405_v9 = vmul.f32 %v1539_v15, %v1467_v41  ;;  %v3407_v11 = vmul.f32 %v1539_v15, %v1468_v59  ;;  %v3409_v7 = vmul.f32 %v1539_v15, %v1469_v55  ;;  %v3411_v26 = vmul.f32 %v1539_v15, %v1470_v47  ;;  %v1534_v16 = vpop.permute.xlu0 %1533  ;;  %v2359_v37 = vld [vmem:[%s4344_s4 + $0x2f8] sm:$0xff]  ;;  %v1471_v47 = vld [vmem:[%s4344_s4 + $0xc0] sm:$0xff]  ;;  %v1472_v21 = vld [vmem:[%s4344_s4 + $0xc8] sm:$0xff] }
 0x2c8   : > { %v3425_v2 = vmul.f32 %v2348_v3, %v1539_v15  ;;  %v3427_v41 = vmul.f32 %v2349_v58, %v1539_v15  ;;  %v3429_v59 = vmul.f32 %v2350_v54, %v1539_v15  ;;  %v3431_v55 = vmul.f32 %v2351_v57, %v1539_v15  ;;  %v1474_v3 = vld [vmem:[%s4344_s4 + $0xd8] sm:$0xff] }
 0x2c9   : > { %4345 = vst [vmem:[#allocation4_spill] sm:$0xff] %v3411_v26  ;;  %v1473_v26 = vld [vmem:[%s4344_s4 + $0xd0] sm:$0xff]  ;;  %v3445_v58 = vmul.f32 %v1534_v16, %v1463_v1  ;;  %v3447_v54 = vmul.f32 %v1534_v16, %v1464_v5  ;;  %v3449_v57 = vmul.f32 %v1534_v16, %v1465_v6  ;;  %v3451_v15 = vmul.f32 %v1534_v16, %v1466_v18  ;;  %v2355_v1 = vld [vmem:[%s4344_s4 + $0x2d8] sm:$0xff] }
 0x2ca   : > { %4346 = vst [vmem:[#allocation5_spill] sm:$0xff] %v3425_v2  ;;  %4347 = vst [vmem:[#allocation6_spill] sm:$0xff] %v3427_v41  ;;  %v2354_v41 = vld [vmem:[%s4344_s4 + $0x2d0] sm:$0xff]  ;;  %v3465_v5 = vmul.f32 %v2344_v33, %v1534_v16  ;;  %v3467_v6 = vmul.f32 %v2345_v35, %v1534_v16  ;;  %v3469_v18 = vmul.f32 %v2346_v43, %v1534_v16  ;;  %v1486_v35 = vld [vmem:[%s4344_s4 + $0x138] sm:$0xff] }
 0x2cb   : > { %4348 = vst [vmem:[#allocation7_spill] sm:$0xff] %v3429_v59  ;;  %4349 = vst [vmem:[#allocation8_spill] sm:$0xff] %v3431_v55  ;;  %v2352_v55 = vld [vmem:[%s4344_s4 + $0x2c0] sm:$0xff]  ;;  %v2353_v59 = vld [vmem:[%s4344_s4 + $0x2c8] sm:$0xff] }
 0x2cc   : > { %4350 = vst [vmem:[#allocation9_spill] sm:$0xff] %v3445_v58  ;;  %4351 = vst [vmem:[#allocation10_spill] sm:$0xff] %v3447_v54  ;;  %v1483_v54 = vld [vmem:[%s4344_s4 + $0x120] sm:$0xff]  ;;  %v1484_v58 = vld [vmem:[%s4344_s4 + $0x128] sm:$0xff] }
 0x2cd   : > { %4352 = vst [vmem:[#allocation11_spill] sm:$0xff] %v3449_v57  ;;  %4353 = vst [vmem:[#allocation12_spill] sm:$0xff] %v3451_v15  ;;  %v3471_v15 = vmul.f32 %v2347_v56, %v1534_v16  ;;  %v1549_v57 = vpop.permute.xlu1 %1548  ;;  %v1485_v33 = vld [vmem:[%s4344_s4 + $0x130] sm:$0xff] }
 0x2ce   : > { %4354 = vst [vmem:[#allocation13_spill] sm:$0xff] %v3465_v5  ;;  %4355 = vst [vmem:[#allocation14_spill] sm:$0xff] %v3467_v6  ;;  %v3485_v43 = vmul.f32 %v1549_v57, %v1475_v4  ;;  %v3487_v56 = vmul.f32 %v1549_v57, %v1476_v20  ;;  %v3489_v16 = vmul.f32 %v1549_v57, %v1477_v49  ;;  %v2364_v6 = vld [vmem:[%s4344_s4 + $0x320] sm:$0xff]  ;;  %v2365_v5 = vld [vmem:[%s4344_s4 + $0x328] sm:$0xff] }
 0x2cf   : > { %4356 = vst [vmem:[#allocation15_spill] sm:$0xff] %v3469_v18  ;;  %4357 = vst [vmem:[#allocation16_spill] sm:$0xff] %v3471_v15  ;;  %v3491_v15 = vmul.f32 %v1549_v57, %v1478_v45  ;;  %v1544_v18 = vpop.permute.xlu0 %1543  ;;  %v2366_v4 = vld [vmem:[%s4344_s4 + $0x330] sm:$0xff]  ;;  %v2367_v20 = vld [vmem:[%s4344_s4 + $0x338] sm:$0xff]  ;;  %v3505_v49 = vmul.f32 %v2356_v29, %v1549_v57  ;;  %v3507_v45 = vmul.f32 %v2357_v42, %v1549_v57 }
 0x2d0   : > { %4358 = vst [vmem:[#allocation17_spill] sm:$0xff] %v3485_v43  ;;  %4359 = vst [vmem:[#allocation18_spill] sm:$0xff] %v3487_v56  ;;  %v1479_v56 = vld [vmem:[%s4344_s4 + $0x100] sm:$0xff]  ;;  %v1480_v43 = vld [vmem:[%s4344_s4 + $0x108] sm:$0xff]  ;;  %v3525_v42 = vmul.f32 %v1544_v18, %v1471_v47 }
 0x2d1   : > { %4360 = vst [vmem:[#allocation19_spill] sm:$0xff] %v3489_v16  ;;  %4361 = vst [vmem:[#allocation20_spill] sm:$0xff] %v3491_v15  ;;  %v3509_v15 = vmul.f32 %v2358_v34, %v1549_v57  ;;  %v3511_v16 = vmul.f32 %v2359_v37, %v1549_v57  ;;  %v1481_v2 = vld [vmem:[%s4344_s4 + $0x110] sm:$0xff]  ;;  %v1482_v29 = vld [vmem:[%s4344_s4 + $0x118] sm:$0xff]  ;;  %v3527_v34 = vmul.f32 %v1544_v18, %v1472_v21 }
 0x2d2   : > { %4362 = vst [vmem:[#allocation21_spill] sm:$0xff] %v3505_v49  ;;  %4363 = vst [vmem:[#allocation22_spill] sm:$0xff] %v3507_v45  ;;  %v3529_v37 = vmul.f32 %v1544_v18, %v1473_v26  ;;  %v3531_v57 = vmul.f32 %v1544_v18, %v1474_v3  ;;  %v2362_v45 = vld [vmem:[%s4344_s4 + $0x310] sm:$0xff]  ;;  %v2363_v47 = vld [vmem:[%s4344_s4 + $0x318] sm:$0xff]  ;;  %v3545_v26 = vmul.f32 %v2352_v55, %v1544_v18 }
 0x2d3   : > { %4364 = vst [vmem:[#allocation23_spill] sm:$0xff] %v3509_v15  ;;  %4365 = vst [vmem:[#allocation24_spill] sm:$0xff] %v3511_v16  ;;  %v2360_v16 = vld [vmem:[%s4344_s4 + $0x300] sm:$0xff]  ;;  %v2361_v15 = vld [vmem:[%s4344_s4 + $0x308] sm:$0xff]  ;;  %v3547_v21 = vmul.f32 %v2353_v59, %v1544_v18  ;;  %v3549_v3 = vmul.f32 %v2354_v41, %v1544_v18 }
 0x2d4   : > { %4366 = vst [vmem:[#allocation25_spill] sm:$0xff] %v3525_v42  ;;  %4367 = vst [vmem:[#allocation26_spill] sm:$0xff] %v3527_v34  ;;  %v1491_v34 = vld [vmem:[%s4344_s4 + $0x160] sm:$0xff]  ;;  %v1492_v42 = vld [vmem:[%s4344_s4 + $0x168] sm:$0xff] }
 0x2d5   : > { %4368 = vst [vmem:[#allocation27_spill] sm:$0xff] %v3529_v37  ;;  %4369 = vst [vmem:[#allocation28_spill] sm:$0xff] %v3531_v57  ;;  %v3551_v57 = vmul.f32 %v2355_v1, %v1544_v18  ;;  %v1559_v37 = vpop.permute.xlu1 %1558  ;;  %v1493_v55 = vld [vmem:[%s4344_s4 + $0x170] sm:$0xff]  ;;  %v1494_v41 = vld [vmem:[%s4344_s4 + $0x178] sm:$0xff] }
 0x2d6   : > { %4370 = vst [vmem:[#allocation29_spill] sm:$0xff] %v3545_v26  ;;  %4371 = vst [vmem:[#allocation30_spill] sm:$0xff] %v3547_v21  ;;  %v3565_v59 = vmul.f32 %v1559_v37, %v1483_v54  ;;  %v3567_v1 = vmul.f32 %v1559_v37, %v1484_v58  ;;  %v3569_v18 = vmul.f32 %v1559_v37, %v1485_v33  ;;  %v2372_v21 = vld [vmem:[%s4344_s4 + $0x360] sm:$0xff]  ;;  %v2373_v26 = vld [vmem:[%s4344_s4 + $0x368] sm:$0xff] }
 0x2d7   : > { %4372 = vst [vmem:[#allocation31_spill] sm:$0xff] %v3549_v3  ;;  %4373 = vst [vmem:[#allocation32_spill] sm:$0xff] %v3551_v57  ;;  %v3571_v57 = vmul.f32 %v1559_v37, %v1486_v35  ;;  %v1554_v3 = vpop.permute.xlu0 %1553  ;;  %v2374_v54 = vld [vmem:[%s4344_s4 + $0x370] sm:$0xff]  ;;  %v2375_v58 = vld [vmem:[%s4344_s4 + $0x378] sm:$0xff]  ;;  %v3585_v33 = vmul.f32 %v2364_v6, %v1559_v37  ;;  %v3587_v35 = vmul.f32 %v2365_v5, %v1559_v37 }
 0x2d8   : > { %4374 = vst [vmem:[#allocation33_spill] sm:$0xff] %v3565_v59  ;;  %4375 = vst [vmem:[#allocation34_spill] sm:$0xff] %v3567_v1  ;;  %v1487_v1 = vld [vmem:[%s4344_s4 + $0x140] sm:$0xff]  ;;  %v1488_v59 = vld [vmem:[%s4344_s4 + $0x148] sm:$0xff]  ;;  %v3605_v6 = vmul.f32 %v1554_v3, %v1479_v56  ;;  %v3627_v56 = vmul.f32 %v2361_v15, %v1554_v3 }
 0x2d9   : > { %4376 = vst [vmem:[#allocation35_spill] sm:$0xff] %v3569_v18  ;;  %4377 = vst [vmem:[#allocation36_spill] sm:$0xff] %v3571_v57  ;;  %v3589_v57 = vmul.f32 %v2366_v4, %v1559_v37  ;;  %v3591_v18 = vmul.f32 %v2367_v20, %v1559_v37  ;;  %v1489_v49 = vld [vmem:[%s4344_s4 + $0x150] sm:$0xff]  ;;  %v1490_v5 = vld [vmem:[%s4344_s4 + $0x158] sm:$0xff]  ;;  %v3607_v4 = vmul.f32 %v1554_v3, %v1480_v43 }
 0x2da   : > { %4378 = vst [vmem:[#allocation37_spill] sm:$0xff] %v3585_v33  ;;  %4379 = vst [vmem:[#allocation38_spill] sm:$0xff] %v3587_v35  ;;  %v3609_v20 = vmul.f32 %v1554_v3, %v1481_v2  ;;  %v3611_v37 = vmul.f32 %v1554_v3, %v1482_v29  ;;  %v2370_v35 = vld [vmem:[%s4344_s4 + $0x350] sm:$0xff]  ;;  %v2371_v43 = vld [vmem:[%s4344_s4 + $0x358] sm:$0xff]  ;;  %v3625_v2 = vmul.f32 %v2360_v16, %v1554_v3 }
 0x2db   : > { %4380 = vst [vmem:[#allocation39_spill] sm:$0xff] %v3589_v57  ;;  %4381 = vst [vmem:[#allocation40_spill] sm:$0xff] %v3591_v18  ;;  %v2368_v18 = vld [vmem:[%s4344_s4 + $0x340] sm:$0xff]  ;;  %v2369_v57 = vld [vmem:[%s4344_s4 + $0x348] sm:$0xff]  ;;  %v3629_v29 = vmul.f32 %v2362_v45, %v1554_v3 }
 0x2dc   : > { %4382 = vst [vmem:[#allocation41_spill] sm:$0xff] %v3605_v6  ;;  %4383 = vst [vmem:[#allocation42_spill] sm:$0xff] %v3607_v4  ;;  %v1499_v4 = vld [vmem:[%s4344_s4 + $0x1a0] sm:$0xff]  ;;  %v1500_v6 = vld [vmem:[%s4344_s4 + $0x1a8] sm:$0xff] }
 0x2dd   : > { %4384 = vst [vmem:[#allocation43_spill] sm:$0xff] %v3609_v20  ;;  %4385 = vst [vmem:[#allocation44_spill] sm:$0xff] %v3611_v37  ;;  %v3631_v37 = vmul.f32 %v2363_v47, %v1554_v3  ;;  %v1569_v20 = vpop.permute.xlu1 %1568  ;;  %v1501_v16 = vld [vmem:[%s4344_s4 + $0x1b0] sm:$0xff]  ;;  %v1502_v15 = vld [vmem:[%s4344_s4 + $0x1b8] sm:$0xff] }
 0x2de   : > { %4386 = vst [vmem:[#allocation45_spill] sm:$0xff] %v3625_v2  ;;  %4387 = vst [vmem:[#allocation46_spill] sm:$0xff] %v3627_v56  ;;  %v3645_v45 = vmul.f32 %v1569_v20, %v1491_v34  ;;  %v3647_v47 = vmul.f32 %v1569_v20, %v1492_v42  ;;  %v3649_v3 = vmul.f32 %v1569_v20, %v1493_v55  ;;  %v2380_v56 = vld [vmem:[%s4344_s4 + $0x3a0] sm:$0xff]  ;;  %v2381_v2 = vld [vmem:[%s4344_s4 + $0x3a8] sm:$0xff] }
 0x2df   : > { %4388 = vst [vmem:[#allocation47_spill] sm:$0xff] %v3629_v29  ;;  %4389 = vst [vmem:[#allocation48_spill] sm:$0xff] %v3631_v37  ;;  %v3651_v37 = vmul.f32 %v1569_v20, %v1494_v41  ;;  %v1564_v29 = vpop.permute.xlu0 %1563  ;;  %v2382_v34 = vld [vmem:[%s4344_s4 + $0x3b0] sm:$0xff]  ;;  %v2383_v42 = vld [vmem:[%s4344_s4 + $0x3b8] sm:$0xff]  ;;  %v3665_v55 = vmul.f32 %v2372_v21, %v1569_v20  ;;  %v3667_v41 = vmul.f32 %v2373_v26, %v1569_v20 }
 0x2e0   : > { %4390 = vst [vmem:[#allocation49_spill] sm:$0xff] %v3645_v45  ;;  %4391 = vst [vmem:[#allocation50_spill] sm:$0xff] %v3647_v47  ;;  %v1495_v47 = vld [vmem:[%s4344_s4 + $0x180] sm:$0xff]  ;;  %v1496_v45 = vld [vmem:[%s4344_s4 + $0x188] sm:$0xff]  ;;  %v3682_v21 = vmul.f32 %v1564_v29, %v1487_v1  ;;  %v3684_v26 = vmul.f32 %v1564_v29, %v1488_v59  ;;  %v3699_v1 = vmul.f32 %v2368_v18, %v1564_v29 }
 0x2e1   : > { %4392 = vst [vmem:[#allocation51_spill] sm:$0xff] %v3649_v3  ;;  %4393 = vst [vmem:[#allocation52_spill] sm:$0xff] %v3651_v37  ;;  %v3669_v37 = vmul.f32 %v2374_v54, %v1569_v20  ;;  %v3671_v3 = vmul.f32 %v2375_v58, %v1569_v20  ;;  %v1497_v33 = vld [vmem:[%s4344_s4 + $0x190] sm:$0xff]  ;;  %v3686_v54 = vmul.f32 %v1564_v29, %v1489_v49  ;;  %v1498_v20 = vld [vmem:[%s4344_s4 + $0x198] sm:$0xff] }
 0x2e2   : > { %4396 = vst [vmem:[#allocation55_spill] sm:$0xff] %v3684_v26  ;;  %v3688_v58 = vmul.f32 %v1564_v29, %v1490_v5  ;;  %4399 = vst [vmem:[#allocation58_spill] sm:$0xff] %v3699_v1  ;;  %v3701_v59 = vmul.f32 %v2369_v57, %v1564_v29  ;;  %v3703_v49 = vmul.f32 %v2370_v35, %v1564_v29  ;;  %v2379_v26 = vld [vmem:[%s4344_s4 + $0x398] sm:$0xff]  ;;  %v1507_v18 = vld [vmem:[%s4344_s4 + $0x1e0] sm:$0xff] }
 0x2e3   : > { %4394 = vst [vmem:[#allocation53_spill] sm:$0xff] %v3669_v37  ;;  %4395 = vst [vmem:[#allocation54_spill] sm:$0xff] %v3671_v3  ;;  %v2376_v3 = vld [vmem:[%s4344_s4 + $0x380] sm:$0xff]  ;;  %v2377_v37 = vld [vmem:[%s4344_s4 + $0x388] sm:$0xff]  ;;  %v3705_v5 = vmul.f32 %v2371_v43, %v1564_v29  ;;  %v1574_v29 = vpop.permute.xlu0 %1573 }
 0x2e4   : > { %4397 = vst [vmem:[#allocation56_spill] sm:$0xff] %v3686_v54  ;;  %4398 = vst [vmem:[#allocation57_spill] sm:$0xff] %v3688_v58  ;;  %v1579_v58 = vpop.permute.xlu1 %1578  ;;  %v2378_v54 = vld [vmem:[%s4344_s4 + $0x390] sm:$0xff] }
 0x2e5   : > { %4400 = vst [vmem:[#allocation59_spill] sm:$0xff] %v3703_v49  ;;  %4401 = vst [vmem:[#allocation60_spill] sm:$0xff] %v3705_v5  ;;  %v3716_v1 = vmul.f32 %v1579_v58, %v1499_v4  ;;  %v3718_v57 = vmul.f32 %v1579_v58, %v1500_v6  ;;  %v3720_v35 = vmul.f32 %v1579_v58, %v1501_v16  ;;  %v1508_v5 = vld [vmem:[%s4344_s4 + $0x1e8] sm:$0xff]  ;;  %v1509_v49 = vld [vmem:[%s4344_s4 + $0x1f0] sm:$0xff] }
 0x2e6   : > { %v3722_v43 = vmul.f32 %v1579_v58, %v1502_v15  ;;  %v1510_v4 = vld [vmem:[%s4344_s4 + $0x1f8] sm:$0xff]  ;;  %v3735_v6 = vmul.f32 %v2381_v2, %v1579_v58  ;;  %v3737_v16 = vmul.f32 %v2382_v34, %v1579_v58  ;;  %v3739_v15 = vmul.f32 %v2383_v42, %v1579_v58 }
 0x2e7   : > { %4402 = vst [vmem:[#allocation61_spill] sm:$0xff] %v3716_v1  ;;  %4403 = vst [vmem:[#allocation62_spill] sm:$0xff] %v3718_v57  ;;  %v3733_v1 = vmul.f32 %v2380_v56, %v1579_v58  ;;  %v2390_v57 = vld [vmem:[%s4344_s4 + $0x3f0] sm:$0xff]  ;;  %v3750_v56 = vmul.f32 %v1574_v29, %v1495_v47  ;;  %v3752_v2 = vmul.f32 %v1574_v29, %v1496_v45  ;;  %v2391_v58 = vld [vmem:[%s4344_s4 + $0x3f8] sm:$0xff] }
 0x2e8   : > { %4404 = vst [vmem:[#allocation63_spill] sm:$0xff] %v3720_v35  ;;  %4405 = vst [vmem:[#allocation64_spill] sm:$0xff] %v3722_v43  ;;  %v2388_v43 = vld [vmem:[%s4344_s4 + $0x3e0] sm:$0xff]  ;;  %v2389_v35 = vld [vmem:[%s4344_s4 + $0x3e8] sm:$0xff]  ;;  %v3754_v34 = vmul.f32 %v1574_v29, %v1497_v33  ;;  %v3756_v42 = vmul.f32 %v1574_v29, %v1498_v20  ;;  %v3767_v47 = vmul.f32 %v2376_v3, %v1574_v29 }
 0x2e9   : > { %4406 = vst [vmem:[#allocation65_spill] sm:$0xff] %v3733_v1  ;;  %4407 = vst [vmem:[#allocation66_spill] sm:$0xff] %v3735_v6  ;;  %v3769_v45 = vmul.f32 %v2377_v37, %v1574_v29  ;;  %v3771_v33 = vmul.f32 %v2378_v54, %v1574_v29  ;;  %v3773_v20 = vmul.f32 %v2379_v26, %v1574_v29  ;;  %v2384_v3 = vld [vmem:[%s4344_s4 + $0x3c0] sm:$0xff] }
 0x2ea   : > { %4408 = vst [vmem:[#allocation67_spill] sm:$0xff] %v3737_v16  ;;  %4409 = vst [vmem:[#allocation68_spill] sm:$0xff] %v3739_v15  ;;  %v1503_v15 = vld [vmem:[%s4344_s4 + $0x1c0] sm:$0xff]  ;;  %v1504_v16 = vld [vmem:[%s4344_s4 + $0x1c8] sm:$0xff] }
 0x2eb   : > { %4410 = vst [vmem:[#allocation69_spill] sm:$0xff] %v3750_v56  ;;  %4411 = vst [vmem:[#allocation70_spill] sm:$0xff] %v3752_v2  ;;  %v1506_v2 = vld [vmem:[%s4344_s4 + $0x1d8] sm:$0xff] }
 0x2ec   : > { %4412 = vst [vmem:[#allocation71_spill] sm:$0xff] %v3754_v34  ;;  %4413 = vst [vmem:[#allocation72_spill] sm:$0xff] %v3756_v42  ;;  %v1589_v42 = vpop.permute.xlu1 %1588  ;;  %v1505_v34 = vld [vmem:[%s4344_s4 + $0x1d0] sm:$0xff] }
 0x2ed   : > { %4414 = vst [vmem:[#allocation73_spill] sm:$0xff] %v3767_v47  ;;  %4415 = vst [vmem:[#allocation74_spill] sm:$0xff] %v3769_v45  ;;  %v1584_v47 = vpop.permute.xlu0 %1583  ;;  %v3784_v37 = vmul.f32 %v1589_v42, %v1507_v18  ;;  %v3786_v54 = vmul.f32 %v1589_v42, %v1508_v5  ;;  %v3788_v26 = vmul.f32 %v1589_v42, %v1509_v49  ;;  %v2387_v45 = vld [vmem:[%s4344_s4 + $0x3d8] sm:$0xff] }
 0x2ee   : > { %4416 = vst [vmem:[#allocation75_spill] sm:$0xff] %v3771_v33  ;;  %4417 = vst [vmem:[#allocation76_spill] sm:$0xff] %v3773_v20  ;;  %v3790_v29 = vmul.f32 %v1589_v42, %v1510_v4  ;;  %v2385_v20 = vld [vmem:[%s4344_s4 + $0x3c8] sm:$0xff]  ;;  %v2386_v33 = vld [vmem:[%s4344_s4 + $0x3d0] sm:$0xff]  ;;  %v3801_v18 = vmul.f32 %v2388_v43, %v1589_v42  ;;  %v3803_v5 = vmul.f32 %v2389_v35, %v1589_v42 }
 0x2ef   : > { %4418 = vst [vmem:[#allocation77_spill] sm:$0xff] %v3784_v37  ;;  %4419 = vst [vmem:[#allocation78_spill] sm:$0xff] %v3786_v54  ;;  %v3805_v49 = vmul.f32 %v2390_v57, %v1589_v42  ;;  %v3807_v4 = vmul.f32 %v2391_v58, %v1589_v42  ;;  %v3813_v54 = vmul.f32 %v1584_v47, %v1505_v34 }
 0x2f0   : > { %4420 = vst [vmem:[#allocation79_spill] sm:$0xff] %v3788_v26  ;;  %4421 = vst [vmem:[#allocation80_spill] sm:$0xff] %v3790_v29  ;;  %v3809_v29 = vmul.f32 %v1584_v47, %v1503_v15  ;;  %v3811_v26 = vmul.f32 %v1584_v47, %v1504_v16  ;;  %v3815_v37 = vmul.f32 %v1584_v47, %v1506_v2  ;;  %v1663_v56 = vpop.permute.xlu1 %1662 }
 0x2f1   : > { %v3817_v6 = vmul.f32 %v2384_v3, %v1584_v47  ;;  %v3819_v1 = vmul.f32 %v2385_v20, %v1584_v47  ;;  %v3821_v43 = vmul.f32 %v2386_v33, %v1584_v47  ;;  %v3823_v35 = vmul.f32 %v2387_v45, %v1584_v47  ;;  %v1658_v33 = vpop.permute.xlu0 %1657 }
 0x2f2   : > { %v1739_v57 = vadd.f32 %v1663_v56, %v3365_v19  ;;  %v1740_v15 = vadd.f32 %v1663_v56, %v3367_v25  ;;  %v1741_v16 = vadd.f32 %v1663_v56, %v3369_v28  ;;  %v1742_v34 = vadd.f32 %v1663_v56, %v3371_v32 }
 0x2f3   : > { %4422 = vst [vmem:[#allocation81_spill] sm:$0xff] %v3819_v1  ;;  %4423 = vst [vmem:[#allocation82_spill] sm:$0xff] %v3821_v43  ;;  %v2060_v2 = vadd.f32 %v3385_v44, %v1663_v56  ;;  %v2061_v42 = vadd.f32 %v3387_v10, %v1663_v56  ;;  %v2062_v58 = vadd.f32 %v3389_v48, %v1663_v56 }
 0x2f4   : > { %4424 = vst [vmem:[#allocation83_spill] sm:$0xff] %v3823_v35  ;;  %v2063_v20 = vadd.f32 %v3391_v14, %v1663_v56  ;;  %v1803_v3 = vmax.f32 %v1739_v57, 0.0  ;;  %v1804_v47 = vmax.f32 %v1740_v15, 0.0  ;;  %v1805_v45 = vmax.f32 %v1741_v16, 0.0  ;;  %v1673_v48 = vpop.permute.xlu1 %1672 }
 0x2f5   : > { %v1806_v35 = vmax.f32 %v1742_v34, 0.0  ;;  %v2124_v19 = vmax.f32 %v2060_v2, 0.0  ;;  %v2125_v43 = vmax.f32 %v2061_v42, 0.0  ;;  %v2126_v25 = vmax.f32 %v2062_v58, 0.0 }
 0x2f6   : > { %v2127_v1 = vmax.f32 %v2063_v20, 0.0  ;;  %1867 = vst [vmem:[%s4344_s4 + $0x20] sm:$0xff] %v1803_v3  ;;  %1868 = vst [vmem:[%s4344_s4 + $0x28] sm:$0xff] %v1804_v47  ;;  %v1735_v28 = vadd.f32 %v1658_v33, %v3285_v46  ;;  %v1736_v32 = vadd.f32 %v1658_v33, %v3287_v31  ;;  %v1737_v44 = vadd.f32 %v1658_v33, %v3289_v36 }
 0x2f7   : > { %1869 = vst [vmem:[%s4344_s4 + $0x30] sm:$0xff] %v1805_v45  ;;  %1870 = vst [vmem:[%s4344_s4 + $0x38] sm:$0xff] %v1806_v35  ;;  %v1738_v10 = vadd.f32 %v1658_v33, %v3291_v24  ;;  %v2056_v46 = vadd.f32 %v3305_v38, %v1658_v33  ;;  %v2057_v31 = vadd.f32 %v3307_v8, %v1658_v33 }
 0x2f8   : > { %2396 = vst [vmem:[%s4344_s4 + $0x220] sm:$0xff] %v2124_v19  ;;  %2397 = vst [vmem:[%s4344_s4 + $0x228] sm:$0xff] %v2125_v43  ;;  %v2058_v36 = vadd.f32 %v3309_v39, %v1658_v33  ;;  %v2059_v24 = vadd.f32 %v3311_v30, %v1658_v33  ;;  %v1799_v14 = vmax.f32 %v1735_v28, 0.0  ;;  %v1800_v56 = vmax.f32 %v1736_v32, 0.0  ;;  %v1683_v19 = vpop.permute.xlu1 %1682 }
 0x2f9   : > { %2398 = vst [vmem:[%s4344_s4 + $0x230] sm:$0xff] %v2126_v25  ;;  %2399 = vst [vmem:[%s4344_s4 + $0x238] sm:$0xff] %v2127_v1  ;;  %v1801_v43 = vmax.f32 %v1737_v44, 0.0  ;;  %v1802_v35 = vmax.f32 %v1738_v10, 0.0  ;;  %v2120_v57 = vmax.f32 %v2056_v46, 0.0  ;;  %v2121_v15 = vmax.f32 %v2057_v31, 0.0  ;;  %v1668_v1 = vpop.permute.xlu0 %1667 }
 0x2fa   : > { %v2122_v16 = vmax.f32 %v2058_v36, 0.0  ;;  %v2123_v34 = vmax.f32 %v2059_v24, 0.0  ;;  %1863 = vst [vmem:[%s4344_s4] sm:$0xff] %v1799_v14  ;;  %1864 = vst [vmem:[%s4344_s4 + $0x8] sm:$0xff] %v1800_v56  ;;  %v1747_v38 = vadd.f32 %v1673_v48, %v3325_v13  ;;  %v1748_v8 = vadd.f32 %v1673_v48, %v3327_v50  ;;  %v4428_v14 = vld [vmem:[#allocation7_spill] sm:$0xff] }
 0x2fb   : > { %1865 = vst [vmem:[%s4344_s4 + $0x10] sm:$0xff] %v1801_v43  ;;  %1866 = vst [vmem:[%s4344_s4 + $0x18] sm:$0xff] %v1802_v35  ;;  %v1749_v39 = vadd.f32 %v1673_v48, %v3329_v51  ;;  %v1750_v30 = vadd.f32 %v1673_v48, %v3331_v53  ;;  %v2068_v13 = vadd.f32 %v3345_v62, %v1673_v48  ;;  %v4429_v43 = vld [vmem:[#allocation8_spill] sm:$0xff] }
 0x2fc   : > { %2392 = vst [vmem:[%s4344_s4 + $0x200] sm:$0xff] %v2120_v57  ;;  %2393 = vst [vmem:[%s4344_s4 + $0x208] sm:$0xff] %v2121_v15  ;;  %v2069_v50 = vadd.f32 %v3347_v63, %v1673_v48  ;;  %v2070_v51 = vadd.f32 %v3349_v12, %v1673_v48  ;;  %v2071_v53 = vadd.f32 %v3351_v0, %v1673_v48  ;;  %v1811_v2 = vmax.f32 %v1747_v38, 0.0 }
 0x2fd   : > { %2394 = vst [vmem:[%s4344_s4 + $0x210] sm:$0xff] %v2122_v16  ;;  %2395 = vst [vmem:[%s4344_s4 + $0x218] sm:$0xff] %v2123_v34  ;;  %v1812_v42 = vmax.f32 %v1748_v8, 0.0  ;;  %v1813_v58 = vmax.f32 %v1749_v39, 0.0  ;;  %v1814_v20 = vmax.f32 %v1750_v30, 0.0  ;;  %v2132_v33 = vmax.f32 %v2068_v13, 0.0  ;;  %v1678_v57 = vpop.permute.xlu0 %1677 }
 0x2fe   : > { %v2133_v3 = vmax.f32 %v2069_v50, 0.0  ;;  %v2134_v47 = vmax.f32 %v2070_v51, 0.0  ;;  %v2135_v45 = vmax.f32 %v2071_v53, 0.0  ;;  %1875 = vst [vmem:[%s4344_s4 + $0x60] sm:$0xff] %v1811_v2  ;;  %v1743_v62 = vadd.f32 %v1668_v1, %v3245_v17  ;;  %v4430_v50 = vld [vmem:[#allocation9_spill] sm:$0xff]  ;;  %v4431_v53 = vld [vmem:[#allocation10_spill] sm:$0xff] }
 0x2ff   : > { %1876 = vst [vmem:[%s4344_s4 + $0x68] sm:$0xff] %v1812_v42  ;;  %1877 = vst [vmem:[%s4344_s4 + $0x70] sm:$0xff] %v1813_v58  ;;  %v1744_v63 = vadd.f32 %v1668_v1, %v3247_v60  ;;  %v1745_v12 = vadd.f32 %v1668_v1, %v3249_v27  ;;  %v1746_v0 = vadd.f32 %v1668_v1, %v3251_v52  ;;  %v4432_v2 = vld [vmem:[#allocation11_spill] sm:$0xff]  ;;  %v4433_v58 = vld [vmem:[#allocation12_spill] sm:$0xff] }
 0x300   : > { %1878 = vst [vmem:[%s4344_s4 + $0x78] sm:$0xff] %v1814_v20  ;;  %2404 = vst [vmem:[%s4344_s4 + $0x260] sm:$0xff] %v2132_v33  ;;  %v2064_v17 = vadd.f32 %v3265_v40, %v1668_v1  ;;  %v2065_v60 = vadd.f32 %v3267_v61, %v1668_v1  ;;  %v2066_v27 = vadd.f32 %v3269_v22, %v1668_v1  ;;  %v1807_v25 = vmax.f32 %v1743_v62, 0.0  ;;  %v4434_v33 = vld [vmem:[#allocation13_spill] sm:$0xff]  ;;  %v4436_v62 = vld [vmem:[#allocation15_spill] sm:$0xff] }
 0x301   : > { %2405 = vst [vmem:[%s4344_s4 + $0x268] sm:$0xff] %v2133_v3  ;;  %2406 = vst [vmem:[%s4344_s4 + $0x270] sm:$0xff] %v2134_v47  ;;  %v2067_v52 = vadd.f32 %v3271_v23, %v1668_v1  ;;  %v1808_v28 = vmax.f32 %v1744_v63, 0.0  ;;  %v1809_v32 = vmax.f32 %v1745_v12, 0.0  ;;  %v1810_v44 = vmax.f32 %v1746_v0, 0.0  ;;  %v4425_v23 = vld [vmem:[#allocation4_spill] sm:$0xff] }
 0x302   : > { %2407 = vst [vmem:[%s4344_s4 + $0x278] sm:$0xff] %v2135_v45  ;;  %v2128_v10 = vmax.f32 %v2064_v17, 0.0  ;;  %v2129_v46 = vmax.f32 %v2065_v60, 0.0  ;;  %v2130_v31 = vmax.f32 %v2066_v27, 0.0  ;;  %1871 = vst [vmem:[%s4344_s4 + $0x40] sm:$0xff] %v1807_v25  ;;  %v1755_v40 = vadd.f32 %v1683_v19, %v3405_v9  ;;  %v4426_v9 = vld [vmem:[#allocation5_spill] sm:$0xff]  ;;  %v1693_v17 = vpop.permute.xlu1 %1692 }
 0x303   : > { %v2131_v36 = vmax.f32 %v2067_v52, 0.0  ;;  %1872 = vst [vmem:[%s4344_s4 + $0x48] sm:$0xff] %v1808_v28  ;;  %1873 = vst [vmem:[%s4344_s4 + $0x50] sm:$0xff] %v1809_v32  ;;  %v1756_v61 = vadd.f32 %v1683_v19, %v3407_v11  ;;  %v1757_v22 = vadd.f32 %v1683_v19, %v3409_v7  ;;  %v1758_v24 = vadd.f32 %v1683_v19, %v4425_v23  ;;  %v4427_v7 = vld [vmem:[#allocation6_spill] sm:$0xff]  ;;  %v4437_v12 = vld [vmem:[#allocation16_spill] sm:$0xff] }
 0x304   : > { %1874 = vst [vmem:[%s4344_s4 + $0x58] sm:$0xff] %v1810_v44  ;;  %2400 = vst [vmem:[%s4344_s4 + $0x240] sm:$0xff] %v2128_v10  ;;  %v2076_v11 = vadd.f32 %v4426_v9, %v1683_v19  ;;  %v2077_v48 = vadd.f32 %v4427_v7, %v1683_v19  ;;  %v2078_v56 = vadd.f32 %v4428_v14, %v1683_v19  ;;  %v1819_v15 = vmax.f32 %v1755_v40, 0.0  ;;  %v4435_v47 = vld [vmem:[#allocation14_spill] sm:$0xff]  ;;  %v4438_v10 = vld [vmem:[#allocation17_spill] sm:$0xff] }
 0x305   : > { %2401 = vst [vmem:[%s4344_s4 + $0x248] sm:$0xff] %v2129_v46  ;;  %2402 = vst [vmem:[%s4344_s4 + $0x250] sm:$0xff] %v2130_v31  ;;  %v2079_v35 = vadd.f32 %v4429_v43, %v1683_v19  ;;  %v1820_v16 = vmax.f32 %v1756_v61, 0.0  ;;  %v1821_v34 = vmax.f32 %v1757_v22, 0.0  ;;  %v1822_v38 = vmax.f32 %v1758_v24, 0.0  ;;  %v4439_v31 = vld [vmem:[#allocation18_spill] sm:$0xff] }
 0x306   : > { %2403 = vst [vmem:[%s4344_s4 + $0x258] sm:$0xff] %v2131_v36  ;;  %v2140_v8 = vmax.f32 %v2076_v11, 0.0  ;;  %v2141_v39 = vmax.f32 %v2077_v48, 0.0  ;;  %v2142_v30 = vmax.f32 %v2078_v56, 0.0  ;;  %1883 = vst [vmem:[%s4344_s4 + $0xa0] sm:$0xff] %v1819_v15  ;;  %v1751_v51 = vadd.f32 %v1678_v57, %v4430_v50  ;;  %v4440_v40 = vld [vmem:[#allocation19_spill] sm:$0xff] }
 0x307   : > { %v2143_v13 = vmax.f32 %v2079_v35, 0.0  ;;  %1884 = vst [vmem:[%s4344_s4 + $0xa8] sm:$0xff] %v1820_v16  ;;  %1885 = vst [vmem:[%s4344_s4 + $0xb0] sm:$0xff] %v1821_v34  ;;  %v1752_v1 = vadd.f32 %v1678_v57, %v4431_v53  ;;  %v1753_v42 = vadd.f32 %v1678_v57, %v4432_v2  ;;  %v1754_v20 = vadd.f32 %v1678_v57, %v4433_v58  ;;  %v4441_v22 = vld [vmem:[#allocation20_spill] sm:$0xff]  ;;  %v4442_v24 = vld [vmem:[#allocation21_spill] sm:$0xff]  ;;  %v1688_v35 = vpop.permute.xlu0 %1687 }
 0x308   : > { %1886 = vst [vmem:[%s4344_s4 + $0xb8] sm:$0xff] %v1822_v38  ;;  %2412 = vst [vmem:[%s4344_s4 + $0x2a0] sm:$0xff] %v2140_v8  ;;  %v2072_v3 = vadd.f32 %v4434_v33, %v1678_v57  ;;  %v2073_v45 = vadd.f32 %v4435_v47, %v1678_v57  ;;  %v2074_v63 = vadd.f32 %v4436_v62, %v1678_v57  ;;  %v1815_v60 = vmax.f32 %v1751_v51, 0.0  ;;  %v4443_v11 = vld [vmem:[#allocation22_spill] sm:$0xff]  ;;  %v4444_v48 = vld [vmem:[#allocation23_spill] sm:$0xff] }
 0x309   : > { %2413 = vst [vmem:[%s4344_s4 + $0x2a8] sm:$0xff] %v2141_v39  ;;  %2414 = vst [vmem:[%s4344_s4 + $0x2b0] sm:$0xff] %v2142_v30  ;;  %v2075_v0 = vadd.f32 %v4437_v12, %v1678_v57  ;;  %v1816_v27 = vmax.f32 %v1752_v1, 0.0  ;;  %v1817_v52 = vmax.f32 %v1753_v42, 0.0  ;;  %v1818_v19 = vmax.f32 %v1754_v20, 0.0  ;;  %v4445_v56 = vld [vmem:[#allocation24_spill] sm:$0xff] }
 0x30a   : > { %2415 = vst [vmem:[%s4344_s4 + $0x2b8] sm:$0xff] %v2143_v13  ;;  %v2136_v25 = vmax.f32 %v2072_v3, 0.0  ;;  %v2137_v28 = vmax.f32 %v2073_v45, 0.0  ;;  %v2138_v32 = vmax.f32 %v2074_v63, 0.0  ;;  %1879 = vst [vmem:[%s4344_s4 + $0x80] sm:$0xff] %v1815_v60  ;;  %v1763_v46 = vadd.f32 %v1693_v17, %v4438_v10  ;;  %v4446_v13 = vld [vmem:[#allocation25_spill] sm:$0xff] }
 0x30b   : > { %v2139_v44 = vmax.f32 %v2075_v0, 0.0  ;;  %1880 = vst [vmem:[%s4344_s4 + $0x88] sm:$0xff] %v1816_v27  ;;  %1881 = vst [vmem:[%s4344_s4 + $0x90] sm:$0xff] %v1817_v52  ;;  %v1764_v36 = vadd.f32 %v1693_v17, %v4439_v31  ;;  %v1765_v61 = vadd.f32 %v1693_v17, %v4440_v40  ;;  %v1766_v23 = vadd.f32 %v1693_v17, %v4441_v22  ;;  %v4447_v51 = vld [vmem:[#allocation26_spill] sm:$0xff]  ;;  %v4448_v1 = vld [vmem:[#allocation27_spill] sm:$0xff]  ;;  %v1703_v0 = vpop.permute.xlu1 %1702 }
 0x30c   : > { %1882 = vst [vmem:[%s4344_s4 + $0x98] sm:$0xff] %v1818_v19  ;;  %2408 = vst [vmem:[%s4344_s4 + $0x280] sm:$0xff] %v2136_v25  ;;  %v2084_v9 = vadd.f32 %v4442_v24, %v1693_v17  ;;  %v2085_v7 = vadd.f32 %v4443_v11, %v1693_v17  ;;  %v2086_v14 = vadd.f32 %v4444_v48, %v1693_v17  ;;  %v1827_v57 = vmax.f32 %v1763_v46, 0.0  ;;  %v4449_v42 = vld [vmem:[#allocation28_spill] sm:$0xff]  ;;  %v4450_v20 = vld [vmem:[#allocation29_spill] sm:$0xff] }
 0x30d   : > { %2409 = vst [vmem:[%s4344_s4 + $0x288] sm:$0xff] %v2137_v28  ;;  %2410 = vst [vmem:[%s4344_s4 + $0x290] sm:$0xff] %v2138_v32  ;;  %v2087_v43 = vadd.f32 %v4445_v56, %v1693_v17  ;;  %v1828_v15 = vmax.f32 %v1764_v36, 0.0  ;;  %v1829_v16 = vmax.f32 %v1765_v61, 0.0  ;;  %v1830_v34 = vmax.f32 %v1766_v23, 0.0  ;;  %v4451_v3 = vld [vmem:[#allocation30_spill] sm:$0xff] }
 0x30e   : > { %2411 = vst [vmem:[%s4344_s4 + $0x298] sm:$0xff] %v2139_v44  ;;  %v2148_v38 = vmax.f32 %v2084_v9, 0.0  ;;  %v2149_v8 = vmax.f32 %v2085_v7, 0.0  ;;  %v2150_v39 = vmax.f32 %v2086_v14, 0.0  ;;  %1891 = vst [vmem:[%s4344_s4 + $0xe0] sm:$0xff] %v1827_v57  ;;  %v1759_v50 = vadd.f32 %v1688_v35, %v4446_v13  ;;  %v4452_v45 = vld [vmem:[#allocation31_spill] sm:$0xff] }
 0x30f   : > { %v2151_v30 = vmax.f32 %v2087_v43, 0.0  ;;  %1892 = vst [vmem:[%s4344_s4 + $0xe8] sm:$0xff] %v1828_v15  ;;  %1893 = vst [vmem:[%s4344_s4 + $0xf0] sm:$0xff] %v1829_v16  ;;  %v1760_v53 = vadd.f32 %v1688_v35, %v4447_v51  ;;  %v1761_v2 = vadd.f32 %v1688_v35, %v4448_v1  ;;  %v1762_v58 = vadd.f32 %v1688_v35, %v4449_v42  ;;  %v4453_v63 = vld [vmem:[#allocation32_spill] sm:$0xff]  ;;  %v4454_v44 = vld [vmem:[#allocation33_spill] sm:$0xff]  ;;  %v1698_v43 = vpop.permute.xlu0 %1697 }
 0x310   : > { %1894 = vst [vmem:[%s4344_s4 + $0xf8] sm:$0xff] %v1830_v34  ;;  %2420 = vst [vmem:[%s4344_s4 + $0x2e0] sm:$0xff] %v2148_v38  ;;  %v2080_v33 = vadd.f32 %v4450_v20, %v1688_v35  ;;  %v2081_v47 = vadd.f32 %v4451_v3, %v1688_v35  ;;  %v2082_v62 = vadd.f32 %v4452_v45, %v1688_v35  ;;  %v1823_v17 = vmax.f32 %v1759_v50, 0.0  ;;  %v4455_v46 = vld [vmem:[#allocation34_spill] sm:$0xff]  ;;  %v4456_v36 = vld [vmem:[#allocation35_spill] sm:$0xff] }
 0x311   : > { %2421 = vst [vmem:[%s4344_s4 + $0x2e8] sm:$0xff] %v2149_v8  ;;  %2422 = vst [vmem:[%s4344_s4 + $0x2f0] sm:$0xff] %v2150_v39  ;;  %v2083_v12 = vadd.f32 %v4453_v63, %v1688_v35  ;;  %v1824_v60 = vmax.f32 %v1760_v53, 0.0  ;;  %v1825_v27 = vmax.f32 %v1761_v2, 0.0  ;;  %v1826_v52 = vmax.f32 %v1762_v58, 0.0  ;;  %v4457_v61 = vld [vmem:[#allocation36_spill] sm:$0xff] }
 0x312   : > { %2423 = vst [vmem:[%s4344_s4 + $0x2f8] sm:$0xff] %v2151_v30  ;;  %v2144_v19 = vmax.f32 %v2080_v33, 0.0  ;;  %v2145_v25 = vmax.f32 %v2081_v47, 0.0  ;;  %v2146_v28 = vmax.f32 %v2082_v62, 0.0  ;;  %1887 = vst [vmem:[%s4344_s4 + $0xc0] sm:$0xff] %v1823_v17  ;;  %v1771_v10 = vadd.f32 %v1703_v0, %v4454_v44  ;;  %v4458_v23 = vld [vmem:[#allocation37_spill] sm:$0xff] }
 0x313   : > { %v2147_v32 = vmax.f32 %v2083_v12, 0.0  ;;  %1888 = vst [vmem:[%s4344_s4 + $0xc8] sm:$0xff] %v1824_v60  ;;  %1889 = vst [vmem:[%s4344_s4 + $0xd0] sm:$0xff] %v1825_v27  ;;  %v1772_v31 = vadd.f32 %v1703_v0, %v4455_v46  ;;  %v1773_v40 = vadd.f32 %v1703_v0, %v4456_v36  ;;  %v1774_v22 = vadd.f32 %v1703_v0, %v4457_v61  ;;  %v4459_v9 = vld [vmem:[#allocation38_spill] sm:$0xff]  ;;  %v4460_v7 = vld [vmem:[#allocation39_spill] sm:$0xff]  ;;  %v1713_v12 = vpop.permute.xlu1 %1712 }
 0x314   : > { %1890 = vst [vmem:[%s4344_s4 + $0xd8] sm:$0xff] %v1826_v52  ;;  %2416 = vst [vmem:[%s4344_s4 + $0x2c0] sm:$0xff] %v2144_v19  ;;  %v2092_v24 = vadd.f32 %v4458_v23, %v1703_v0  ;;  %v2093_v11 = vadd.f32 %v4459_v9, %v1703_v0  ;;  %v2094_v48 = vadd.f32 %v4460_v7, %v1703_v0  ;;  %v4461_v14 = vld [vmem:[#allocation40_spill] sm:$0xff]  ;;  %v1835_v35 = vmax.f32 %v1771_v10, 0.0  ;;  %v4462_v30 = vld [vmem:[#allocation41_spill] sm:$0xff] }
 0x315   : > { %2417 = vst [vmem:[%s4344_s4 + $0x2c8] sm:$0xff] %v2145_v25  ;;  %2418 = vst [vmem:[%s4344_s4 + $0x2d0] sm:$0xff] %v2146_v28  ;;  %v2095_v56 = vadd.f32 %v4461_v14, %v1703_v0  ;;  %v1836_v57 = vmax.f32 %v1772_v31, 0.0  ;;  %v1837_v15 = vmax.f32 %v1773_v40, 0.0  ;;  %v1838_v16 = vmax.f32 %v1774_v22, 0.0  ;;  %v4463_v50 = vld [vmem:[#allocation42_spill] sm:$0xff] }
 0x316   : > { %2419 = vst [vmem:[%s4344_s4 + $0x2d8] sm:$0xff] %v2147_v32  ;;  %v2156_v34 = vmax.f32 %v2092_v24, 0.0  ;;  %v2157_v38 = vmax.f32 %v2093_v11, 0.0  ;;  %v2158_v8 = vmax.f32 %v2094_v48, 0.0  ;;  %1899 = vst [vmem:[%s4344_s4 + $0x120] sm:$0xff] %v1835_v35  ;;  %v1767_v13 = vadd.f32 %v1698_v43, %v4462_v30  ;;  %v4464_v53 = vld [vmem:[#allocation43_spill] sm:$0xff]  ;;  %v1708_v48 = vpop.permute.xlu0 %1707 }
 0x317   : > { %v2159_v39 = vmax.f32 %v2095_v56, 0.0  ;;  %1900 = vst [vmem:[%s4344_s4 + $0x128] sm:$0xff] %v1836_v57  ;;  %1901 = vst [vmem:[%s4344_s4 + $0x130] sm:$0xff] %v1837_v15  ;;  %v1768_v51 = vadd.f32 %v1698_v43, %v4463_v50  ;;  %v1769_v1 = vadd.f32 %v1698_v43, %v4464_v53  ;;  %v4465_v2 = vld [vmem:[#allocation44_spill] sm:$0xff]  ;;  %v4466_v58 = vld [vmem:[#allocation45_spill] sm:$0xff]  ;;  %v2100_v22 = vadd.f32 %v3665_v55, %v1713_v12 }
 0x318   : > { %1902 = vst [vmem:[%s4344_s4 + $0x138] sm:$0xff] %v1838_v16  ;;  %v1770_v42 = vadd.f32 %v1698_v43, %v4465_v2  ;;  %2428 = vst [vmem:[%s4344_s4 + $0x320] sm:$0xff] %v2156_v34  ;;  %v2088_v20 = vadd.f32 %v4466_v58, %v1698_v43  ;;  %v4467_v33 = vld [vmem:[#allocation46_spill] sm:$0xff]  ;;  %v4468_v47 = vld [vmem:[#allocation47_spill] sm:$0xff]  ;;  %v1831_v0 = vmax.f32 %v1767_v13, 0.0  ;;  %v2101_v23 = vadd.f32 %v3667_v41, %v1713_v12  ;;  %v1723_v58 = vpop.permute.xlu1 %1722 }
 0x319   : > { %2429 = vst [vmem:[%s4344_s4 + $0x328] sm:$0xff] %v2157_v38  ;;  %2430 = vst [vmem:[%s4344_s4 + $0x330] sm:$0xff] %v2158_v8  ;;  %v2089_v3 = vadd.f32 %v4467_v33, %v1698_v43  ;;  %v2090_v45 = vadd.f32 %v4468_v47, %v1698_v43  ;;  %v4469_v62 = vld [vmem:[#allocation48_spill] sm:$0xff]  ;;  %v1832_v17 = vmax.f32 %v1768_v51, 0.0  ;;  %v1833_v60 = vmax.f32 %v1769_v1, 0.0  ;;  %v4470_v32 = vld [vmem:[#allocation49_spill] sm:$0xff] }
 0x31a   : > { %2431 = vst [vmem:[%s4344_s4 + $0x338] sm:$0xff] %v2159_v39  ;;  %v2091_v63 = vadd.f32 %v4469_v62, %v1698_v43  ;;  %v1834_v27 = vmax.f32 %v1770_v42, 0.0  ;;  %v2152_v52 = vmax.f32 %v2088_v20, 0.0  ;;  %1895 = vst [vmem:[%s4344_s4 + $0x100] sm:$0xff] %v1831_v0  ;;  %v1779_v44 = vadd.f32 %v1713_v12, %v4470_v32  ;;  %v4471_v10 = vld [vmem:[#allocation50_spill] sm:$0xff]  ;;  %v4472_v31 = vld [vmem:[#allocation51_spill] sm:$0xff] }
 0x31b   : > { %v2153_v19 = vmax.f32 %v2089_v3, 0.0  ;;  %v2154_v25 = vmax.f32 %v2090_v45, 0.0  ;;  %1896 = vst [vmem:[%s4344_s4 + $0x108] sm:$0xff] %v1832_v17  ;;  %1897 = vst [vmem:[%s4344_s4 + $0x110] sm:$0xff] %v1833_v60  ;;  %v1780_v46 = vadd.f32 %v1713_v12, %v4471_v10  ;;  %v1781_v36 = vadd.f32 %v1713_v12, %v4472_v31  ;;  %v4473_v40 = vld [vmem:[#allocation52_spill] sm:$0xff]  ;;  %v4474_v24 = vld [vmem:[#allocation53_spill] sm:$0xff] }
 0x31c   : > { %v2155_v28 = vmax.f32 %v2091_v63, 0.0  ;;  %1898 = vst [vmem:[%s4344_s4 + $0x118] sm:$0xff] %v1834_v27  ;;  %v1782_v61 = vadd.f32 %v1713_v12, %v4473_v40  ;;  %2424 = vst [vmem:[%s4344_s4 + $0x300] sm:$0xff] %v2152_v52  ;;  %v2102_v9 = vadd.f32 %v4474_v24, %v1713_v12  ;;  %v4475_v11 = vld [vmem:[#allocation54_spill] sm:$0xff]  ;;  %v1843_v14 = vmax.f32 %v1779_v44, 0.0  ;;  %v4476_v41 = vld [vmem:[#allocation55_spill] sm:$0xff] }
 0x31d   : > { %2425 = vst [vmem:[%s4344_s4 + $0x308] sm:$0xff] %v2153_v19  ;;  %2426 = vst [vmem:[%s4344_s4 + $0x310] sm:$0xff] %v2154_v25  ;;  %v2103_v7 = vadd.f32 %v4475_v11, %v1713_v12  ;;  %v1844_v56 = vmax.f32 %v1780_v46, 0.0  ;;  %v1845_v43 = vmax.f32 %v1781_v36, 0.0  ;;  %v2164_v57 = vmax.f32 %v2100_v22, 0.0  ;;  %v4477_v8 = vld [vmem:[#allocation56_spill] sm:$0xff] }
 0x31e   : > { %2427 = vst [vmem:[%s4344_s4 + $0x318] sm:$0xff] %v2155_v28  ;;  %v1846_v35 = vmax.f32 %v1782_v61, 0.0  ;;  %v2165_v15 = vmax.f32 %v2101_v23, 0.0  ;;  %v2166_v16 = vmax.f32 %v2102_v9, 0.0  ;;  %1907 = vst [vmem:[%s4344_s4 + $0x160] sm:$0xff] %v1843_v14  ;;  %v1775_v55 = vadd.f32 %v1708_v48, %v3682_v21  ;;  %v4478_v30 = vld [vmem:[#allocation57_spill] sm:$0xff]  ;;  %v1718_v61 = vpop.permute.xlu0 %1717 }
 0x31f   : > { %v2167_v34 = vmax.f32 %v2103_v7, 0.0  ;;  %1908 = vst [vmem:[%s4344_s4 + $0x168] sm:$0xff] %v1844_v56  ;;  %1909 = vst [vmem:[%s4344_s4 + $0x170] sm:$0xff] %v1845_v43  ;;  %v1776_v38 = vadd.f32 %v1708_v48, %v4476_v41  ;;  %v1777_v39 = vadd.f32 %v1708_v48, %v4477_v8  ;;  %v1778_v13 = vadd.f32 %v1708_v48, %v4478_v30  ;;  %v4479_v21 = vld [vmem:[#allocation58_spill] sm:$0xff]  ;;  %v4480_v53 = vld [vmem:[#allocation59_spill] sm:$0xff] }
 0x320   : > { %1910 = vst [vmem:[%s4344_s4 + $0x178] sm:$0xff] %v1846_v35  ;;  %2436 = vst [vmem:[%s4344_s4 + $0x360] sm:$0xff] %v2164_v57  ;;  %v2096_v50 = vadd.f32 %v4479_v21, %v1708_v48  ;;  %v2097_v51 = vadd.f32 %v3701_v59, %v1708_v48  ;;  %v2098_v1 = vadd.f32 %v4480_v53, %v1708_v48  ;;  %v4481_v2 = vld [vmem:[#allocation60_spill] sm:$0xff]  ;;  %v1839_v20 = vmax.f32 %v1775_v55, 0.0  ;;  %v4482_v59 = vld [vmem:[#allocation61_spill] sm:$0xff] }
 0x321   : > { %2437 = vst [vmem:[%s4344_s4 + $0x368] sm:$0xff] %v2165_v15  ;;  %2438 = vst [vmem:[%s4344_s4 + $0x370] sm:$0xff] %v2166_v16  ;;  %v2099_v42 = vadd.f32 %v4481_v2, %v1708_v48  ;;  %v1840_v33 = vmax.f32 %v1776_v38, 0.0  ;;  %v1841_v3 = vmax.f32 %v1777_v39, 0.0  ;;  %v1842_v47 = vmax.f32 %v1778_v13, 0.0  ;;  %v4483_v17 = vld [vmem:[#allocation62_spill] sm:$0xff] }
 0x322   : > { %2439 = vst [vmem:[%s4344_s4 + $0x378] sm:$0xff] %v2167_v34  ;;  %v2160_v45 = vmax.f32 %v2096_v50, 0.0  ;;  %v2161_v62 = vmax.f32 %v2097_v51, 0.0  ;;  %v2162_v63 = vmax.f32 %v2098_v1, 0.0  ;;  %1903 = vst [vmem:[%s4344_s4 + $0x140] sm:$0xff] %v1839_v20  ;;  %v1787_v0 = vadd.f32 %v1723_v58, %v4482_v59  ;;  %v4484_v27 = vld [vmem:[#allocation63_spill] sm:$0xff]  ;;  %v1733_v51 = vpop.permute.xlu1 %1732 }
 0x323   : > { %v2163_v12 = vmax.f32 %v2099_v42, 0.0  ;;  %1904 = vst [vmem:[%s4344_s4 + $0x148] sm:$0xff] %v1840_v33  ;;  %1905 = vst [vmem:[%s4344_s4 + $0x150] sm:$0xff] %v1841_v3  ;;  %v1788_v60 = vadd.f32 %v1723_v58, %v4483_v17  ;;  %v1789_v52 = vadd.f32 %v1723_v58, %v4484_v27  ;;  %v4485_v19 = vld [vmem:[#allocation64_spill] sm:$0xff]  ;;  %v4486_v28 = vld [vmem:[#allocation65_spill] sm:$0xff]  ;;  %v2117_v27 = vadd.f32 %v3803_v5, %v1733_v51 }
 0x324   : > { %1906 = vst [vmem:[%s4344_s4 + $0x158] sm:$0xff] %v1842_v47  ;;  %v1790_v25 = vadd.f32 %v1723_v58, %v4485_v19  ;;  %2432 = vst [vmem:[%s4344_s4 + $0x340] sm:$0xff] %v2160_v45  ;;  %v2108_v32 = vadd.f32 %v4486_v28, %v1723_v58  ;;  %v4487_v44 = vld [vmem:[#allocation66_spill] sm:$0xff]  ;;  %v4488_v46 = vld [vmem:[#allocation67_spill] sm:$0xff]  ;;  %v1851_v22 = vmax.f32 %v1787_v0, 0.0  ;;  %v2119_v19 = vadd.f32 %v3807_v4, %v1733_v51 }
 0x325   : > { %2433 = vst [vmem:[%s4344_s4 + $0x348] sm:$0xff] %v2161_v62  ;;  %2434 = vst [vmem:[%s4344_s4 + $0x350] sm:$0xff] %v2162_v63  ;;  %v2109_v10 = vadd.f32 %v4487_v44, %v1723_v58  ;;  %v2110_v31 = vadd.f32 %v4488_v46, %v1723_v58  ;;  %v4489_v36 = vld [vmem:[#allocation68_spill] sm:$0xff]  ;;  %v1852_v23 = vmax.f32 %v1788_v60, 0.0  ;;  %v1853_v24 = vmax.f32 %v1789_v52, 0.0  ;;  %v4490_v56 = vld [vmem:[#allocation69_spill] sm:$0xff] }
 0x326   : > { %2435 = vst [vmem:[%s4344_s4 + $0x358] sm:$0xff] %v2163_v12  ;;  %v2111_v40 = vadd.f32 %v4489_v36, %v1723_v58  ;;  %v1854_v9 = vmax.f32 %v1790_v25, 0.0  ;;  %v2172_v11 = vmax.f32 %v2108_v32, 0.0  ;;  %1915 = vst [vmem:[%s4344_s4 + $0x1a0] sm:$0xff] %v1851_v22  ;;  %v1783_v43 = vadd.f32 %v1718_v61, %v4490_v56  ;;  %v4491_v35 = vld [vmem:[#allocation70_spill] sm:$0xff]  ;;  %v4492_v15 = vld [vmem:[#allocation71_spill] sm:$0xff]  ;;  %v1728_v25 = vpop.permute.xlu0 %1727 }
 0x327   : > { %v2173_v7 = vmax.f32 %v2109_v10, 0.0  ;;  %v2174_v48 = vmax.f32 %v2110_v31, 0.0  ;;  %1916 = vst [vmem:[%s4344_s4 + $0x1a8] sm:$0xff] %v1852_v23  ;;  %1917 = vst [vmem:[%s4344_s4 + $0x1b0] sm:$0xff] %v1853_v24  ;;  %v1784_v57 = vadd.f32 %v1718_v61, %v4491_v35  ;;  %v1785_v16 = vadd.f32 %v1718_v61, %v4492_v15  ;;  %v4493_v34 = vld [vmem:[#allocation72_spill] sm:$0xff]  ;;  %v4494_v41 = vld [vmem:[#allocation73_spill] sm:$0xff] }
 0x328   : > { %v2175_v14 = vmax.f32 %v2111_v40, 0.0  ;;  %1918 = vst [vmem:[%s4344_s4 + $0x1b8] sm:$0xff] %v1854_v9  ;;  %v1786_v55 = vadd.f32 %v1718_v61, %v4493_v34  ;;  %2444 = vst [vmem:[%s4344_s4 + $0x3a0] sm:$0xff] %v2172_v11  ;;  %v2104_v38 = vadd.f32 %v4494_v41, %v1718_v61  ;;  %v4495_v8 = vld [vmem:[#allocation74_spill] sm:$0xff]  ;;  %v4496_v30 = vld [vmem:[#allocation75_spill] sm:$0xff]  ;;  %v1847_v53 = vmax.f32 %v1783_v43, 0.0 }
 0x329   : > { %2445 = vst [vmem:[%s4344_s4 + $0x3a8] sm:$0xff] %v2173_v7  ;;  %2446 = vst [vmem:[%s4344_s4 + $0x3b0] sm:$0xff] %v2174_v48  ;;  %v2105_v39 = vadd.f32 %v4495_v8, %v1718_v61  ;;  %v2106_v13 = vadd.f32 %v4496_v30, %v1718_v61  ;;  %v4497_v21 = vld [vmem:[#allocation76_spill] sm:$0xff]  ;;  %v1848_v1 = vmax.f32 %v1784_v57, 0.0  ;;  %v1849_v2 = vmax.f32 %v1785_v16, 0.0  ;;  %v4498_v47 = vld [vmem:[#allocation77_spill] sm:$0xff] }
 0x32a   : > { %2447 = vst [vmem:[%s4344_s4 + $0x3b8] sm:$0xff] %v2175_v14  ;;  %v2107_v50 = vadd.f32 %v4497_v21, %v1718_v61  ;;  %v1850_v42 = vmax.f32 %v1786_v55, 0.0  ;;  %v2168_v58 = vmax.f32 %v2104_v38, 0.0  ;;  %1911 = vst [vmem:[%s4344_s4 + $0x180] sm:$0xff] %v1847_v53  ;;  %v1795_v45 = vadd.f32 %v1733_v51, %v4498_v47  ;;  %v4499_v62 = vld [vmem:[#allocation78_spill] sm:$0xff]  ;;  %v4500_v12 = vld [vmem:[#allocation79_spill] sm:$0xff] }
 0x32b   : > { %v2169_v20 = vmax.f32 %v2105_v39, 0.0  ;;  %v2170_v33 = vmax.f32 %v2106_v13, 0.0  ;;  %1912 = vst [vmem:[%s4344_s4 + $0x188] sm:$0xff] %v1848_v1  ;;  %1913 = vst [vmem:[%s4344_s4 + $0x190] sm:$0xff] %v1849_v2  ;;  %v1796_v63 = vadd.f32 %v1733_v51, %v4499_v62  ;;  %v1797_v59 = vadd.f32 %v1733_v51, %v4500_v12  ;;  %v4501_v0 = vld [vmem:[#allocation80_spill] sm:$0xff]  ;;  %v4504_v22 = vld [vmem:[#allocation83_spill] sm:$0xff] }
 0x32c   : > { %v2171_v3 = vmax.f32 %v2107_v50, 0.0  ;;  %1914 = vst [vmem:[%s4344_s4 + $0x198] sm:$0xff] %v1850_v42  ;;  %v1798_v17 = vadd.f32 %v1733_v51, %v4501_v0  ;;  %2440 = vst [vmem:[%s4344_s4 + $0x380] sm:$0xff] %v2168_v58  ;;  %v2116_v60 = vadd.f32 %v3801_v18, %v1733_v51  ;;  %v2118_v52 = vadd.f32 %v3805_v49, %v1733_v51 }
 0x32d   : > { %2441 = vst [vmem:[%s4344_s4 + $0x388] sm:$0xff] %v2169_v20  ;;  %2442 = vst [vmem:[%s4344_s4 + $0x390] sm:$0xff] %v2170_v33  ;;  %v1859_v28 = vmax.f32 %v1795_v45, 0.0  ;;  %v1860_v32 = vmax.f32 %v1796_v63, 0.0  ;;  %v1861_v44 = vmax.f32 %v1797_v59, 0.0  ;;  %v2181_v31 = vmax.f32 %v2117_v27, 0.0 }
 0x32e   : > { %2443 = vst [vmem:[%s4344_s4 + $0x398] sm:$0xff] %v2171_v3  ;;  %v1862_v10 = vmax.f32 %v1798_v17, 0.0  ;;  %v2180_v46 = vmax.f32 %v2116_v60, 0.0  ;;  %v2182_v36 = vmax.f32 %v2118_v52, 0.0  ;;  %v2183_v40 = vmax.f32 %v2119_v19, 0.0 }
 0x32f   : > { %1923 = vst [vmem:[%s4344_s4 + $0x1e0] sm:$0xff] %v1859_v28  ;;  %1924 = vst [vmem:[%s4344_s4 + $0x1e8] sm:$0xff] %v1860_v32  ;;  %v1791_v18 = vadd.f32 %v1728_v25, %v3809_v29  ;;  %v1792_v5 = vadd.f32 %v1728_v25, %v3811_v26  ;;  %v1793_v49 = vadd.f32 %v1728_v25, %v3813_v54  ;;  %v4502_v26 = vld [vmem:[#allocation81_spill] sm:$0xff]  ;;  %v4503_v29 = vld [vmem:[#allocation82_spill] sm:$0xff] }
 0x330   : > { %1925 = vst [vmem:[%s4344_s4 + $0x1f0] sm:$0xff] %v1861_v44  ;;  %1926 = vst [vmem:[%s4344_s4 + $0x1f8] sm:$0xff] %v1862_v10  ;;  %v1794_v4 = vadd.f32 %v1728_v25, %v3815_v37  ;;  %v2112_v54 = vadd.f32 %v3817_v6, %v1728_v25  ;;  %v2113_v37 = vadd.f32 %v4502_v26, %v1728_v25 }
 0x331   : > { %2452 = vst [vmem:[%s4344_s4 + $0x3e0] sm:$0xff] %v2180_v46  ;;  %2453 = vst [vmem:[%s4344_s4 + $0x3e8] sm:$0xff] %v2181_v31  ;;  %v2114_v61 = vadd.f32 %v4503_v29, %v1728_v25  ;;  %v2115_v23 = vadd.f32 %v4504_v22, %v1728_v25  ;;  %v1855_v24 = vmax.f32 %v1791_v18, 0.0  ;;  %v1856_v9 = vmax.f32 %v1792_v5, 0.0 }
 0x332   : > { %2454 = vst [vmem:[%s4344_s4 + $0x3f0] sm:$0xff] %v2182_v36  ;;  %2455 = vst [vmem:[%s4344_s4 + $0x3f8] sm:$0xff] %v2183_v40  ;;  %v1857_v11 = vmax.f32 %v1793_v49, 0.0  ;;  %v1858_v7 = vmax.f32 %v1794_v4, 0.0  ;;  %v2176_v48 = vmax.f32 %v2112_v54, 0.0  ;;  %v2177_v14 = vmax.f32 %v2113_v37, 0.0 }
 0x333   : > { %v2178_v56 = vmax.f32 %v2114_v61, 0.0  ;;  %v2179_v43 = vmax.f32 %v2115_v23, 0.0  ;;  %1919 = vst [vmem:[%s4344_s4 + $0x1c0] sm:$0xff] %v1855_v24  ;;  %1920 = vst [vmem:[%s4344_s4 + $0x1c8] sm:$0xff] %v1856_v9 }
 0x334   : > { %1921 = vst [vmem:[%s4344_s4 + $0x1d0] sm:$0xff] %v1857_v11  ;;  %1922 = vst [vmem:[%s4344_s4 + $0x1d8] sm:$0xff] %v1858_v7 }
 0x335   : > { %2448 = vst [vmem:[%s4344_s4 + $0x3c0] sm:$0xff] %v2176_v48  ;;  %2449 = vst [vmem:[%s4344_s4 + $0x3c8] sm:$0xff] %v2177_v14 }
 0x336   : > { %2450 = vst [vmem:[%s4344_s4 + $0x3d0] sm:$0xff] %v2178_v56  ;;  %2451 = vst [vmem:[%s4344_s4 + $0x3d8] sm:$0xff] %v2179_v43 }
 0x337 PF: > { %s14_s15 = sadd.s32 1, %s2567_s15  }
 0x338   : > { %p11_p6 = scmp.ge.s32.totalorder %s14_s15, 4  }
 0x33a   :  { %13 = sbr.rel (!%p11_p6) target bundleno = 1 (0x1), region = 72 }

</bundles_post_ra>
